<compile_context>
chip_gen: v7x
topology: tpu7x:2x2x1
jax: 0.10.0
libtpu: 0.0.40
codegen_flags: <defaults>
</compile_context>

<pallas_src>
import functools
import math

import jax
import jax.numpy as jnp
import numpy as np
from jax.experimental import pallas as pl
from jax.experimental.pallas import tpu as pltpu

_INV_SQRT2 = 1.0 / math.sqrt(2.0)
_LN_EPS = 1e-5  # torch nn.LayerNorm default eps


def _gelu_exact(t):
    # matches torch nn.GELU() default (erf-based, exact)
    return 0.5 * t * (1.0 + jax.lax.erf(t * _INV_SQRT2))


def _fast_recip(t):
    # EUP approximate reciprocal (free bundle slot) + one Newton-Raphson step
    r = pl.reciprocal(t, approx=True)
    return r * (2.0 - t * r)


def _layernorm(t, gamma, beta):
    # single-pass: E[x] and E[x^2] reductions issue back-to-back into the XLU
    mu = jnp.mean(t, axis=-1, keepdims=True)
    ms = jnp.mean(t * t, axis=-1, keepdims=True)
    var = ms - mu * mu
    return (t - mu) * jax.lax.rsqrt(var + _LN_EPS) * gamma + beta


def _softmax_lastdim(t):
    m = jnp.max(t, axis=-1, keepdims=True)
    e = jnp.exp(t - m)
    return e * _fast_recip(jnp.sum(e, axis=-1, keepdims=True))


def latent_attention_kernel(
    x_ref, q_ref,
    ln_ref,            # (4, D)  : [gamma, beta, gamma_q, beta_q]
    wf1_ref, bf1_ref,  # (D, 2H), (1, 2H) : [w1 | w1q], [b1 | b1q]
    wf2_ref, bf2_ref,  # (2H, 2L), (1, 2L): blockdiag(w2, w2q), [b2 | b2q]
    out_ref,
    *, mm_dtype=jnp.float32,
):
    Bt, N, D = x_ref.shape
    _, M, _ = q_ref.shape
    L = wf2_ref.shape[1] // 2
    R = Bt * N  # row offset where the q-branch rows start in the stacked LHS

    # ---- hoist parameter loads once per grid step -------------------------
    ln = ln_ref[...]
    ln_g, ln_b = ln[0:1, :], ln[1:2, :]
    lnq_g, lnq_b = ln[2:3, :], ln[3:4, :]
    wf1, bf1 = wf1_ref[...], bf1_ref[...]
    wf2, bf2 = wf2_ref[...], bf2_ref[...]

    x = x_ref[...]                                   # (Bt, N, D) -- also the values `v`
    q = q_ref[...]                                   # (Bt, M, D)
    xf = x.astype(jnp.float32)
    qf = q.astype(jnp.float32)

    # ---- LayerNorms on flattened (batch*token, D) rows ---------------------
    xn = _layernorm(xf.reshape(Bt * N, D), ln_g, ln_b)    # (Bt*N, D)
    qn = _layernorm(qf.reshape(Bt * M, D), lnq_g, lnq_b)  # (Bt*M, D)

    # ---- fused MLP branches: one wide first layer + one block-diag second --
    lhs = jnp.concatenate([xn, qn], axis=0)                # (Bt*(N+M), D)
    h = _gelu_exact(
        jnp.dot(lhs.astype(mm_dtype), wf1.astype(mm_dtype),
                preferred_element_type=jnp.float32) + bf1)           # (rows, 2H)
    al = jnp.dot(h.astype(mm_dtype), wf2.astype(mm_dtype),
                 preferred_element_type=jnp.float32) + bf2           # (rows, 2L)

    a = al[:R, :L]        # x-branch latent scores (Bt*N, L)
    qa = al[R:, L:]       # q-branch latent scores (Bt*M, L)

    # softmax over latent dim (row-wise) for the query branch
    qs = _softmax_lastdim(qa).reshape(Bt, M, L)                       # (Bt, M, L)

    # softmax over the *token* axis for the input branch, without an explicit
    # (N, L) transpose: reduce over axis=1, then contract N directly.
    a3 = a.reshape(Bt, N, L)
    a_max = jnp.max(a3, axis=1, keepdims=True)
    a_exp = jnp.exp(a3 - a_max)
    a_sm = a_exp * _fast_recip(jnp.sum(a_exp, axis=1, keepdims=True))  # (Bt, N, L)

    # kv = softmax(a^T, -1) @ v  ==  'bnl,bnd->bld' (single batched dot_general)
    kv = jnp.einsum("bnl,bnd->bld", a_sm.astype(mm_dtype), xf.astype(mm_dtype),
                    preferred_element_type=jnp.float32)               # (Bt, L, D)
    out = jnp.einsum("bml,bld->bmd", qs.astype(mm_dtype), kv.astype(mm_dtype),
                     preferred_element_type=jnp.float32)              # (Bt, M, D)

    if len(out_ref.shape) == 2:
        # D < 128: lane-dense (Bt, M*D) slab -> unmasked vst
        out_ref[...] = out.reshape(Bt, M * D).astype(out_ref.dtype)
    else:
        # D >= 128: store (Bt, M, D) directly, no flatten relayout
        out_ref[...] = out.astype(out_ref.dtype)


def _pick_batch_tile(B, N, M, D, *, target_block_bytes=8 << 20, min_rows=256):
    """Batch tile Bt (multiple of 8 dividing B):
      * keeps the per-step f32 in+out blocks under `target_block_bytes`
      * prefers >=2 grid steps (v7x megacore) only when each step still has
        >= `min_rows` flattened MXU LHS rows; otherwise takes the biggest
        single/bigger step (v5e/v6e: no extra per-step pipeline overhead).
    """
    row_bytes = 4 * ((N + M) * D + M * D)
    cap = max(8, target_block_bytes // max(row_bytes, 1))
    candidates = [t for t in range(8, B + 1, 8) if B % t == 0 and t <= cap]
    if not candidates:
        return B
    multi = [t for t in candidates if B // t >= 2 and t * (N + M) >= min_rows]
    if multi:
        return max(multi)
    return max(candidates)


def latent_attention(x, q, params, *, batch_tile=None, use_bf16_matmul=False):
    B, N, D = x.shape
    _, M, _ = q.shape
    H = params["w1"].shape[1]
    L = params["w2"].shape[1]

    Bt = batch_tile if batch_tile is not None else _pick_batch_tile(B, N, M, D)
    assert B % Bt == 0, "batch tile must divide batch"
    # keep the stacked-LHS row split sublane-aligned (avoid silent relayouts)
    assert (Bt * N) % 8 == 0 and (Bt * M) % 8 == 0, \
        "Bt*N and Bt*M must be multiples of 8"
    grid = (B // Bt,)

    f32 = jnp.float32
    # ---- one-time host-side parameter packing (fewer, denser DMAs) --------
    ln_pack = jnp.concatenate(
        [params["ln_g"].reshape(1, D), params["ln_b"].reshape(1, D),
         params["lnq_g"].reshape(1, D), params["lnq_b"].reshape(1, D)],
        axis=0).astype(f32)                                           # (4, D)
    wf1 = jnp.concatenate([params["w1"], params["w1q"]], axis=1).astype(f32)   # (D, 2H)
    bf1 = jnp.concatenate([params["b1"].reshape(1, H),
                           params["b1q"].reshape(1, H)], axis=1).astype(f32)   # (1, 2H)
    zHL = jnp.zeros((H, L), f32)
    wf2 = jnp.concatenate(
        [jnp.concatenate([params["w2"].astype(f32), zHL], axis=1),
         jnp.concatenate([zHL, params["w2q"].astype(f32)], axis=1)],
        axis=0)                                                        # (2H, 2L)
    bf2 = jnp.concatenate([params["b2"].reshape(1, L),
                           params["b2q"].reshape(1, L)], axis=1).astype(f32)   # (1, 2L)

    def const(shape):
        nd = len(shape)
        return pl.BlockSpec(shape, lambda *_: (0,) * nd)

    # lane-dense flattened output only pays when D < 128 (sub-128 lane dim)
    flatten_out = D < 128
    if flatten_out:
        out_shape = jax.ShapeDtypeStruct((B, M * D), x.dtype)
        out_spec = pl.BlockSpec((Bt, M * D), lambda b: (b, 0))
    else:
        out_shape = jax.ShapeDtypeStruct((B, M, D), x.dtype)
        out_spec = pl.BlockSpec((Bt, M, D), lambda b: (b, 0, 0))

    grid_spec = pltpu.PrefetchScalarGridSpec(
        num_scalar_prefetch=0,
        grid=grid,
        in_specs=[
            pl.BlockSpec((Bt, N, D), lambda b: (b, 0, 0)),   # input tokens (values)
            pl.BlockSpec((Bt, M, D), lambda b: (b, 0, 0)),   # query tokens
            const((4, D)),                                   # packed LayerNorm params
            const((D, 2 * H)), const((1, 2 * H)),            # fused first layer
            const((2 * H, 2 * L)), const((1, 2 * L)),        # fused second layer
        ],
        out_specs=out_spec,
    )

    # VMEM budget from actual need; never allowed near v7x's 64 MiB ceiling.
    in_block_bytes = 4 * Bt * (N + M) * D
    out_block_bytes = 4 * Bt * M * D
    weight_bytes = 4 * (4 * D + 2 * D * H + 2 * H + 4 * H * L + 2 * L)
    need = 2 * (in_block_bytes + out_block_bytes + weight_bytes)   # double-buffered
    vmem_limit = int(min(48 * 2**20, max(4 * 2**20, 2 * need)))

    kernel = functools.partial(
        latent_attention_kernel,
        mm_dtype=jnp.bfloat16 if use_bf16_matmul else jnp.float32)

    out = pl.pallas_call(
        kernel,
        out_shape=out_shape,
        grid_spec=grid_spec,
        compiler_params=pltpu.CompilerParams(
            dimension_semantics=("parallel",),
            vmem_limit_bytes=vmem_limit,
        ),
    )(x, q, ln_pack, wf1, bf1, wf2, bf2)

    return out.reshape(B, M, D) if flatten_out else out


def latent_attention_reference(x, q, p):
    """Pure-JAX reference mirroring the PyTorch forward."""
    def ln(t, g, b):
        mu = jnp.mean(t, axis=-1, keepdims=True)
        var = jnp.mean(jnp.square(t - mu), axis=-1, keepdims=True)
        return (t - mu) / jnp.sqrt(var + _LN_EPS) * g + b

    def mlp(t, w1, b1, w2, b2):
        return _gelu_exact(t @ w1 + b1) @ w2 + b2

    v = x
    xn = ln(x, p["ln_g"], p["ln_b"])
    qn = ln(q, p["lnq_g"], p["lnq_b"])
    a = mlp(xn, p["w1"], p["b1"], p["w2"], p["b2"])        # (B, N, L)
    qa = mlp(qn, p["w1q"], p["b1q"], p["w2q"], p["b2q"])   # (B, M, L)
    qs = jax.nn.softmax(qa, axis=-1)
    at = jax.nn.softmax(jnp.swapaxes(a, -1, -2), axis=-1)  # (B, L, N)
    return qs @ (at @ v)                                   # (B, M, D)


if __name__ == "__main__":
    # Small shapes consistent with the module:
    #   embed_dim D=32, bottleneck H=16, latent_size L=8,
    #   B=16 batches, N=16 input tokens, M=8 query tokens
    B, N, M, D, H, L = 16, 16, 8, 32, 16, 8

    key = jax.random.PRNGKey(0)
    keys = jax.random.split(key, 10)
    x = jax.random.normal(keys[0], (B, N, D), jnp.float32)
    q = jax.random.normal(keys[1], (B, M, D), jnp.float32)

    params = dict(
        # LayerNorm params (PyTorch default init: ones / zeros)
        ln_g=jnp.ones((1, D), jnp.float32), ln_b=jnp.zeros((1, D), jnp.float32),
        lnq_g=jnp.ones((1, D), jnp.float32), lnq_b=jnp.zeros((1, D), jnp.float32),
        # Mlp (input branch): D -> H -> L
        w1=0.05 * jax.random.normal(keys[2], (D, H), jnp.float32),
        b1=0.05 * jax.random.normal(keys[3], (1, H), jnp.float32),
        w2=0.05 * jax.random.normal(keys[4], (H, L), jnp.float32),
        b2=0.05 * jax.random.normal(keys[5], (1, L), jnp.float32),
        # Mlp2 (query branch): D -> H -> L
        w1q=0.05 * jax.random.normal(keys[6], (D, H), jnp.float32),
        b1q=0.05 * jax.random.normal(keys[7], (1, H), jnp.float32),
        w2q=0.05 * jax.random.normal(keys[8], (H, L), jnp.float32),
        b2q=0.05 * jax.random.normal(keys[9], (1, L), jnp.float32),
    )

    out = latent_attention(x, q, params)
    jax.block_until_ready(out)

    ref = latent_attention_reference(x, q, params)
    assert out.shape == (B, M, D)
    np.testing.assert_allclose(np.asarray(out), np.asarray(ref),
                               rtol=2e-4, atol=2e-4)

    print("KERNEL_OK")
</pallas_src>

<mosaic_0001>
module attributes {stable_mosaic.version = 11 : i64} {
  func.func @latent_attention_kernel(%arg0: i32, %arg1: memref<16x16x32xf32, #tpu.memory_space<vmem>>, %arg2: memref<16x8x32xf32, #tpu.memory_space<vmem>>, %arg3: memref<4x32xf32, #tpu.memory_space<vmem>>, %arg4: memref<32x32xf32, #tpu.memory_space<vmem>>, %arg5: memref<1x32xf32, #tpu.memory_space<vmem>>, %arg6: memref<32x16xf32, #tpu.memory_space<vmem>>, %arg7: memref<1x16xf32, #tpu.memory_space<vmem>>, %arg8: memref<16x256xf32, #tpu.memory_space<vmem>>) attributes {dimension_semantics = [#tpu.dimension_semantics<parallel>], iteration_bounds = array<i64: 1>, scalar_prefetch = 0 : i64, scratch_operands = 0 : i64, tpu.core_type = #tpu.core_type<tc>, window_params = [{transform_indices = @transform_0, window_bounds = array<i64: 16, 16, 32>}, {transform_indices = @transform_1, window_bounds = array<i64: 16, 8, 32>}, {pipeline_mode = #tpu.pipeline_mode<synchronous>, transform_indices = @transform_2, window_bounds = array<i64: 4, 32>}, {pipeline_mode = #tpu.pipeline_mode<synchronous>, transform_indices = @transform_3, window_bounds = array<i64: 32, 32>}, {pipeline_mode = #tpu.pipeline_mode<synchronous>, transform_indices = @transform_4, window_bounds = array<i64: 1, 32>}, {pipeline_mode = #tpu.pipeline_mode<synchronous>, transform_indices = @transform_5, window_bounds = array<i64: 32, 16>}, {pipeline_mode = #tpu.pipeline_mode<synchronous>, transform_indices = @transform_6, window_bounds = array<i64: 1, 16>}, {transform_indices = @transform_7, window_bounds = array<i64: 16, 256>}]} {
    %c0 = arith.constant 0 : index
    %c0_0 = arith.constant 0 : index
    %0 = vector.load %arg3[%c0, %c0_0] : memref<4x32xf32, #tpu.memory_space<vmem>>, vector<4x32xf32>
    %1 = vector.extract_strided_slice %0 {offsets = [0, 0], sizes = [1, 32], strides = [1, 1]} : vector<4x32xf32> to vector<1x32xf32>
    %2 = vector.extract_strided_slice %0 {offsets = [1, 0], sizes = [1, 32], strides = [1, 1]} : vector<4x32xf32> to vector<1x32xf32>
    %3 = vector.extract_strided_slice %0 {offsets = [2, 0], sizes = [1, 32], strides = [1, 1]} : vector<4x32xf32> to vector<1x32xf32>
    %4 = vector.extract_strided_slice %0 {offsets = [3, 0], sizes = [1, 32], strides = [1, 1]} : vector<4x32xf32> to vector<1x32xf32>
    %c0_1 = arith.constant 0 : index
    %c0_2 = arith.constant 0 : index
    %5 = vector.load %arg4[%c0_1, %c0_2] : memref<32x32xf32, #tpu.memory_space<vmem>>, vector<32x32xf32>
    %c0_3 = arith.constant 0 : index
    %c0_4 = arith.constant 0 : index
    %6 = vector.load %arg5[%c0_3, %c0_4] : memref<1x32xf32, #tpu.memory_space<vmem>>, vector<1x32xf32>
    %c0_5 = arith.constant 0 : index
    %c0_6 = arith.constant 0 : index
    %7 = vector.load %arg6[%c0_5, %c0_6] : memref<32x16xf32, #tpu.memory_space<vmem>>, vector<32x16xf32>
    %c0_7 = arith.constant 0 : index
    %c0_8 = arith.constant 0 : index
    %8 = vector.load %arg7[%c0_7, %c0_8] : memref<1x16xf32, #tpu.memory_space<vmem>>, vector<1x16xf32>
    %c0_9 = arith.constant 0 : index
    %c0_10 = arith.constant 0 : index
    %c0_11 = arith.constant 0 : index
    %9 = vector.load %arg1[%c0_9, %c0_10, %c0_11] : memref<16x16x32xf32, #tpu.memory_space<vmem>>, vector<16x16x32xf32>
    %c0_12 = arith.constant 0 : index
    %c0_13 = arith.constant 0 : index
    %c0_14 = arith.constant 0 : index
    %10 = vector.load %arg2[%c0_12, %c0_13, %c0_14] : memref<16x8x32xf32, #tpu.memory_space<vmem>>, vector<16x8x32xf32>
    %11 = vector.shape_cast %9 : vector<16x16x32xf32> to vector<256x32xf32>
    %cst = arith.constant dense<0.000000e+00> : vector<256xf32>
    %12 = vector.multi_reduction <add>, %11, %cst [1] : vector<256x32xf32> to vector<256xf32>
    %13 = vector.shape_cast %12 : vector<256xf32> to vector<256x1xf32>
    %cst_15 = arith.constant 3.200000e+01 : f32
    %14 = vector.broadcast %cst_15 : f32 to vector<256x1xf32>
    %15 = arith.divf %13, %14 : vector<256x1xf32>
    %16 = arith.mulf %11, %11 : vector<256x32xf32>
    %cst_16 = arith.constant dense<0.000000e+00> : vector<256xf32>
    %17 = vector.multi_reduction <add>, %16, %cst_16 [1] : vector<256x32xf32> to vector<256xf32>
    %18 = vector.shape_cast %17 : vector<256xf32> to vector<256x1xf32>
    %cst_17 = arith.constant 3.200000e+01 : f32
    %19 = vector.broadcast %cst_17 : f32 to vector<256x1xf32>
    %20 = arith.divf %18, %19 : vector<256x1xf32>
    %21 = arith.mulf %15, %15 : vector<256x1xf32>
    %22 = arith.subf %20, %21 : vector<256x1xf32>
    %23 = vector.broadcast %15 : vector<256x1xf32> to vector<256x32xf32>
    %24 = arith.subf %11, %23 : vector<256x32xf32>
    %cst_18 = arith.constant 9.99999974E-6 : f32
    %25 = vector.broadcast %cst_18 : f32 to vector<256x1xf32>
    %26 = arith.addf %22, %25 : vector<256x1xf32>
    %27 = math.rsqrt %26 : vector<256x1xf32>
    %28 = vector.broadcast %27 : vector<256x1xf32> to vector<256x32xf32>
    %29 = arith.mulf %24, %28 : vector<256x32xf32>
    %30 = vector.broadcast %1 : vector<1x32xf32> to vector<256x32xf32>
    %31 = arith.mulf %29, %30 : vector<256x32xf32>
    %32 = vector.broadcast %2 : vector<1x32xf32> to vector<256x32xf32>
    %33 = arith.addf %31, %32 : vector<256x32xf32>
    %34 = vector.shape_cast %10 : vector<16x8x32xf32> to vector<128x32xf32>
    %cst_19 = arith.constant dense<0.000000e+00> : vector<128xf32>
    %35 = vector.multi_reduction <add>, %34, %cst_19 [1] : vector<128x32xf32> to vector<128xf32>
    %36 = vector.shape_cast %35 : vector<128xf32> to vector<128x1xf32>
    %cst_20 = arith.constant 3.200000e+01 : f32
    %37 = vector.broadcast %cst_20 : f32 to vector<128x1xf32>
    %38 = arith.divf %36, %37 : vector<128x1xf32>
    %39 = arith.mulf %34, %34 : vector<128x32xf32>
    %cst_21 = arith.constant dense<0.000000e+00> : vector<128xf32>
    %40 = vector.multi_reduction <add>, %39, %cst_21 [1] : vector<128x32xf32> to vector<128xf32>
    %41 = vector.shape_cast %40 : vector<128xf32> to vector<128x1xf32>
    %cst_22 = arith.constant 3.200000e+01 : f32
    %42 = vector.broadcast %cst_22 : f32 to vector<128x1xf32>
    %43 = arith.divf %41, %42 : vector<128x1xf32>
    %44 = arith.mulf %38, %38 : vector<128x1xf32>
    %45 = arith.subf %43, %44 : vector<128x1xf32>
    %46 = vector.broadcast %38 : vector<128x1xf32> to vector<128x32xf32>
    %47 = arith.subf %34, %46 : vector<128x32xf32>
    %cst_23 = arith.constant 9.99999974E-6 : f32
    %48 = vector.broadcast %cst_23 : f32 to vector<128x1xf32>
    %49 = arith.addf %45, %48 : vector<128x1xf32>
    %50 = math.rsqrt %49 : vector<128x1xf32>
    %51 = vector.broadcast %50 : vector<128x1xf32> to vector<128x32xf32>
    %52 = arith.mulf %47, %51 : vector<128x32xf32>
    %53 = vector.broadcast %3 : vector<1x32xf32> to vector<128x32xf32>
    %54 = arith.mulf %52, %53 : vector<128x32xf32>
    %55 = vector.broadcast %4 : vector<1x32xf32> to vector<128x32xf32>
    %56 = arith.addf %54, %55 : vector<128x32xf32>
    %57 = tpu.concatenate %33, %56 in 0 : vector<256x32xf32>, vector<128x32xf32> -> vector<384x32xf32>
    %cst_24 = arith.constant dense<0.000000e+00> : vector<384x32xf32>
    %58 = tpu.matmul %57, %5, %cst_24 {dimension_numbers = #tpu.dot_dimension_numbers<[1], [0], [0], [1], [0, 0, 1, 1], [], []>} : vector<384x32xf32>, vector<32x32xf32>, vector<384x32xf32> -> vector<384x32xf32>
    %59 = vector.broadcast %6 : vector<1x32xf32> to vector<384x32xf32>
    %60 = arith.addf %58, %59 : vector<384x32xf32>
    %cst_25 = arith.constant 5.000000e-01 : f32
    %61 = vector.broadcast %cst_25 : f32 to vector<384x32xf32>
    %62 = arith.mulf %61, %60 : vector<384x32xf32>
    %cst_26 = arith.constant 0.707106769 : f32
    %63 = vector.broadcast %cst_26 : f32 to vector<384x32xf32>
    %64 = arith.mulf %60, %63 : vector<384x32xf32>
    %65 = math.erf %64 : vector<384x32xf32>
    %cst_27 = arith.constant 1.000000e+00 : f32
    %66 = vector.broadcast %cst_27 : f32 to vector<384x32xf32>
    %67 = arith.addf %66, %65 : vector<384x32xf32>
    %68 = arith.mulf %62, %67 : vector<384x32xf32>
    %cst_28 = arith.constant dense<0.000000e+00> : vector<384x16xf32>
    %69 = tpu.matmul %68, %7, %cst_28 {dimension_numbers = #tpu.dot_dimension_numbers<[1], [0], [0], [1], [0, 0, 1, 1], [], []>} : vector<384x32xf32>, vector<32x16xf32>, vector<384x16xf32> -> vector<384x16xf32>
    %70 = vector.broadcast %8 : vector<1x16xf32> to vector<384x16xf32>
    %71 = arith.addf %69, %70 : vector<384x16xf32>
    %72 = vector.extract_strided_slice %71 {offsets = [0, 0], sizes = [256, 8], strides = [1, 1]} : vector<384x16xf32> to vector<256x8xf32>
    %73 = vector.extract_strided_slice %71 {offsets = [256, 8], sizes = [128, 8], strides = [1, 1]} : vector<384x16xf32> to vector<128x8xf32>
    %cst_29 = arith.constant dense<0xFF800000> : vector<128xf32>
    %74 = vector.multi_reduction <maximumf>, %73, %cst_29 [1] : vector<128x8xf32> to vector<128xf32>
    %75 = vector.shape_cast %74 : vector<128xf32> to vector<128x1xf32>
    %76 = vector.broadcast %75 : vector<128x1xf32> to vector<128x8xf32>
    %77 = arith.subf %73, %76 : vector<128x8xf32>
    %78 = math.exp %77 : vector<128x8xf32>
    %cst_30 = arith.constant dense<0.000000e+00> : vector<128xf32>
    %79 = vector.multi_reduction <add>, %78, %cst_30 [1] : vector<128x8xf32> to vector<128xf32>
    %80 = vector.shape_cast %79 : vector<128xf32> to vector<128x1xf32>
    %81 = tpu.reciprocal %80 {approx = true} : vector<128x1xf32> -> vector<128x1xf32>
    %82 = arith.mulf %80, %81 : vector<128x1xf32>
    %cst_31 = arith.constant 2.000000e+00 : f32
    %83 = vector.broadcast %cst_31 : f32 to vector<128x1xf32>
    %84 = arith.subf %83, %82 : vector<128x1xf32>
    %85 = arith.mulf %81, %84 : vector<128x1xf32>
    %86 = vector.broadcast %85 : vector<128x1xf32> to vector<128x8xf32>
    %87 = arith.mulf %78, %86 : vector<128x8xf32>
    %88 = vector.shape_cast %87 : vector<128x8xf32> to vector<16x8x8xf32>
    %89 = vector.shape_cast %72 : vector<256x8xf32> to vector<16x16x8xf32>
    %cst_32 = arith.constant dense<0xFF800000> : vector<16x8xf32>
    %90 = vector.multi_reduction <maximumf>, %89, %cst_32 [1] : vector<16x16x8xf32> to vector<16x8xf32>
    %91 = vector.shape_cast %90 : vector<16x8xf32> to vector<16x1x8xf32>
    %92 = vector.broadcast %91 : vector<16x1x8xf32> to vector<16x16x8xf32>
    %93 = arith.subf %89, %92 : vector<16x16x8xf32>
    %94 = math.exp %93 : vector<16x16x8xf32>
    %cst_33 = arith.constant dense<0.000000e+00> : vector<16x8xf32>
    %95 = vector.multi_reduction <add>, %94, %cst_33 [1] : vector<16x16x8xf32> to vector<16x8xf32>
    %96 = vector.shape_cast %95 : vector<16x8xf32> to vector<16x1x8xf32>
    %97 = tpu.reciprocal %96 {approx = true} : vector<16x1x8xf32> -> vector<16x1x8xf32>
    %98 = arith.mulf %96, %97 : vector<16x1x8xf32>
    %cst_34 = arith.constant 2.000000e+00 : f32
    %99 = vector.broadcast %cst_34 : f32 to vector<16x1x8xf32>
    %100 = arith.subf %99, %98 : vector<16x1x8xf32>
    %101 = arith.mulf %97, %100 : vector<16x1x8xf32>
    %102 = vector.broadcast %101 : vector<16x1x8xf32> to vector<16x16x8xf32>
    %103 = arith.mulf %94, %102 : vector<16x16x8xf32>
    "tpu.trace_start"() <{level = 10 : i32, message = "bnl,bnd->bld"}> : () -> ()
    %cst_35 = arith.constant dense<0.000000e+00> : vector<16x8x32xf32>
    %104 = tpu.matmul %103, %9, %cst_35 {dimension_numbers = #tpu.dot_dimension_numbers<[1], [1], [2], [2], [0, 0, 0, 2, 1, 2], [0], [0]>} : vector<16x16x8xf32>, vector<16x16x32xf32>, vector<16x8x32xf32> -> vector<16x8x32xf32>
    "tpu.trace_stop"() : () -> ()
    "tpu.trace_start"() <{level = 10 : i32, message = "bml,bld->bmd"}> : () -> ()
    %cst_36 = arith.constant dense<0.000000e+00> : vector<16x8x32xf32>
    %105 = tpu.matmul %88, %104, %cst_36 {dimension_numbers = #tpu.dot_dimension_numbers<[2], [1], [1], [2], [0, 0, 0, 1, 1, 2], [0], [0]>} : vector<16x8x8xf32>, vector<16x8x32xf32>, vector<16x8x32xf32> -> vector<16x8x32xf32>
    "tpu.trace_stop"() : () -> ()
    %106 = vector.shape_cast %105 : vector<16x8x32xf32> to vector<16x256xf32>
    %c0_37 = arith.constant 0 : index
    %c0_38 = arith.constant 0 : index
    %107 = vector.load %arg8[%c0_37, %c0_38] : memref<16x256xf32, #tpu.memory_space<vmem>>, vector<16x256xf32>
    tpu.vector_store %arg8[%c0_37, %c0_38], %106 {strides = array<i32>} : memref<16x256xf32, #tpu.memory_space<vmem>>, vector<16x256xf32>,
    return
  }
  func.func @transform_0(%arg0: i32) -> (i32, i32, i32) {
    %c0_i32 = arith.constant 0 : i32
    %c0_i32_0 = arith.constant 0 : i32
    %c0_i32_1 = arith.constant 0 : i32
    return %arg0, %c0_i32, %c0_i32_0 : i32, i32, i32
  }
  func.func @transform_1(%arg0: i32) -> (i32, i32, i32) {
    %c0_i32 = arith.constant 0 : i32
    %c0_i32_0 = arith.constant 0 : i32
    %c0_i32_1 = arith.constant 0 : i32
    return %arg0, %c0_i32, %c0_i32_0 : i32, i32, i32
  }
  func.func @transform_2(%arg0: i32) -> (i32, i32) {
    %c0_i32 = arith.constant 0 : i32
    %c0_i32_0 = arith.constant 0 : i32
    %c0_i32_1 = arith.constant 0 : i32
    return %c0_i32, %c0_i32_0 : i32, i32
  }
  func.func @transform_3(%arg0: i32) -> (i32, i32) {
    %c0_i32 = arith.constant 0 : i32
    %c0_i32_0 = arith.constant 0 : i32
    %c0_i32_1 = arith.constant 0 : i32
    return %c0_i32, %c0_i32_0 : i32, i32
  }
  func.func @transform_4(%arg0: i32) -> (i32, i32) {
    %c0_i32 = arith.constant 0 : i32
    %c0_i32_0 = arith.constant 0 : i32
    %c0_i32_1 = arith.constant 0 : i32
    return %c0_i32, %c0_i32_0 : i32, i32
  }
  func.func @transform_5(%arg0: i32) -> (i32, i32) {
    %c0_i32 = arith.constant 0 : i32
    %c0_i32_0 = arith.constant 0 : i32
    %c0_i32_1 = arith.constant 0 : i32
    return %c0_i32, %c0_i32_0 : i32, i32
  }
  func.func @transform_6(%arg0: i32) -> (i32, i32) {
    %c0_i32 = arith.constant 0 : i32
    %c0_i32_0 = arith.constant 0 : i32
    %c0_i32_1 = arith.constant 0 : i32
    return %c0_i32, %c0_i32_0 : i32, i32
  }
  func.func @transform_7(%arg0: i32) -> (i32, i32) {
    %c0_i32 = arith.constant 0 : i32
    %c0_i32_0 = arith.constant 0 : i32
    return %arg0, %c0_i32 : i32, i32
  }
}

</mosaic_0001>

<bundles_post_ra>
// kernel: tpu_custom_call.1
= control target key start
LH: loop header
LB: loop body
LE: loop exit
PB: predicated region body
PF: predicated region fallthrough
CT: control target
= control target key end

     0   :  { %12 = vsyncpa [#allocation3], 0  ;;  %s9184_s0 = inlined_call_operand.hbm [shape: f32[16,16,32], index: 0, kind: input, shape index: {}]   ;;  %s9185_s1 = inlined_call_operand.hbm [shape: f32[16,8,32], index: 1, kind: input, shape index: {}]   ;;  %s9186_s2 = inlined_call_operand.vmem [shape: f32[4,32], index: 2, kind: input, shape index: {}]   ;;  %s9187_s3 = inlined_call_operand.vmem [shape: f32[32,32], index: 3, kind: input, shape index: {}]   ;;  %s9188_s4 = inlined_call_operand.vmem [shape: f32[1,32], index: 4, kind: input, shape index: {}]   ;;  %s9189_s5 = inlined_call_operand.vmem [shape: f32[32,16], index: 5, kind: input, shape index: {}]   ;;  %s9190_s6 = inlined_call_operand.vmem [shape: f32[1,16], index: 6, kind: input, shape index: {}]   ;;  %s9191_s7 = inlined_call_operand.hbm [shape: f32[16,256], index: 7, kind: output, shape index: {}]  }
   0x1   :  { %13 = vsyncpa [#allocation6], 0 }
   0x2   :  { %14 = vsyncpa [#allocation4], 0  ;;  %s7331_s24 = smov [#allocation2]   ;;  %s7259_s28 = scalar_lea.hbm %s9184_s0, 4096 }
   0x3   :  { %s20_s25 = sshll.u32 %s7331_s24, 4  ;;  %p7260_p0 = scmp.ne.s32.totalorder %s9184_s0, %s7259_s28  ;;  %s21_s25 = int_to_ptr.vmem [resolvable:$true] %s20_s25 }
   0x4   :  { %p7263_p1 = scmp.lt.u32.totalorder %s7259_s28, %s9184_s0 }
   0x6   :  { %p7265_p2 = pnand %p7263_p1, %p7260_p0 }
   0x8   :  { %7268 = shalt.err (!%p7265_p2)
}
   0x9   :  { %s7269_s10 = scalar_lea.vmem %s21_s25, 4096  ;;  %p7274_p4 = scmp.lt.s32.totalorder %s21_s25, %s21_s25 }
   0xa   :  { %p7270_p3 = scmp.ne.s32.totalorder %s21_s25, %s7269_s10  ;;  %p7275_p5 = scmp.lt.s32.totalorder %s7269_s10, %s7269_s10 }
   0xc   :  { %p7276_p6 = por %p7275_p5, %p7274_p4 }
   0xe   :  { %p7277_p7 = pnand %p7276_p6, %p7270_p3 }
  0x10   :  { %7280 = shalt.err (!%p7277_p7)
}
  0x11   :  { %s7332_s11 = smov 128   ;;  %s7333_s12 = smov 8  }
  0x12   :  { %26 = dma.hbm_to_vmem [thread:$0]  %s9184_s0, 4096, %s21_s25, [#allocation3], %s7332_s11, %s7332_s11, %s7333_s12  }
  0x13   :  { %s7334_s15 = smov [#allocation5]   ;;  %s7281_s19 = scalar_lea.hbm %s9185_s1, 2048 }
  0x14   :  { %s32_s16 = sshll.u32 %s7334_s15, 4  ;;  %p7282_p8 = scmp.ne.s32.totalorder %s9185_s1, %s7281_s19  ;;  %s33_s16 = int_to_ptr.vmem [resolvable:$true] %s32_s16 }
  0x15   :  { %p7285_p9 = scmp.lt.u32.totalorder %s7281_s19, %s9185_s1 }
  0x17   :  { %p7287_p10 = pnand %p7285_p9, %p7282_p8 }
  0x19   :  { %7290 = shalt.err (!%p7287_p10)
}
  0x1a   :  { %s7291_s24 = scalar_lea.vmem %s33_s16, 2048  ;;  %p7296_p12 = scmp.lt.s32.totalorder %s33_s16, %s33_s16 }
  0x1b   :  { %p7292_p11 = scmp.ne.s32.totalorder %s33_s16, %s7291_s24  ;;  %p7297_p13 = scmp.lt.s32.totalorder %s7291_s24, %s7291_s24 }
  0x1d   :  { %p7298_p0 = por %p7297_p13, %p7296_p12 }
  0x1f   :  { %p7299_p1 = pnand %p7298_p0, %p7292_p11 }
  0x21   :  { %7302 = shalt.err (!%p7299_p1)
}
  0x22   :  { %38 = dma.hbm_to_vmem [thread:$0]  %s9185_s1, 2048, %s33_s16, [#allocation6], %s7332_s11, %s7332_s11, %s7333_s12  }
  0x23   :  { %7325 = dma.done.wait [#allocation3], 4096  }
  0x24   :  { %7326 = vsyncadd [#allocation3], 4294963200 }
  0x25   :  { %7327 = dma.done.wait [#allocation6], 2048  }
  0x26   :  { %7328 = vsyncadd [#allocation6], 4294965248  ;;  %vm114_vm0 = vcmask 261120   ;;  %v7411_v0 = vld [vmem:[#allocation2 + $0x18] sm:$0xff]  ;;  %v7413_v1 = vld [vmem:[#allocation2] sm:$0xff]  ;;  %vm2259_vm1 = vcmask 64512  }
  0x27   :  { %v7415_v2 = vld [vmem:[#allocation2 + $0x8] sm:$0xff]  ;;  %v124_v3 = vsel %vm114_vm0, %v7411_v0, 0.0  ;;  %v115_v4 = vsel %vm114_vm0, %v7413_v1, 0.0  ;;  %v244_v5 = vmul.f32 %v7413_v1, %v7413_v1  ;;  %v7428_v9 = vld [vmem:[#allocation2 + $0x10] sm:$0xff]  ;;  %v247_v12 = vmul.f32 %v7411_v0, %v7411_v0  ;;  %v7441_v17 = vld [vmem:[#allocation2 + $0x20] sm:$0xff]  ;;  %s7341_s25 = smov 32  }
  0x28   :  { %125 = vadd.xlane.f32.xlu1 %v124_v3  ;;  %116 = vadd.xlane.f32.xlu0 %v115_v4  ;;  %v118_v7 = vsel %vm114_vm0, %v7415_v2, 0.0  ;;  %v245_v8 = vmul.f32 %v7415_v2, %v7415_v2  ;;  %v121_v11 = vsel %vm114_vm0, %v7428_v9, 0.0  ;;  %v246_v13 = vmul.f32 %v7428_v9, %v7428_v9  ;;  %v7439_v16 = vld [vmem:[#allocation2 + $0x28] sm:$0xff]  ;;  %v7453_v24 = vld [vmem:[#allocation2 + $0x38] sm:$0xff]  ;;  %v7455_v25 = vld [vmem:[#allocation2 + $0x30] sm:$0xff]  ;;  %s7342_s1 = smov 64  }
  0x29   :  { %v276_v6 = vsel %vm114_vm0, %v244_v5, 0.0  ;;  %v285_v14 = vsel %vm114_vm0, %v247_v12, 0.0  ;;  %v130_v18 = vsel %vm114_vm0, %v7439_v16, 0.0  ;;  %v127_v19 = vsel %vm114_vm0, %v7441_v17, 0.0  ;;  %v7467_v32 = vld [vmem:[#allocation2 + $0x48] sm:$0xff]  ;;  %v7469_v33 = vld [vmem:[#allocation2 + $0x40] sm:$0xff] }
  0x2a   :  { %v279_v10 = vsel %vm114_vm0, %v245_v8, 0.0  ;;  %v282_v15 = vsel %vm114_vm0, %v246_v13, 0.0  ;;  %v249_v20 = vmul.f32 %v7439_v16, %v7439_v16  ;;  %v248_v21 = vmul.f32 %v7441_v17, %v7441_v17  ;;  %v7481_v40 = vld [vmem:[#allocation2 + $0x58] sm:$0xff]  ;;  %v7483_v41 = vld [vmem:[#allocation2 + $0x50] sm:$0xff]  ;;  %v56_v42 = vld [vmem:[%s9187_s3] sm:$0xff]  ;;  %s7343_s26 = smov 96  }
  0x2b   :  { %v136_v26 = vsel %vm114_vm0, %v7453_v24, 0.0  ;;  %v133_v27 = vsel %vm114_vm0, %v7455_v25, 0.0  ;;  %v251_v28 = vmul.f32 %v7453_v24, %v7453_v24  ;;  %v250_v29 = vmul.f32 %v7455_v25, %v7455_v25  ;;  %v57_v43 = vld [vmem:[%s9187_s3 + $0x8] sm:$0xff]  ;;  %v58_v49 = vld [vmem:[%s9187_s3 + $0x10] sm:$0xff]  ;;  %v59_v50 = vld [vmem:[%s9187_s3 + $0x18] sm:$0xff]  ;;  %s7344_s27 = smov [#allocation7]  }
  0x2c   :  { %277 = vadd.xlane.f32.xlu1 %v276_v6  ;;  %119 = vadd.xlane.f32.xlu0 %v118_v7  ;;  %v291_v22 = vsel %vm114_vm0, %v249_v20, 0.0  ;;  %v288_v23 = vsel %vm114_vm0, %v248_v21, 0.0  ;;  %v142_v34 = vsel %vm114_vm0, %v7467_v32, 0.0  ;;  %v139_v35 = vsel %vm114_vm0, %v7469_v33, 0.0  ;;  %v7507_v54 = vld [vmem:[#allocation2 + $0x68] sm:$0xff]  ;;  %v7509_v55 = vld [vmem:[#allocation2 + $0x60] sm:$0xff] }
  0x2d   :  { %v297_v30 = vsel %vm114_vm0, %v251_v28, 0.0  ;;  %v294_v31 = vsel %vm114_vm0, %v250_v29, 0.0  ;;  %v253_v36 = vmul.f32 %v7467_v32, %v7467_v32  ;;  %v252_v37 = vmul.f32 %v7469_v33, %v7469_v33  ;;  %v7521_v62 = vld [vmem:[#allocation2 + $0x78] sm:$0xff]  ;;  %v7523_v63 = vld [vmem:[#allocation2 + $0x70] sm:$0xff]  ;;  %s6092_s28 = sshll.u32 %s7344_s27, 4  ;;  %s6093_s28 = int_to_ptr.vmem [resolvable:$true] %s6092_s28 }
  0x2e   :  { %v6771_v44 = vpack.c.bf16 %v57_v43, %v56_v42  ;;  %v148_v45 = vsel %vm114_vm0, %v7481_v40, 0.0  ;;  %v145_v46 = vsel %vm114_vm0, %v7483_v41, 0.0  ;;  %v255_v47 = vmul.f32 %v7481_v40, %v7481_v40  ;;  %v7549_v20 = vld [vmem:[#allocation2 + $0x98] sm:$0xff]  ;;  %v7551_v21 = vld [vmem:[#allocation2 + $0x90] sm:$0xff]  ;;  %s7303_s29 = scalar_lea.vmem %s6093_s28, 512  ;;  %p7308_p3 = scmp.lt.s32.totalorder %s6093_s28, %s6093_s28 }
  0x2f   :  { %v303_v38 = vsel %vm114_vm0, %v253_v36, 0.0  ;;  %v300_v39 = vsel %vm114_vm0, %v252_v37, 0.0  ;;  %v254_v48 = vmul.f32 %v7483_v41, %v7483_v41  ;;  %v6775_v51 = vpack.c.bf16 %v59_v50, %v58_v49  ;;  %v7577_v42 = vld [vmem:[#allocation2 + $0xb8] sm:$0xff]  ;;  %v7579_v43 = vld [vmem:[#allocation2 + $0xb0] sm:$0xff]  ;;  %v7591_v50 = vld [vmem:[#allocation2 + $0xc8] sm:$0xff]  ;;  %p7304_p2 = scmp.ne.s32.totalorder %s6093_s28, %s7303_s29  ;;  %p7309_p4 = scmp.lt.s32.totalorder %s7303_s29, %s7303_s29 }
  0x30   :  { %280 = vadd.xlane.f32.xlu1 %v279_v10  ;;  %122 = vadd.xlane.f32.xlu0 %v121_v11  ;;  %v309_v52 = vsel %vm114_vm0, %v255_v47, 0.0  ;;  %v154_v56 = vsel %vm114_vm0, %v7507_v54, 0.0  ;;  %v151_v57 = vsel %vm114_vm0, %v7509_v55, 0.0  ;;  %v257_v58 = vmul.f32 %v7507_v54, %v7507_v54  ;;  %v7535_v10 = vld [vmem:[#allocation2 + $0x88] sm:$0xff]  ;;  %v7537_v11 = vld [vmem:[#allocation2 + $0x80] sm:$0xff] }
  0x31   :  { %6772 = vmatprep.subr.bf16.mxu0 %v6771_v44  ;;  %v306_v53 = vsel %vm114_vm0, %v254_v48, 0.0  ;;  %v256_v59 = vmul.f32 %v7509_v55, %v7509_v55  ;;  %v160_v3 = vsel %vm114_vm0, %v7521_v62, 0.0  ;;  %v157_v4 = vsel %vm114_vm0, %v7523_v63, 0.0  ;;  %p7310_p5 = por %p7309_p4, %p7308_p3 }
  0x32   :  { %6774 = vmatpush3.bf16.msra.mxu0 %v6771_v44  ;;  %v315_v60 = vsel %vm114_vm0, %v257_v58, 0.0  ;;  %v259_v5 = vmul.f32 %v7521_v62, %v7521_v62  ;;  %v258_v6 = vmul.f32 %v7523_v63, %v7523_v63  ;;  %v166_v12 = vsel %vm114_vm0, %v7535_v10, 0.0 }
  0x33   :  { %6776 = vmatprep.subr.bf16.mxu0 %v6775_v51  ;;  %v312_v61 = vsel %vm114_vm0, %v256_v59, 0.0  ;;  %v163_v13 = vsel %vm114_vm0, %v7537_v11, 0.0  ;;  %v184_v44 = vsel %vm114_vm0, %v7577_v42, 0.0  ;;  %v266_v47 = vmul.f32 %v7579_v43, %v7579_v43  ;;  %p7311_p6 = pnand %p7310_p5, %p7304_p2 }
  0x34   :  { %286 = vadd.xlane.f32.xlu1 %v285_v14  ;;  %283 = vadd.xlane.f32.xlu0 %v282_v15  ;;  %v321_v7 = vsel %vm114_vm0, %v259_v5, 0.0  ;;  %v318_v8 = vsel %vm114_vm0, %v258_v6, 0.0  ;;  %v261_v14 = vmul.f32 %v7535_v10, %v7535_v10  ;;  %v260_v15 = vmul.f32 %v7537_v11, %v7537_v11 }
  0x35   :  { %v342_v49 = vsel %vm114_vm0, %v266_v47, 0.0  ;;  %vm2098_vm2 = vcmask 130112   ;;  %vm7336_vm3 = vmmov 0   ;;  %vm2900_vm4 = vcmask 130048  }
  0x36   :  { %6778 = vmatpush3.bf16.msra.mxu0 %v6775_v51  ;;  %v90_v51 = vld [vmem:[#allocation2 + $0xc0] sm:$0xff]  ;;  %vm6071_vm5 = vcmask 523264   ;;  %vm6074_vm6 = vcmask 785408  }
  0x38   :  { %131 = vadd.xlane.f32.xlu1 %v130_v18  ;;  %128 = vadd.xlane.f32.xlu0 %v127_v19  ;;  %v327_v18 = vsel %vm114_vm0, %v261_v14, 0.0  ;;  %v324_v19 = vsel %vm114_vm0, %v260_v15, 0.0 }
  0x3c   :  { %292 = vadd.xlane.f32.xlu1 %v291_v22  ;;  %289 = vadd.xlane.f32.xlu0 %v288_v23  ;;  %v172_v22 = vsel %vm114_vm0, %v7549_v20, 0.0  ;;  %v169_v23 = vsel %vm114_vm0, %v7551_v21, 0.0 }
  0x40   :  { %137 = vadd.xlane.f32.xlu1 %v136_v26  ;;  %134 = vadd.xlane.f32.xlu0 %v133_v27  ;;  %v263_v26 = vmul.f32 %v7549_v20, %v7549_v20  ;;  %v262_v27 = vmul.f32 %v7551_v21, %v7551_v21 }
  0x42   :  { %v333_v28 = vsel %vm114_vm0, %v263_v26, 0.0  ;;  %v330_v29 = vsel %vm114_vm0, %v262_v27, 0.0  ;;  %v97_v26 = vld [vmem:[#allocation2 + $0xf8] sm:$0xff]  ;;  %v96_v27 = vld [vmem:[#allocation2 + $0xf0] sm:$0xff] }
  0x44   :  { %298 = vadd.xlane.f32.xlu1 %v297_v30  ;;  %295 = vadd.xlane.f32.xlu0 %v294_v31  ;;  %v7563_v30 = vld [vmem:[#allocation2 + $0xa8] sm:$0xff]  ;;  %v7565_v31 = vld [vmem:[#allocation2 + $0xa0] sm:$0xff] }
  0x45   :  { %v265_v36 = vmul.f32 %v7563_v30, %v7563_v30  ;;  %v264_v37 = vmul.f32 %v7565_v31, %v7565_v31 }
  0x48   :  { %143 = vadd.xlane.f32.xlu1 %v142_v34  ;;  %140 = vadd.xlane.f32.xlu0 %v139_v35  ;;  %v178_v34 = vsel %vm114_vm0, %v7563_v30, 0.0  ;;  %v175_v35 = vsel %vm114_vm0, %v7565_v31, 0.0 }
  0x4c   :  { %304 = vadd.xlane.f32.xlu1 %v303_v38  ;;  %301 = vadd.xlane.f32.xlu0 %v300_v39  ;;  %v339_v38 = vsel %vm114_vm0, %v265_v36, 0.0  ;;  %v336_v39 = vsel %vm114_vm0, %v264_v37, 0.0 }
  0x50   :  { %149 = vadd.xlane.f32.xlu1 %v148_v45  ;;  %146 = vadd.xlane.f32.xlu0 %v145_v46  ;;  %v181_v45 = vsel %vm114_vm0, %v7579_v43, 0.0  ;;  %v267_v46 = vmul.f32 %v7577_v42, %v7577_v42 }
  0x52   :  { %v345_v48 = vsel %vm114_vm0, %v267_v46, 0.0 }
  0x54   :  { %310 = vadd.xlane.f32.xlu1 %v309_v52  ;;  %307 = vadd.xlane.f32.xlu0 %v306_v53  ;;  %v190_v52 = vsel %vm114_vm0, %v7591_v50, 0.0  ;;  %v187_v53 = vsel %vm114_vm0, %v90_v51, 0.0 }
  0x58   :  { %155 = vadd.xlane.f32.xlu1 %v154_v56  ;;  %152 = vadd.xlane.f32.xlu0 %v151_v57  ;;  %v269_v56 = vmul.f32 %v7591_v50, %v7591_v50  ;;  %v268_v57 = vmul.f32 %v90_v51, %v90_v51  ;;  %v100_v51 = vld [vmem:[#allocation5 + $0x10] sm:$0xff] }
  0x5a   :  { %v351_v58 = vsel %vm114_vm0, %v269_v56, 0.0  ;;  %v348_v59 = vsel %vm114_vm0, %v268_v57, 0.0  ;;  %v734_v57 = vmul.f32 %v100_v51, %v100_v51 }
  0x5c   :  { %316 = vadd.xlane.f32.xlu1 %v315_v60  ;;  %313 = vadd.xlane.f32.xlu0 %v312_v61  ;;  %v93_v60 = vld [vmem:[#allocation2 + $0xd8] sm:$0xff]  ;;  %v92_v61 = vld [vmem:[#allocation2 + $0xd0] sm:$0xff] }
  0x5d   :  { %v271_v5 = vmul.f32 %v93_v60, %v93_v60  ;;  %v270_v6 = vmul.f32 %v92_v61, %v92_v61 }
  0x60   :  { %161 = vadd.xlane.f32.xlu1 %v160_v3  ;;  %158 = vadd.xlane.f32.xlu0 %v157_v4  ;;  %v196_v3 = vsel %vm114_vm0, %v93_v60, 0.0  ;;  %v193_v4 = vsel %vm114_vm0, %v92_v61, 0.0  ;;  %v102_v61 = vld [vmem:[#allocation5 + $0x20] sm:$0xff] }
  0x64   :  { %322 = vadd.xlane.f32.xlu1 %v321_v7  ;;  %319 = vadd.xlane.f32.xlu0 %v318_v8  ;;  %v357_v7 = vsel %vm114_vm0, %v271_v5, 0.0  ;;  %v354_v8 = vsel %vm114_vm0, %v270_v6, 0.0  ;;  %v680_v6 = vsel %vm114_vm0, %v102_v61, 0.0 }
  0x68   :  { %167 = vadd.xlane.f32.xlu1 %v166_v12  ;;  %164 = vadd.xlane.f32.xlu0 %v163_v13  ;;  %v95_v12 = vld [vmem:[#allocation2 + $0xe8] sm:$0xff]  ;;  %v94_v13 = vld [vmem:[#allocation2 + $0xe0] sm:$0xff] }
  0x69   :  { %v202_v14 = vsel %vm114_vm0, %v95_v12, 0.0  ;;  %v199_v15 = vsel %vm114_vm0, %v94_v13, 0.0 }
  0x6c   :  { %328 = vadd.xlane.f32.xlu1 %v327_v18  ;;  %325 = vadd.xlane.f32.xlu0 %v324_v19  ;;  %v273_v18 = vmul.f32 %v95_v12, %v95_v12  ;;  %v272_v19 = vmul.f32 %v94_v13, %v94_v13 }
  0x70   :  { %173 = vadd.xlane.f32.xlu1 %v172_v22  ;;  %170 = vadd.xlane.f32.xlu0 %v169_v23  ;;  %v363_v22 = vsel %vm114_vm0, %v273_v18, 0.0  ;;  %v360_v23 = vsel %vm114_vm0, %v272_v19, 0.0  ;;  %v104_v19 = vld [vmem:[#allocation5 + $0x30] sm:$0xff] }
  0x74   :  { %334 = vadd.xlane.f32.xlu1 %v333_v28  ;;  %331 = vadd.xlane.f32.xlu0 %v330_v29  ;;  %v208_v28 = vsel %vm114_vm0, %v97_v26, 0.0  ;;  %v205_v29 = vsel %vm114_vm0, %v96_v27, 0.0 }
  0x78   :  { %179 = vadd.xlane.f32.xlu1 %v178_v34  ;;  %176 = vadd.xlane.f32.xlu0 %v175_v35  ;;  %v275_v34 = vmul.f32 %v97_v26, %v97_v26  ;;  %v274_v35 = vmul.f32 %v96_v27, %v96_v27 }
  0x7a   :  { %v369_v36 = vsel %vm114_vm0, %v275_v34, 0.0  ;;  %v366_v37 = vsel %vm114_vm0, %v274_v35, 0.0  ;;  %v596_v34 = vlaneseq  ;;  %v686_v35 = vsel %vm114_vm0, %v104_v19, 0.0 }
  0x7c   :  { %340 = vadd.xlane.f32.xlu1 %v339_v38  ;;  %337 = vadd.xlane.f32.xlu0 %v336_v39  ;;  %v99_v38 = vld [vmem:[#allocation5 + $0x8] sm:$0xff]  ;;  %v98_v39 = vld [vmem:[#allocation5] sm:$0xff] }
  0x7d   :  { %v733_v46 = vmul.f32 %v99_v38, %v99_v38  ;;  %v732_v47 = vmul.f32 %v98_v39, %v98_v39 }
  0x80   :  { %185 = vadd.xlane.f32.xlu1 %v184_v44  ;;  %182 = vadd.xlane.f32.xlu0 %v181_v45  ;;  %v671_v44 = vsel %vm114_vm0, %v99_v38, 0.0  ;;  %v668_v45 = vsel %vm114_vm0, %v98_v39, 0.0 }
  0x84   :  { %346 = vadd.xlane.f32.xlu1 %v345_v48  ;;  %343 = vadd.xlane.f32.xlu0 %v342_v49  ;;  %v751_v48 = vsel %vm114_vm0, %v733_v46, 0.0  ;;  %v748_v49 = vsel %vm114_vm0, %v732_v47, 0.0 }
  0x88   :  { %191 = vadd.xlane.f32.xlu1 %v190_v52  ;;  %188 = vadd.xlane.f32.xlu0 %v187_v53  ;;  %v101_v52 = vld [vmem:[#allocation5 + $0x18] sm:$0xff]  ;;  %v674_v53 = vsel %vm114_vm0, %v100_v51, 0.0 }
  0x89   :  { %v677_v56 = vsel %vm114_vm0, %v101_v52, 0.0 }
  0x8c   :  { %352 = vadd.xlane.f32.xlu1 %v351_v58  ;;  %349 = vadd.xlane.f32.xlu0 %v348_v59  ;;  %v735_v58 = vmul.f32 %v101_v52, %v101_v52  ;;  %v754_v59 = vsel %vm114_vm0, %v734_v57, 0.0  ;;  %v7638_v52 = vshrl.u32 %v596_v34, 7 }
  0x8e   :  { %v757_v60 = vsel %vm114_vm0, %v735_v58, 0.0  ;;  %9195 = vst [vmem:[#allocation11_spill] sm:$0xff] %v7638_v52 }
  0x90   :  { %197 = vadd.xlane.f32.xlu1 %v196_v3  ;;  %194 = vadd.xlane.f32.xlu0 %v193_v4  ;;  %v103_v3 = vld [vmem:[#allocation5 + $0x28] sm:$0xff] }
  0x91   :  { %v683_v12 = vsel %vm114_vm0, %v103_v3, 0.0  ;;  %v737_v13 = vmul.f32 %v103_v3, %v103_v3 }
  0x93   :  { %v763_v27 = vsel %vm114_vm0, %v737_v13, 0.0  ;;  %v598_v13 = vsub.s32 0, %v7638_v52 }
  0x94   :  { %358 = vadd.xlane.f32.xlu1 %v357_v7  ;;  %355 = vadd.xlane.f32.xlu0 %v354_v8  ;;  %v736_v7 = vmul.f32 %v102_v61, %v102_v61 }
  0x96   :  { %v760_v18 = vsel %vm114_vm0, %v736_v7, 0.0 }
  0x98   :  { %203 = vadd.xlane.f32.xlu1 %v202_v14  ;;  %200 = vadd.xlane.f32.xlu0 %v199_v15 }
  0x9c   :  { %364 = vadd.xlane.f32.xlu1 %v363_v22  ;;  %361 = vadd.xlane.f32.xlu0 %v360_v23 }
  0xa0   :  { %209 = vadd.xlane.f32.xlu1 %v208_v28  ;;  %206 = vadd.xlane.f32.xlu0 %v205_v29  ;;  %v105_v28 = vld [vmem:[#allocation5 + $0x38] sm:$0xff] }
  0xa1   :  { %v689_v39 = vsel %vm114_vm0, %v105_v28, 0.0 }
  0xa4   :  { %370 = vadd.xlane.f32.xlu1 %v369_v36  ;;  %367 = vadd.xlane.f32.xlu0 %v366_v37 }
  0xa8   :  { %672 = vadd.xlane.f32.xlu1 %v671_v44  ;;  %669 = vadd.xlane.f32.xlu0 %v668_v45  ;;  %v738_v44 = vmul.f32 %v104_v19, %v104_v19  ;;  %v739_v45 = vmul.f32 %v105_v28, %v105_v28 }
  0xaa   :  { %v766_v58 = vsel %vm114_vm0, %v738_v44, 0.0 }
  0xac   :  { %752 = vadd.xlane.f32.xlu1 %v751_v48  ;;  %749 = vadd.xlane.f32.xlu0 %v748_v49 }
  0xb0   :  { %675 = vadd.xlane.f32.xlu0 %v674_v53  ;;  %678 = vadd.xlane.f32.xlu1 %v677_v56 }
  0xb4   :  { %755 = vadd.xlane.f32.xlu0 %v754_v59  ;;  %758 = vadd.xlane.f32.xlu1 %v757_v60  ;;  %v769_v59 = vsel %vm114_vm0, %v739_v45, 0.0 }
  0xb5   :  { %v126_v4 = vpop.xlane.xlu1 %125  ;;  %v117_v5 = vpop.xlane.xlu0 %116 }
  0xb6   :  { %v7621_v8 = vmul.f32 0.03125, %v117_v5  ;;  %v7631_v36 = vmul.f32 0.03125, %v126_v4  ;;  %v106_v5 = vld [vmem:[#allocation5 + $0x40] sm:$0xff] }
  0xb7   :  { %v692_v19 = vsel %vm114_vm0, %v106_v5, 0.0 }
  0xb8   :  { %681 = vadd.xlane.f32.xlu0 %v680_v6  ;;  %684 = vadd.xlane.f32.xlu1 %v683_v12  ;;  %v404_v22 = vmul.f32 %v7621_v8, %v7621_v8  ;;  %v407_v53 = vmul.f32 %v7631_v36, %v7631_v36  ;;  %v107_v6 = vld [vmem:[#allocation5 + $0x48] sm:$0xff] }
  0xb9   :  { %v278_v14 = vpop.xlane.xlu1 %277  ;;  %v120_v15 = vpop.xlane.xlu0 %119 }
  0xba   :  { %v372_v23 = vmul.f32 0.03125, %v278_v14  ;;  %v7627_v26 = vmul.f32 0.03125, %v120_v15 }
  0xbc   :  { %v436_v29 = vsub.f32 %v372_v23, %v404_v22  ;;  %761 = vadd.xlane.f32.xlu0 %v760_v18  ;;  %764 = vadd.xlane.f32.xlu1 %v763_v27  ;;  %v405_v47 = vmul.f32 %v7627_v26, %v7627_v26  ;;  %v7650_v18 = vld [vmem:[%s9186_s2] sm:$0xf]  ;;  %v695_v22 = vsel %vm114_vm0, %v107_v6, 0.0  ;;  %v740_v23 = vmul.f32 %v106_v5, %v106_v5 }
  0xbd   :  { %v281_v37 = vpop.xlane.xlu1 %280  ;;  %v123_v38 = vpop.xlane.xlu0 %122  ;;  %v741_v27 = vmul.f32 %v107_v6, %v107_v6 }
  0xbe   :  { %v500_v46 = vadd.f32 1e-05, %v436_v29  ;;  %v373_v48 = vmul.f32 0.03125, %v281_v37  ;;  %v7636_v49 = vmul.f32 0.03125, %v123_v38  ;;  %v634_v37 = vsub.s32 1, %v7638_v52 }
  0xc0   :  { %6851 = vrsqrt.f32 %v500_v46  ;;  %v437_v51 = vsub.f32 %v373_v48, %v405_v47  ;;  %687 = vadd.xlane.f32.xlu0 %v686_v35  ;;  %690 = vadd.xlane.f32.xlu1 %v689_v39  ;;  %v406_v61 = vmul.f32 %v7636_v49, %v7636_v49  ;;  %v468_v39 = vsub.f32 %v7413_v1, %v7621_v8 }
  0xc1   :  { %v287_v56 = vpop.xlane.xlu1 %286  ;;  %v284_v57 = vpop.xlane.xlu0 %283  ;;  %v7664_v46 = vrot.slane %v7650_v18, %v598_v13  ;;  %v772_v47 = vsel %vm114_vm0, %v740_v23, 0.0  ;;  %v7671_v1 = vrot.slane %v7650_v18, %v634_v37 }
  0xc2   :  { %v501_v60 = vadd.f32 1e-05, %v437_v51  ;;  %v375_v3 = vmul.f32 0.03125, %v287_v56  ;;  %v374_v4 = vmul.f32 0.03125, %v284_v57  ;;  %v775_v57 = vsel %vm114_vm0, %v741_v27, 0.0 }
  0xc4   :  { %6853 = vrsqrt.f32 %v501_v60  ;;  %v439_v7 = vsub.f32 %v375_v3, %v407_v53  ;;  %v438_v12 = vsub.f32 %v374_v4, %v406_v61  ;;  %767 = vadd.xlane.f32.xlu0 %v766_v58  ;;  %770 = vadd.xlane.f32.xlu1 %v769_v59  ;;  %v469_v60 = vsub.f32 %v7415_v2, %v7627_v26 }
  0xc5   :  { %v132_v14 = vpop.xlane.xlu1 %131  ;;  %v129_v15 = vpop.xlane.xlu0 %128  ;;  %v471_v2 = vsub.f32 %v7411_v0, %v7631_v36 }
  0xc6   :  { %v503_v28 = vadd.f32 1e-05, %v439_v7  ;;  %v502_v29 = vadd.f32 1e-05, %v438_v12  ;;  %v7654_v34 = vmul.f32 0.03125, %v132_v14  ;;  %v7656_v35 = vmul.f32 0.03125, %v129_v15 }
  0xc8   :  { %6855 = vrsqrt.f32 %v503_v28  ;;  %v409_v38 = vmul.f32 %v7654_v34, %v7654_v34  ;;  %693 = vadd.xlane.f32.xlu0 %v692_v19  ;;  %696 = vadd.xlane.f32.xlu1 %v695_v22  ;;  %v408_v51 = vmul.f32 %v7656_v35, %v7656_v35  ;;  %v470_v28 = vsub.f32 %v7428_v9, %v7636_v49 }
  0xc9   :  { %6857 = vrsqrt.f32 %v502_v29  ;;  %v293_v44 = vpop.xlane.xlu1 %292  ;;  %v290_v45 = vpop.xlane.xlu0 %289 }
  0xca   :  { %v6852_v48 = vpop.eup %6851  ;;  %v377_v53 = vmul.f32 0.03125, %v293_v44  ;;  %v376_v56 = vmul.f32 0.03125, %v290_v45 }
  0xcb   :  { %v564_v58 = vmul.f32 %v6852_v48, %v468_v39 }
  0xcc   :  { %v441_v8 = vsub.f32 %v377_v53, %v409_v38  ;;  %v440_v59 = vsub.f32 %v376_v56, %v408_v51  ;;  %773 = vadd.xlane.f32.xlu0 %v772_v47  ;;  %776 = vadd.xlane.f32.xlu1 %v775_v57 }
  0xcd   :  { %v138_v61 = vpop.xlane.xlu1 %137  ;;  %v135_v3 = vpop.xlane.xlu0 %134  ;;  %v600_v4 = vmul.f32 %v7664_v46, %v564_v58 }
  0xce   :  { %v6854_v5 = vpop.eup %6853  ;;  %v505_v6 = vadd.f32 1e-05, %v441_v8  ;;  %v504_v7 = vadd.f32 1e-05, %v440_v59  ;;  %v7676_v12 = vmul.f32 0.03125, %v138_v61  ;;  %v7678_v13 = vmul.f32 0.03125, %v135_v3 }
  0xcf   :  { %v636_v14 = vadd.f32 %v7671_v1, %v600_v4  ;;  %v565_v15 = vmul.f32 %v6854_v5, %v469_v60  ;;  %v473_v60 = vsub.f32 %v7439_v16, %v7654_v34 }
  0xd0   :  { %6859 = vrsqrt.f32 %v505_v6  ;;  %v411_v19 = vmul.f32 %v7676_v12, %v7676_v12  ;;  %v410_v29 = vmul.f32 %v7678_v13, %v7678_v13  ;;  %v472_v6 = vsub.f32 %v7441_v17, %v7656_v35 }
  0xd1   :  { %6861 = vrsqrt.f32 %v504_v7  ;;  %v299_v26 = vpop.xlane.xlu1 %298  ;;  %v296_v22 = vpop.xlane.xlu0 %295  ;;  %6427 = vmatprep.mubr.msk.f32.mxu0 %vm114_vm0, %v636_v14  ;;  %v601_v23 = vmul.f32 %v7664_v46, %v565_v15 }
  0xd2   :  { %v6856_v27 = vpop.eup %6855  ;;  %v379_v37 = vmul.f32 0.03125, %v299_v26  ;;  %v378_v38 = vmul.f32 0.03125, %v296_v22 }
  0xd3   :  { %v6858_v39 = vpop.eup %6857  ;;  %v637_v44 = vadd.f32 %v7671_v1, %v601_v23  ;;  %v567_v0 = vmul.f32 %v6856_v27, %v471_v2 }
  0xd4   :  { %v443_v36 = vsub.f32 %v379_v37, %v411_v19  ;;  %v442_v45 = vsub.f32 %v378_v38, %v410_v29  ;;  %v566_v47 = vmul.f32 %v6858_v39, %v470_v28 }
  0xd5   :  { %v144_v48 = vpop.xlane.xlu1 %143  ;;  %v141_v51 = vpop.xlane.xlu0 %140  ;;  %6428 = vmatmul.mubr.msk.f32.vlgmr.msra.gmra.mrb[0].mxu0 %vm114_vm0, %v637_v44  ;;  %v603_v53 = vmul.f32 %v7664_v46, %v567_v0  ;;  %v475_v44 = vsub.f32 %v7453_v24, %v7676_v12 }
  0xd6   :  { %v507_v56 = vadd.f32 1e-05, %v443_v36  ;;  %v506_v9 = vadd.f32 1e-05, %v442_v45  ;;  %v7694_v49 = vmul.f32 0.03125, %v144_v48  ;;  %v7696_v57 = vmul.f32 0.03125, %v141_v51 }
  0xd7   :  { %v602_v58 = vmul.f32 %v7664_v46, %v566_v47  ;;  %v639_v59 = vadd.f32 %v7671_v1, %v603_v53  ;;  %v474_v48 = vsub.f32 %v7455_v25, %v7678_v13 }
  0xd8   :  { %6863 = vrsqrt.f32 %v507_v56  ;;  %v413_v8 = vmul.f32 %v7694_v49, %v7694_v49  ;;  %v412_v7 = vmul.f32 %v7696_v57, %v7696_v57 }
  0xd9   :  { %6865 = vrsqrt.f32 %v506_v9  ;;  %v305_v61 = vpop.xlane.xlu1 %304  ;;  %v302_v3 = vpop.xlane.xlu0 %301  ;;  %v638_v4 = vadd.f32 %v7671_v1, %v602_v58  ;;  %v108_v9 = vld [vmem:[#allocation5 + $0x50] sm:$0xff]  ;;  %v109_v58 = vld [vmem:[#allocation5 + $0x58] sm:$0xff] }
  0xda   :  { %v6860_v5 = vpop.eup %6859  ;;  %v381_v14 = vmul.f32 0.03125, %v305_v61  ;;  %v380_v15 = vmul.f32 0.03125, %v302_v3  ;;  %v698_v12 = vsel %vm114_vm0, %v108_v9, 0.0 }
  0xdb   :  { %v6862_v19 = vpop.eup %6861  ;;  %6430 = vmatprep.mubr.msk.f32.mxu0 %vm114_vm0, %v638_v4  ;;  %v569_v2 = vmul.f32 %v6860_v5, %v473_v60  ;;  %v742_v60 = vmul.f32 %v108_v9, %v108_v9  ;;  %699 = vadd.xlane.f32.xlu0 %v698_v12 }
  0xdc   :  { %v445_v26 = vsub.f32 %v381_v14, %v413_v8  ;;  %v444_v16 = vsub.f32 %v380_v15, %v412_v7  ;;  %6431 = vmatmul.mubr.msk.f32.gmra.mrb[2].mxu0 %vm114_vm0, %v639_v59  ;;  %v568_v34 = vmul.f32 %v6862_v19, %v472_v6  ;;  %v701_v59 = vsel %vm114_vm0, %v109_v58, 0.0  ;;  %v110_v14 = vld [vmem:[#allocation5 + $0x60] sm:$0xff]  ;;  %v111_v15 = vld [vmem:[#allocation5 + $0x68] sm:$0xff] }
  0xdd   :  { %v150_v22 = vpop.xlane.xlu1 %149  ;;  %v147_v23 = vpop.xlane.xlu0 %146  ;;  %v605_v27 = vmul.f32 %v7664_v46, %v569_v2  ;;  %702 = vadd.xlane.f32.xlu1 %v701_v59  ;;  %v778_v6 = vsel %vm114_vm0, %v742_v60, 0.0  ;;  %v743_v7 = vmul.f32 %v109_v58, %v109_v58 }
  0xde   :  { %v509_v28 = vadd.f32 1e-05, %v445_v26  ;;  %v508_v17 = vadd.f32 1e-05, %v444_v16  ;;  %v7712_v35 = vmul.f32 0.03125, %v150_v22  ;;  %v7714_v29 = vmul.f32 0.03125, %v147_v23 }
  0xdf   :  { %v604_v37 = vmul.f32 %v7664_v46, %v568_v34  ;;  %v641_v39 = vadd.f32 %v7671_v1, %v605_v27  ;;  %v477_v34 = vsub.f32 %v7467_v32, %v7694_v49  ;;  %v476_v22 = vsub.f32 %v7469_v33, %v7696_v57  ;;  %779 = vadd.xlane.f32.xlu0 %v778_v6 }
  0xe0   :  { %6867 = vrsqrt.f32 %v509_v28  ;;  %v415_v38 = vmul.f32 %v7712_v35, %v7712_v35  ;;  %v414_v51 = vmul.f32 %v7714_v29, %v7714_v29  ;;  %v781_v27 = vsel %vm114_vm0, %v743_v7, 0.0 }
  0xe1   :  { %6869 = vrsqrt.f32 %v508_v17  ;;  %v311_v0 = vpop.xlane.xlu1 %310  ;;  %v308_v36 = vpop.xlane.xlu0 %307  ;;  %v640_v45 = vadd.f32 %v7671_v1, %v604_v37  ;;  %v704_v37 = vsel %vm114_vm0, %v110_v14, 0.0  ;;  %782 = vadd.xlane.f32.xlu1 %v781_v27  ;;  %v707_v33 = vsel %vm114_vm0, %v111_v15, 0.0 }
  0xe2   :  { %v6864_v47 = vpop.eup %6863  ;;  %v383_v53 = vmul.f32 0.03125, %v311_v0  ;;  %v382_v56 = vmul.f32 0.03125, %v308_v36  ;;  %v744_v49 = vmul.f32 %v110_v14, %v110_v14 }
  0xe3   :  { %v6866_v8 = vpop.eup %6865  ;;  %6433 = vmatprep.mubr.msk.f32.mxu0 %vm114_vm0, %v640_v45  ;;  %v571_v24 = vmul.f32 %v6864_v47, %v475_v44  ;;  %v745_v45 = vmul.f32 %v111_v15, %v111_v15  ;;  %705 = vadd.xlane.f32.xlu0 %v704_v37 }
  0xe4   :  { %v447_v61 = vsub.f32 %v383_v53, %v415_v38  ;;  %v446_v3 = vsub.f32 %v382_v56, %v414_v51  ;;  %6434 = vmatmul.mubr.msk.f32.gmra.mrb[4].mxu0 %vm114_vm0, %v641_v39  ;;  %v570_v25 = vmul.f32 %v6866_v8, %v474_v48 }
  0xe5   :  { %v156_v13 = vpop.xlane.xlu1 %155  ;;  %v153_v4 = vpop.xlane.xlu0 %152  ;;  %v607_v5 = vmul.f32 %v7664_v46, %v571_v24  ;;  %708 = vadd.xlane.f32.xlu1 %v707_v33  ;;  %v784_v24 = vsel %vm114_vm0, %v744_v49, 0.0  ;;  %v787_v12 = vsel %vm114_vm0, %v745_v45, 0.0 }
  0xe6   :  { %v511_v19 = vadd.f32 1e-05, %v447_v61  ;;  %v510_v2 = vadd.f32 1e-05, %v446_v3  ;;  %v7733_v26 = vmul.f32 0.03125, %v156_v13  ;;  %v7735_v16 = vmul.f32 0.03125, %v153_v4 }
  0xe7   :  { %v606_v23 = vmul.f32 %v7664_v46, %v570_v25  ;;  %v643_v17 = vadd.f32 %v7671_v1, %v607_v5  ;;  %785 = vadd.xlane.f32.xlu0 %v784_v24  ;;  %v479_v5 = vsub.f32 %v7481_v40, %v7712_v35 }
  0xe8   :  { %6871 = vrsqrt.f32 %v511_v19  ;;  %v417_v28 = vmul.f32 %v7733_v26, %v7733_v26  ;;  %v416_v44 = vmul.f32 %v7735_v16, %v7735_v16  ;;  %v478_v19 = vsub.f32 %v7483_v41, %v7714_v29 }
  0xe9   :  { %6873 = vrsqrt.f32 %v510_v2  ;;  %v317_v38 = vpop.xlane.xlu1 %316  ;;  %v314_v39 = vpop.xlane.xlu0 %313  ;;  %v642_v32 = vadd.f32 %v7671_v1, %v606_v23  ;;  %788 = vadd.xlane.f32.xlu1 %v787_v12 }
  0xea   :  { %v6868_v57 = vpop.eup %6867  ;;  %v385_v0 = vmul.f32 0.03125, %v317_v38  ;;  %v384_v36 = vmul.f32 0.03125, %v314_v39 }
  0xeb   :  { %v6870_v47 = vpop.eup %6869  ;;  %6436 = vmatprep.mubr.msk.f32.mxu0 %vm114_vm0, %v642_v32  ;;  %v573_v48 = vmul.f32 %v6868_v57, %v477_v34 }
  0xec   :  { %v449_v51 = vsub.f32 %v385_v0, %v417_v28  ;;  %v448_v53 = vsub.f32 %v384_v36, %v416_v44  ;;  %6437 = vmatmul.mubr.msk.f32.gmra.mrb[6].mxu0 %vm114_vm0, %v643_v17  ;;  %v572_v56 = vmul.f32 %v6870_v47, %v476_v22  ;;  %v481_v44 = vsub.f32 %v7507_v54, %v7733_v26 }
  0xed   :  { %v162_v9 = vpop.xlane.xlu1 %161  ;;  %v159_v58 = vpop.xlane.xlu0 %158  ;;  %v609_v8 = vmul.f32 %v7664_v46, %v573_v48  ;;  %v480_v48 = vsub.f32 %v7509_v55, %v7735_v16 }
  0xee   :  { %v513_v59 = vadd.f32 1e-05, %v449_v51  ;;  %v512_v60 = vadd.f32 1e-05, %v448_v53  ;;  %v7756_v61 = vmul.f32 0.03125, %v162_v9  ;;  %v7758_v3 = vmul.f32 0.03125, %v159_v58 }
  0xef   :  { %v608_v25 = vmul.f32 %v7664_v46, %v572_v56  ;;  %v645_v4 = vadd.f32 %v7671_v1, %v609_v8 }
  0xf0   :  { %6875 = vrsqrt.f32 %v513_v59  ;;  %v419_v13 = vmul.f32 %v7756_v61, %v7756_v61  ;;  %v418_v2 = vmul.f32 %v7758_v3, %v7758_v3 }
  0xf1   :  { %6877 = vrsqrt.f32 %v512_v60  ;;  %v323_v6 = vpop.xlane.xlu1 %322  ;;  %v320_v7 = vpop.xlane.xlu0 %319  ;;  %v644_v14 = vadd.f32 %v7671_v1, %v608_v25 }
  0xf2   :  { %v6872_v15 = vpop.eup %6871  ;;  %v387_v34 = vmul.f32 0.03125, %v323_v6  ;;  %v386_v22 = vmul.f32 0.03125, %v320_v7  ;;  %v483_v6 = vsub.f32 %v7521_v62, %v7756_v61 }
  0xf3   :  { %v6874_v23 = vpop.eup %6873  ;;  %6439 = vmatprep.mubr.msk.f32.mxu0 %vm114_vm0, %v644_v14  ;;  %v575_v27 = vmul.f32 %v6872_v15, %v479_v5 }
  0xf4   :  { %v451_v40 = vsub.f32 %v387_v34, %v419_v13  ;;  %v450_v35 = vsub.f32 %v386_v22, %v418_v2  ;;  %6440 = vmatmul.mubr.msk.f32.gmra.mrb[8].mxu0 %vm114_vm0, %v645_v4  ;;  %v574_v28 = vmul.f32 %v6874_v23, %v478_v19  ;;  %v482_v2 = vsub.f32 %v7523_v63, %v7758_v3 }
  0xf5   :  { %v168_v17 = vpop.xlane.xlu1 %167  ;;  %v165_v37 = vpop.xlane.xlu0 %164  ;;  %v611_v38 = vmul.f32 %v7664_v46, %v575_v27 }
  0xf6   :  { %v515_v39 = vadd.f32 1e-05, %v451_v40  ;;  %v514_v41 = vadd.f32 1e-05, %v450_v35  ;;  %v7774_v29 = vmul.f32 0.03125, %v168_v17  ;;  %v7776_v32 = vmul.f32 0.03125, %v165_v37 }
  0xf7   :  { %v610_v33 = vmul.f32 %v7664_v46, %v574_v28  ;;  %v647_v57 = vadd.f32 %v7671_v1, %v611_v38 }
  0xf8   :  { %6879 = vrsqrt.f32 %v515_v39  ;;  %v421_v49 = vmul.f32 %v7774_v29, %v7774_v29  ;;  %v420_v51 = vmul.f32 %v7776_v32, %v7776_v32 }
  0xf9   :  { %6881 = vrsqrt.f32 %v514_v41  ;;  %v329_v0 = vpop.xlane.xlu1 %328  ;;  %v326_v36 = vpop.xlane.xlu0 %325  ;;  %v646_v45 = vadd.f32 %v7671_v1, %v610_v33 }
  0xfa   :  { %v6876_v47 = vpop.eup %6875  ;;  %v389_v53 = vmul.f32 0.03125, %v329_v0  ;;  %v388_v56 = vmul.f32 0.03125, %v326_v36 }
  0xfb   :  { %v6878_v9 = vpop.eup %6877  ;;  %6442 = vmatprep.mubr.msk.f32.mxu0 %vm114_vm0, %v646_v45  ;;  %v577_v58 = vmul.f32 %v6876_v47, %v481_v44  ;;  %v484_v47 = vsub.f32 %v7537_v11, %v7776_v32 }
  0xfc   :  { %v453_v8 = vsub.f32 %v389_v53, %v421_v49  ;;  %v452_v54 = vsub.f32 %v388_v56, %v420_v51  ;;  %6443 = vmatmul.mubr.msk.f32.gmra.mrb[10].mxu0 %vm114_vm0, %v647_v57  ;;  %v576_v26 = vmul.f32 %v6878_v9, %v480_v48  ;;  %v485_v57 = vsub.f32 %v7535_v10, %v7774_v29 }
  0xfd   :  { %v174_v24 = vpop.xlane.xlu1 %173  ;;  %v171_v12 = vpop.xlane.xlu0 %170  ;;  %v613_v59 = vmul.f32 %v7664_v46, %v577_v58 }
  0xfe   :  { %v517_v60 = vadd.f32 1e-05, %v453_v8  ;;  %v516_v55 = vadd.f32 1e-05, %v452_v54  ;;  %v7792_v16 = vmul.f32 0.03125, %v174_v24  ;;  %v7794_v25 = vmul.f32 0.03125, %v171_v12 }
  0xff   :  { %v612_v13 = vmul.f32 %v7664_v46, %v576_v26  ;;  %v649_v5 = vadd.f32 %v7671_v1, %v613_v59 }
 0x100   :  { %6883 = vrsqrt.f32 %v517_v60  ;;  %v423_v4 = vmul.f32 %v7792_v16, %v7792_v16  ;;  %v422_v34 = vmul.f32 %v7794_v25, %v7794_v25 }
 0x101   :  { %6885 = vrsqrt.f32 %v516_v55  ;;  %v335_v7 = vpop.xlane.xlu1 %334  ;;  %v332_v14 = vpop.xlane.xlu0 %331  ;;  %v648_v15 = vadd.f32 %v7671_v1, %v612_v13  ;;  %v487_v13 = vsub.f32 %v7549_v20, %v7792_v16 }
 0x102   :  { %v6880_v19 = vpop.eup %6879  ;;  %v391_v22 = vmul.f32 0.03125, %v335_v7  ;;  %v390_v23 = vmul.f32 0.03125, %v332_v14  ;;  %v486_v14 = vsub.f32 %v7551_v21, %v7794_v25 }
 0x103   :  { %v6882_v27 = vpop.eup %6881  ;;  %6445 = vmatprep.mubr.msk.f32.mxu0 %vm114_vm0, %v648_v15  ;;  %v579_v40 = vmul.f32 %v6880_v19, %v483_v6 }
 0x104   :  { %v455_v35 = vsub.f32 %v391_v22, %v423_v4  ;;  %v454_v62 = vsub.f32 %v390_v23, %v422_v34  ;;  %6446 = vmatmul.mubr.msk.f32.gmra.mrb[12].mxu0 %vm114_vm0, %v649_v5  ;;  %v578_v61 = vmul.f32 %v6882_v27, %v482_v2 }
 0x105   :  { %v180_v28 = vpop.xlane.xlu1 %179  ;;  %v177_v17 = vpop.xlane.xlu0 %176  ;;  %v615_v37 = vmul.f32 %v7664_v46, %v579_v40 }
 0x106   :  { %v519_v38 = vadd.f32 1e-05, %v455_v35  ;;  %v518_v63 = vadd.f32 1e-05, %v454_v62  ;;  %v7810_v3 = vmul.f32 0.03125, %v180_v28  ;;  %v7812_v39 = vmul.f32 0.03125, %v177_v17 }
 0x107   :  { %v614_v41 = vmul.f32 %v7664_v46, %v578_v61  ;;  %v651_v49 = vadd.f32 %v7671_v1, %v615_v37 }
 0x108   :  { %6887 = vrsqrt.f32 %v519_v38  ;;  %v425_v33 = vmul.f32 %v7810_v3, %v7810_v3  ;;  %v424_v48 = vmul.f32 %v7812_v39, %v7812_v39  ;;  %v489_v38 = vsub.f32 %v7563_v30, %v7810_v3 }
 0x109   :  { %6889 = vrsqrt.f32 %v518_v63  ;;  %v341_v44 = vpop.xlane.xlu1 %340  ;;  %v338_v0 = vpop.xlane.xlu0 %337  ;;  %v650_v36 = vadd.f32 %v7671_v1, %v614_v41 }
 0x10a   :  { %v6884_v45 = vpop.eup %6883  ;;  %v393_v51 = vmul.f32 0.03125, %v341_v44  ;;  %v392_v53 = vmul.f32 0.03125, %v338_v0 }
 0x10b   :  { %v6886_v56 = vpop.eup %6885  ;;  %6448 = vmatprep.mubr.msk.f32.mxu0 %vm114_vm0, %v650_v36  ;;  %v581_v9 = vmul.f32 %v6884_v45, %v485_v57  ;;  %v488_v57 = vsub.f32 %v7565_v31, %v7812_v39 }
 0x10c   :  { %v457_v58 = vsub.f32 %v393_v51, %v425_v33  ;;  %v456_v10 = vsub.f32 %v392_v53, %v424_v48  ;;  %6449 = vmatmul.mubr.msk.f32.gmra.mrb[14].mxu0 %vm114_vm0, %v651_v49  ;;  %v580_v29 = vmul.f32 %v6886_v56, %v484_v47 }
 0x10d   :  { %v186_v8 = vpop.xlane.xlu1 %185  ;;  %v183_v54 = vpop.xlane.xlu0 %182  ;;  %v617_v26 = vmul.f32 %v7664_v46, %v581_v9 }
 0x10e   :  { %v521_v24 = vadd.f32 1e-05, %v457_v58  ;;  %v520_v11 = vadd.f32 1e-05, %v456_v10  ;;  %v7828_v32 = vmul.f32 0.03125, %v186_v8  ;;  %v7830_v12 = vmul.f32 0.03125, %v183_v54 }
 0x10f   :  { %v616_v59 = vmul.f32 %v7664_v46, %v580_v29  ;;  %v653_v55 = vadd.f32 %v7671_v1, %v617_v26 }
 0x110   :  { %6891 = vrsqrt.f32 %v521_v24  ;;  %v427_v60 = vmul.f32 %v7828_v32, %v7828_v32  ;;  %v426_v15 = vmul.f32 %v7830_v12, %v7830_v12  ;;  %v491_v54 = vsub.f32 %v7577_v42, %v7828_v32 }
 0x111   :  { %6893 = vrsqrt.f32 %v520_v11  ;;  %v347_v4 = vpop.xlane.xlu1 %346  ;;  %v344_v5 = vpop.xlane.xlu0 %343  ;;  %v652_v6 = vadd.f32 %v7671_v1, %v616_v59 }
 0x112   :  { %v6888_v7 = vpop.eup %6887  ;;  %v395_v19 = vmul.f32 0.03125, %v347_v4  ;;  %v394_v2 = vmul.f32 0.03125, %v344_v5 }
 0x113   :  { %v6890_v34 = vpop.eup %6889  ;;  %6451 = vmatprep.mubr.msk.f32.mxu0 %vm114_vm0, %v652_v6  ;;  %v583_v22 = vmul.f32 %v6888_v7, %v487_v13 }
 0x114   :  { %v459_v23 = vsub.f32 %v395_v19, %v427_v60  ;;  %v458_v20 = vsub.f32 %v394_v2, %v426_v15  ;;  %6452 = vmatmul.mubr.msk.f32.gmra.mrb[16].mxu0 %vm114_vm0, %v653_v55  ;;  %v582_v16 = vmul.f32 %v6890_v34, %v486_v14  ;;  %v490_v60 = vsub.f32 %v7579_v43, %v7830_v12 }
 0x115   :  { %v192_v27 = vpop.xlane.xlu1 %191  ;;  %v189_v40 = vpop.xlane.xlu0 %188  ;;  %v619_v35 = vmul.f32 %v7664_v46, %v583_v22 }
 0x116   :  { %v523_v62 = vadd.f32 1e-05, %v459_v23  ;;  %v522_v21 = vadd.f32 1e-05, %v458_v20  ;;  %v7846_v25 = vmul.f32 0.03125, %v192_v27  ;;  %v7848_v61 = vmul.f32 0.03125, %v189_v40 }
 0x117   :  { %v618_v28 = vmul.f32 %v7664_v46, %v582_v16  ;;  %v655_v37 = vadd.f32 %v7671_v1, %v619_v35 }
 0x118   :  { %6895 = vrsqrt.f32 %v523_v62  ;;  %v429_v17 = vmul.f32 %v7846_v25, %v7846_v25  ;;  %v428_v44 = vmul.f32 %v7848_v61, %v7848_v61  ;;  %v493_v16 = vsub.f32 %v7591_v50, %v7846_v25 }
 0x119   :  { %6897 = vrsqrt.f32 %v522_v21  ;;  %v353_v63 = vpop.xlane.xlu1 %352  ;;  %v350_v41 = vpop.xlane.xlu0 %349  ;;  %v654_v33 = vadd.f32 %v7671_v1, %v618_v28  ;;  %v7203_v21 = vld [vmem:[#allocation2 + $0xc0] sm:$0xff] }
 0x11a   :  { %v6892_v49 = vpop.eup %6891  ;;  %v397_v0 = vmul.f32 0.03125, %v353_v63  ;;  %v396_v36 = vmul.f32 0.03125, %v350_v41  ;;  %v492_v28 = vsub.f32 %v7203_v21, %v7848_v61 }
 0x11b   :  { %v6894_v45 = vpop.eup %6893  ;;  %6454 = vmatprep.mubr.msk.f32.mxu0 %vm114_vm0, %v654_v33  ;;  %v585_v47 = vmul.f32 %v6892_v49, %v489_v38 }
 0x11c   :  { %v461_v48 = vsub.f32 %v397_v0, %v429_v17  ;;  %v460_v30 = vsub.f32 %v396_v36, %v428_v44  ;;  %6455 = vmatmul.mubr.msk.f32.gmra.mrb[18].mxu0 %vm114_vm0, %v655_v37  ;;  %v584_v3 = vmul.f32 %v6894_v45, %v488_v57 }
 0x11d   :  { %v198_v51 = vpop.xlane.xlu1 %197  ;;  %v195_v53 = vpop.xlane.xlu0 %194  ;;  %v621_v56 = vmul.f32 %v7664_v46, %v585_v47 }
 0x11e   :  { %v525_v9 = vadd.f32 1e-05, %v461_v48  ;;  %v524_v31 = vadd.f32 1e-05, %v460_v30  ;;  %v7864_v39 = vmul.f32 0.03125, %v198_v51  ;;  %v7866_v58 = vmul.f32 0.03125, %v195_v53 }
 0x11f   :  { %v620_v10 = vmul.f32 %v7664_v46, %v584_v3  ;;  %v657_v8 = vadd.f32 %v7671_v1, %v621_v56  ;;  %v7204_v3 = vld [vmem:[#allocation2 + $0xd8] sm:$0xff] }
 0x120   :  { %6899 = vrsqrt.f32 %v525_v9  ;;  %v431_v29 = vmul.f32 %v7864_v39, %v7864_v39  ;;  %v430_v55 = vmul.f32 %v7866_v58, %v7866_v58  ;;  %v495_v51 = vsub.f32 %v7204_v3, %v7864_v39 }
 0x121   :  { %6901 = vrsqrt.f32 %v524_v31  ;;  %v359_v26 = vpop.xlane.xlu1 %358  ;;  %v356_v24 = vpop.xlane.xlu0 %355  ;;  %v656_v11 = vadd.f32 %v7671_v1, %v620_v10  ;;  %v7205_v10 = vld [vmem:[#allocation2 + $0xd0] sm:$0xff] }
 0x122   :  { %v6896_v59 = vpop.eup %6895  ;;  %v399_v13 = vmul.f32 0.03125, %v359_v26  ;;  %v398_v4 = vmul.f32 0.03125, %v356_v24 }
 0x123   :  { %v6898_v5 = vpop.eup %6897  ;;  %6457 = vmatprep.mubr.msk.f32.mxu0 %vm114_vm0, %v656_v11  ;;  %v587_v6 = vmul.f32 %v6896_v59, %v491_v54 }
 0x124   :  { %v463_v7 = vsub.f32 %v399_v13, %v431_v29  ;;  %v462_v42 = vsub.f32 %v398_v4, %v430_v55  ;;  %6458 = vmatmul.mubr.msk.f32.gmra.mrb[20].mxu0 %vm114_vm0, %v657_v8  ;;  %v586_v32 = vmul.f32 %v6898_v5, %v490_v60  ;;  %v494_v29 = vsub.f32 %v7205_v10, %v7866_v58  ;;  %v61_v58 = vld [vmem:[%s9189_s5] sm:$0xff]  ;;  %v62_v5 = vld [vmem:[%s9189_s5 + $0x8] sm:$0xff] }
 0x125   :  { %v204_v14 = vpop.xlane.xlu1 %203  ;;  %v201_v15 = vpop.xlane.xlu0 %200  ;;  %v623_v19 = vmul.f32 %v7664_v46, %v587_v6 }
 0x126   :  { %v527_v2 = vadd.f32 1e-05, %v463_v7  ;;  %v526_v43 = vadd.f32 1e-05, %v462_v42  ;;  %v7882_v12 = vmul.f32 0.03125, %v204_v14  ;;  %v7884_v34 = vmul.f32 0.03125, %v201_v15 }
 0x127   :  { %v622_v22 = vmul.f32 %v7664_v46, %v586_v32  ;;  %v659_v20 = vadd.f32 %v7671_v1, %v623_v19  ;;  %v6779_v15 = vpack.c.bf16 %v62_v5, %v61_v58 }
 0x128   :  { %6903 = vrsqrt.f32 %v527_v2  ;;  %v433_v23 = vmul.f32 %v7882_v12, %v7882_v12  ;;  %v432_v17 = vmul.f32 %v7884_v34, %v7884_v34 }
 0x129   :  { %6905 = vrsqrt.f32 %v526_v43  ;;  %v365_v27 = vpop.xlane.xlu1 %364  ;;  %v362_v40 = vpop.xlane.xlu0 %361  ;;  %v658_v35 = vadd.f32 %v7671_v1, %v622_v22  ;;  %v7206_v43 = vld [vmem:[#allocation2 + $0xe8] sm:$0xff]  ;;  %6780 = vmatprep.subr.bf16.mxu1 %v6779_v15 }
 0x12a   :  { %v6900_v62 = vpop.eup %6899  ;;  %v401_v37 = vmul.f32 0.03125, %v365_v27  ;;  %v400_v38 = vmul.f32 0.03125, %v362_v40  ;;  %v497_v22 = vsub.f32 %v7206_v43, %v7882_v12  ;;  %6782 = vmatpush3.bf16.msra.mxu1 %v6779_v15  ;;  %v930_v15 = vsub.s32 3, %v7638_v52  ;;  %v7210_v43 = vld [vmem:[#allocation5 + $0x8] sm:$0xff] }
 0x12b   :  { %v6902_v63 = vpop.eup %6901  ;;  %6460 = vmatprep.mubr.msk.f32.mxu0 %vm114_vm0, %v658_v35  ;;  %v589_v41 = vmul.f32 %v6900_v62, %v493_v16  ;;  %v63_v35 = vld [vmem:[%s9189_s5 + $0x10] sm:$0xff]  ;;  %v64_v62 = vld [vmem:[%s9189_s5 + $0x18] sm:$0xff] }
 0x12c   :  { %v465_v33 = vsub.f32 %v401_v37, %v433_v23  ;;  %v464_v50 = vsub.f32 %v400_v38, %v432_v17  ;;  %6461 = vmatmul.mubr.msk.f32.gmra.mrb[22].mxu0 %vm114_vm0, %v659_v20  ;;  %v588_v25 = vmul.f32 %v6902_v63, %v492_v28  ;;  %v7207_v23 = vld [vmem:[#allocation2 + $0xe0] sm:$0xff]  ;;  %v6783_v17 = vpack.c.bf16 %v64_v62, %v63_v35 }
 0x12d   :  { %v210_v49 = vpop.xlane.xlu1 %209  ;;  %v207_v57 = vpop.xlane.xlu0 %206  ;;  %v625_v44 = vmul.f32 %v7664_v46, %v589_v41  ;;  %v496_v20 = vsub.f32 %v7207_v23, %v7884_v34 }
 0x12e   :  { %v529_v0 = vadd.f32 1e-05, %v465_v33  ;;  %v528_v61 = vadd.f32 1e-05, %v464_v50  ;;  %v7899_v36 = vmul.f32 0.03125, %v210_v49  ;;  %v7901_v45 = vmul.f32 0.03125, %v207_v57  ;;  %6784 = vmatprep.subr.bf16.mxu1 %v6783_v17 }
 0x12f   :  { %v624_v47 = vmul.f32 %v7664_v46, %v588_v25  ;;  %v661_v30 = vadd.f32 %v7671_v1, %v625_v44  ;;  %6786 = vmatpush3.bf16.msra.mxu1 %v6783_v17 }
 0x130   :  { %6907 = vrsqrt.f32 %v529_v0  ;;  %v435_v48 = vmul.f32 %v7899_v36, %v7899_v36  ;;  %v434_v8 = vmul.f32 %v7901_v45, %v7901_v45 }
 0x131   :  { %6909 = vrsqrt.f32 %v528_v61  ;;  %v371_v53 = vpop.xlane.xlu1 %370  ;;  %v368_v56 = vpop.xlane.xlu0 %367  ;;  %v660_v9 = vadd.f32 %v7671_v1, %v624_v47 }
 0x132   :  { %v6904_v31 = vpop.eup %6903  ;;  %v403_v54 = vmul.f32 0.03125, %v371_v53  ;;  %v402_v26 = vmul.f32 0.03125, %v368_v56 }
 0x133   :  { %v6906_v24 = vpop.eup %6905  ;;  %6463 = vmatprep.mubr.msk.f32.mxu0 %vm114_vm0, %v660_v9  ;;  %v591_v11 = vmul.f32 %v6904_v31, %v495_v51  ;;  %v7208_v51 = vld [vmem:[#allocation2 + $0xf8] sm:$0xff] }
 0x134   :  { %v467_v59 = vsub.f32 %v403_v54, %v435_v48  ;;  %v466_v39 = vsub.f32 %v402_v26, %v434_v8  ;;  %6464 = vmatmul.mubr.msk.f32.gmra.mrb[24].mxu0 %vm114_vm0, %v661_v30  ;;  %v590_v60 = vmul.f32 %v6906_v24, %v494_v29  ;;  %v499_v53 = vsub.f32 %v7208_v51, %v7899_v36  ;;  %v7209_v29 = vld [vmem:[#allocation2 + $0xf0] sm:$0xff] }
 0x135   :  { %v673_v55 = vpop.xlane.xlu1 %672  ;;  %v670_v13 = vpop.xlane.xlu0 %669  ;;  %v627_v4 = vmul.f32 %v7664_v46, %v591_v11  ;;  %v498_v8 = vsub.f32 %v7209_v29, %v7901_v45 }
 0x136   :  { %v531_v6 = vadd.f32 1e-05, %v467_v59  ;;  %v530_v7 = vadd.f32 1e-05, %v466_v39  ;;  %v7921_v42 = vmul.f32 0.03125, %v673_v55  ;;  %v7923_v32 = vmul.f32 0.03125, %v670_v13 }
 0x137   :  { %v626_v14 = vmul.f32 %v7664_v46, %v590_v60  ;;  %v663_v2 = vadd.f32 %v7671_v1, %v627_v4  ;;  %v910_v13 = vsub.s32 2, %v7638_v52 }
 0x138   :  { %6911 = vrsqrt.f32 %v531_v6  ;;  %v813_v19 = vmul.f32 %v7921_v42, %v7921_v42  ;;  %v812_v12 = vmul.f32 %v7923_v32, %v7923_v32 }
 0x139   :  { %6913 = vrsqrt.f32 %v530_v7  ;;  %v753_v16 = vpop.xlane.xlu1 %752  ;;  %v750_v27 = vpop.xlane.xlu0 %749  ;;  %v662_v40 = vadd.f32 %v7671_v1, %v626_v14 }
 0x13a   :  { %v6908_v21 = vpop.eup %6907  ;;  %v797_v28 = vmul.f32 0.03125, %v753_v16  ;;  %v796_v34 = vmul.f32 0.03125, %v750_v27  ;;  %v7211_v27 = vld [vmem:[#allocation5] sm:$0xff] }
 0x13b   :  { %v6910_v37 = vpop.eup %6909  ;;  %6466 = vmatprep.mubr.msk.f32.mxu0 %vm114_vm0, %v662_v40  ;;  %v593_v38 = vmul.f32 %v6908_v21, %v497_v22  ;;  %v845_v22 = vsub.f32 %v7210_v43, %v7921_v42  ;;  %v844_v40 = vsub.f32 %v7211_v27, %v7923_v32  ;;  %v7212_v42 = vld [vmem:[%s9186_s2] sm:$0xf] }
 0x13c   :  { %v829_v63 = vsub.f32 %v797_v28, %v813_v19  ;;  %v828_v41 = vsub.f32 %v796_v34, %v812_v12  ;;  %6467 = vmatmul.mubr.msk.f32.gmra.mrb[26].mxu0 %vm114_vm0, %v663_v2  ;;  %v592_v33 = vmul.f32 %v6910_v37, %v496_v20  ;;  %v7974_v20 = vrot.slane %v7650_v18, %v910_v13 }
 0x13d   :  { %v676_v50 = vpop.xlane.xlu0 %675  ;;  %v679_v25 = vpop.xlane.xlu1 %678  ;;  %v629_v49 = vmul.f32 %v7664_v46, %v593_v38  ;;  %v7982_v12 = vrot.slane %v7212_v42, %v930_v15 }
 0x13e   :  { %v861_v57 = vadd.f32 1e-05, %v829_v63  ;;  %v860_v44 = vadd.f32 1e-05, %v828_v41  ;;  %v7943_v0 = vmul.f32 0.03125, %v676_v50  ;;  %v7945_v61 = vmul.f32 0.03125, %v679_v25 }
 0x13f   :  { %v628_v47 = vmul.f32 %v7664_v46, %v592_v33  ;;  %v665_v3 = vadd.f32 %v7671_v1, %v629_v49  ;;  %v7213_v50 = vld [vmem:[#allocation5 + $0x10] sm:$0xff] }
 0x140   :  { %6915 = vrsqrt.f32 %v861_v57  ;;  %v814_v48 = vmul.f32 %v7943_v0, %v7943_v0  ;;  %v815_v30 = vmul.f32 %v7945_v61, %v7945_v61  ;;  %v846_v25 = vsub.f32 %v7213_v50, %v7943_v0 }
 0x141   :  { %6917 = vrsqrt.f32 %v860_v44  ;;  %v756_v56 = vpop.xlane.xlu0 %755  ;;  %v664_v9 = vadd.f32 %v7671_v1, %v628_v47  ;;  %v759_v31 = vpop.xlane.xlu1 %758  ;;  %v7214_v47 = vld [vmem:[#allocation5 + $0x18] sm:$0xff] }
 0x142   :  { %v6912_v10 = vpop.eup %6911  ;;  %v798_v54 = vmul.f32 0.03125, %v756_v56  ;;  %v799_v26 = vmul.f32 0.03125, %v759_v31 }
 0x143   :  { %v6914_v24 = vpop.eup %6913  ;;  %6469 = vmatprep.mubr.msk.f32.mxu0 %vm114_vm0, %v664_v9  ;;  %v595_v11 = vmul.f32 %v6912_v10, %v499_v53 }
 0x144   :  { %v830_v59 = vsub.f32 %v798_v54, %v814_v48  ;;  %v831_v39 = vsub.f32 %v799_v26, %v815_v30  ;;  %6470 = vmatmul.mubr.msk.f32.gmra.mrb[28].mxu0 %vm114_vm0, %v665_v3  ;;  %v594_v36 = vmul.f32 %v6914_v24, %v498_v8  ;;  %v847_v48 = vsub.f32 %v7214_v47, %v7945_v61 }
 0x145   :  { %v682_v60 = vpop.xlane.xlu0 %681  ;;  %v631_v55 = vmul.f32 %v7664_v46, %v595_v11  ;;  %v685_v45 = vpop.xlane.xlu1 %684 }
 0x146   :  { %v862_v4 = vadd.f32 1e-05, %v830_v59  ;;  %v863_v58 = vadd.f32 1e-05, %v831_v39  ;;  %v7960_v5 = vmul.f32 0.03125, %v682_v60  ;;  %v630_v6 = vmul.f32 %v7664_v46, %v594_v36  ;;  %v7215_v60 = vld [vmem:[#allocation5 + $0x20] sm:$0xff] }
 0x147   :  { %v7963_v7 = vmul.f32 0.03125, %v685_v45  ;;  %v667_v14 = vadd.f32 %v7671_v1, %v631_v55  ;;  %v7216_v45 = vld [vmem:[#allocation5 + $0x28] sm:$0xff] }
 0x148   :  { %6919 = vrsqrt.f32 %v862_v4  ;;  %v816_v19 = vmul.f32 %v7960_v5, %v7960_v5  ;;  %v666_v2 = vadd.f32 %v7671_v1, %v630_v6  ;;  %v848_v55 = vsub.f32 %v7215_v60, %v7960_v5 }
 0x149   :  { %6921 = vrsqrt.f32 %v863_v58  ;;  %v817_v23 = vmul.f32 %v7963_v7, %v7963_v7  ;;  %v762_v46 = vpop.xlane.xlu0 %761  ;;  %v765_v62 = vpop.xlane.xlu1 %764  ;;  %v849_v6 = vsub.f32 %v7216_v45, %v7963_v7 }
 0x14a   :  { %v6916_v16 = vpop.eup %6915  ;;  %v800_v35 = vmul.f32 0.03125, %v762_v46  ;;  %6472 = vmatprep.mubr.msk.f32.mxu0 %vm114_vm0, %v666_v2  ;;  %v801_v21 = vmul.f32 0.03125, %v765_v62 }
 0x14b   :  { %v6918_v1 = vpop.eup %6917  ;;  %6473 = vmatmul.mubr.msk.f32.gmra.mrb[30].mxu0 %vm114_vm0, %v667_v14  ;;  %v893_v18 = vmul.f32 %v6916_v16, %v845_v22 }
 0x14c   :  { %v832_v28 = vsub.f32 %v800_v35, %v816_v19  ;;  %v892_v34 = vmul.f32 %v6918_v1, %v844_v40  ;;  %v833_v17 = vsub.f32 %v801_v21, %v817_v23  ;;  %v8016_v23 = vld [vmem:[#allocation5 + $0x70] sm:$0xff]  ;;  %v8020_v40 = vld [vmem:[#allocation5 + $0x78] sm:$0xff] }
 0x14d   :  { %v913_v32 = vmul.f32 %v7974_v20, %v893_v18  ;;  %v688_v37 = vpop.xlane.xlu0 %687  ;;  %v691_v33 = vpop.xlane.xlu1 %690  ;;  %v710_v27 = vsel %vm114_vm0, %v8016_v23, 0.0  ;;  %v713_v1 = vsel %vm114_vm0, %v8020_v40, 0.0  ;;  %v746_v18 = vmul.f32 %v8016_v23, %v8016_v23 }
 0x14e   :  { %v864_v38 = vadd.f32 1e-05, %v832_v28  ;;  %v912_v63 = vmul.f32 %v7974_v20, %v892_v34  ;;  %v7986_v41 = vmul.f32 0.03125, %v688_v37  ;;  %v865_v49 = vadd.f32 1e-05, %v833_v17  ;;  %711 = vadd.xlane.f32.xlu0 %v710_v27  ;;  %714 = vadd.xlane.f32.xlu1 %v713_v1  ;;  %v7217_v37 = vld [vmem:[#allocation5 + $0x30] sm:$0xff] }
 0x14f   :  { %v933_v57 = vadd.f32 %v7982_v12, %v913_v32  ;;  %v7990_v44 = vmul.f32 0.03125, %v691_v33  ;;  %v747_v17 = vmul.f32 %v8020_v40, %v8020_v40  ;;  %v790_v33 = vsel %vm114_vm0, %v746_v18, 0.0 }
 0x150   :  { %6923 = vrsqrt.f32 %v864_v38  ;;  %v932_v30 = vadd.f32 %v7982_v12, %v912_v63  ;;  %v818_v3 = vmul.f32 %v7986_v41, %v7986_v41  ;;  %v850_v38 = vsub.f32 %v7217_v37, %v7986_v41 }
 0x151   :  { %6925 = vrsqrt.f32 %v865_v49  ;;  %v819_v51 = vmul.f32 %v7990_v44, %v7990_v44  ;;  %v768_v53 = vpop.xlane.xlu0 %767  ;;  %v771_v9 = vpop.xlane.xlu1 %770 }
 0x152   :  { %v6920_v0 = vpop.eup %6919  ;;  %6475 = vmatprep.mubr.msk.f32.mxu0 %vm114_vm0, %v932_v30  ;;  %v802_v56 = vmul.f32 0.03125, %v768_v53  ;;  %v803_v10 = vmul.f32 0.03125, %v771_v9  ;;  %791 = vadd.xlane.f32.xlu0 %v790_v33  ;;  %v7219_v53 = vld [vmem:[#allocation5 + $0x40] sm:$0xff] }
 0x153   :  { %v6922_v31 = vpop.eup %6921  ;;  %6476 = vmatmul.mubr.msk.f32.gmra.mrb[32].mxu0 %vm114_vm0, %v933_v57  ;;  %v894_v61 = vmul.f32 %v6920_v0, %v846_v25  ;;  %v7218_v25 = vld [vmem:[#allocation5 + $0x38] sm:$0xff]  ;;  %v793_v57 = vsel %vm114_vm0, %v747_v17, 0.0  ;;  %v7223_v33 = vld [vmem:[#allocation5 + $0x60] sm:$0xff] }
 0x154   :  { %v895_v29 = vmul.f32 %v6922_v31, %v847_v48  ;;  %v834_v8 = vsub.f32 %v802_v56, %v818_v3  ;;  %v835_v26 = vsub.f32 %v803_v10, %v819_v51  ;;  %v851_v49 = vsub.f32 %v7218_v25, %v7990_v44  ;;  %794 = vadd.xlane.f32.xlu1 %v793_v57  ;;  %v7220_v56 = vld [vmem:[#allocation5 + $0x48] sm:$0xff] }
 0x155   :  { %v914_v54 = vmul.f32 %v7974_v20, %v894_v61  ;;  %v694_v24 = vpop.xlane.xlu0 %693  ;;  %v697_v36 = vpop.xlane.xlu1 %696 }
 0x156   :  { %v915_v11 = vmul.f32 %v7974_v20, %v895_v29  ;;  %v866_v59 = vadd.f32 1e-05, %v834_v8  ;;  %v8002_v39 = vmul.f32 0.03125, %v694_v24  ;;  %v867_v4 = vadd.f32 1e-05, %v835_v26 }
 0x157   :  { %v934_v13 = vadd.f32 %v7982_v12, %v914_v54  ;;  %v8006_v58 = vmul.f32 0.03125, %v697_v36 }
 0x158   :  { %v935_v14 = vadd.f32 %v7982_v12, %v915_v11  ;;  %6927 = vrsqrt.f32 %v866_v59  ;;  %v820_v15 = vmul.f32 %v8002_v39, %v8002_v39  ;;  %v852_v44 = vsub.f32 %v7219_v53, %v8002_v39 }
 0x159   :  { %6478 = vmatprep.mubr.msk.f32.mxu0 %vm114_vm0, %v934_v13  ;;  %6929 = vrsqrt.f32 %v867_v4  ;;  %v821_v5 = vmul.f32 %v8006_v58, %v8006_v58  ;;  %v774_v19 = vpop.xlane.xlu0 %773  ;;  %v777_v22 = vpop.xlane.xlu1 %776  ;;  %v853_v9 = vsub.f32 %v7220_v56, %v8006_v58 }
 0x15a   :  { %v6924_v2 = vpop.eup %6923  ;;  %6479 = vmatmul.mubr.msk.f32.gmra.mrb[34].mxu0 %vm114_vm0, %v935_v14  ;;  %v804_v43 = vmul.f32 0.03125, %v774_v19  ;;  %v805_v16 = vmul.f32 0.03125, %v777_v22 }
 0x15b   :  { %v6926_v7 = vpop.eup %6925  ;;  %v896_v46 = vmul.f32 %v6924_v2, %v848_v55 }
 0x15c   :  { %v897_v35 = vmul.f32 %v6926_v7, %v849_v6  ;;  %v836_v62 = vsub.f32 %v804_v43, %v820_v15  ;;  %v837_v42 = vsub.f32 %v805_v16, %v821_v5 }
 0x15d   :  { %v916_v21 = vmul.f32 %v7974_v20, %v896_v46 }
 0x15e   :  { %v917_v28 = vmul.f32 %v7974_v20, %v897_v35  ;;  %v868_v34 = vadd.f32 1e-05, %v836_v62  ;;  %v869_v63 = vadd.f32 1e-05, %v837_v42 }
 0x15f   :  { %v936_v32 = vadd.f32 %v7982_v12, %v916_v21 }
 0x160   :  { %v937_v50 = vadd.f32 %v7982_v12, %v917_v28  ;;  %6931 = vrsqrt.f32 %v868_v34  ;;  %v7221_v34 = vld [vmem:[#allocation5 + $0x50] sm:$0xff] }
 0x161   :  { %6481 = vmatprep.mubr.msk.f32.mxu0 %vm114_vm0, %v936_v32  ;;  %6933 = vrsqrt.f32 %v869_v63  ;;  %v7222_v32 = vld [vmem:[#allocation5 + $0x58] sm:$0xff] }
 0x162   :  { %v6928_v47 = vpop.eup %6927  ;;  %6482 = vmatmul.mubr.msk.f32.gmra.mrb[36].mxu0 %vm114_vm0, %v937_v50 }
 0x163   :  { %v6930_v41 = vpop.eup %6929  ;;  %v898_v48 = vmul.f32 %v6928_v47, %v850_v38 }
 0x164   :  { %v899_v30 = vmul.f32 %v6930_v41, %v851_v49  ;;  %v7224_v49 = vld [vmem:[#allocation5 + $0x68] sm:$0xff] }
 0x165   :  { %v918_v3 = vmul.f32 %v7974_v20, %v898_v48 }
 0x166   :  { %v919_v51 = vmul.f32 %v7974_v20, %v899_v30 }
 0x167   :  { %v938_v0 = vadd.f32 %v7982_v12, %v918_v3 }
 0x168   :  { %v939_v31 = vadd.f32 %v7982_v12, %v919_v51  ;;  %v700_v59 = vpop.xlane.xlu0 %699 }
 0x169   :  { %6484 = vmatprep.mubr.msk.f32.mxu0 %vm114_vm0, %v938_v0  ;;  %v726_v55 = vmul.f32 0.03125, %v700_v59 }
 0x16a   :  { %v6932_v61 = vpop.eup %6931  ;;  %6485 = vmatmul.mubr.msk.f32.gmra.mrb[38].mxu0 %vm114_vm0, %v939_v31  ;;  %v703_v39 = vpop.xlane.xlu1 %702 }
 0x16b   :  { %v6934_v10 = vpop.eup %6933  ;;  %v900_v29 = vmul.f32 %v6932_v61, %v852_v44  ;;  %v727_v13 = vmul.f32 0.03125, %v703_v39  ;;  %v822_v58 = vmul.f32 %v726_v55, %v726_v55  ;;  %v854_v17 = vsub.f32 %v7221_v34, %v726_v55  ;;  %v8064_v61 = vld [vmem:[%s9188_s4] ss:$0 sm:$0xff] }
 0x16c   :  { %v901_v8 = vmul.f32 %v6934_v10, %v853_v9  ;;  %v780_v36 = vpop.xlane.xlu0 %779 }
 0x16d   :  { %v920_v54 = vmul.f32 %v7974_v20, %v900_v29  ;;  %v806_v45 = vmul.f32 0.03125, %v780_v36  ;;  %v823_v14 = vmul.f32 %v727_v13, %v727_v13  ;;  %v855_v37 = vsub.f32 %v7222_v32, %v727_v13 }
 0x16e   :  { %v921_v26 = vmul.f32 %v7974_v20, %v901_v8  ;;  %v783_v60 = vpop.xlane.xlu1 %782 }
 0x16f   :  { %v940_v24 = vadd.f32 %v7982_v12, %v920_v54  ;;  %v807_v15 = vmul.f32 0.03125, %v783_v60  ;;  %v838_v5 = vsub.f32 %v806_v45, %v822_v58 }
 0x170   :  { %v941_v11 = vadd.f32 %v7982_v12, %v921_v26  ;;  %v706_v4 = vpop.xlane.xlu0 %705 }
 0x171   :  { %6487 = vmatprep.mubr.msk.f32.mxu0 %vm114_vm0, %v940_v24  ;;  %v728_v19 = vmul.f32 0.03125, %v706_v4  ;;  %v839_v2 = vsub.f32 %v807_v15, %v823_v14  ;;  %v870_v7 = vadd.f32 1e-05, %v838_v5 }
 0x172   :  { %6488 = vmatmul.mubr.msk.f32.gmra.mrb[40].mxu0 %vm114_vm0, %v941_v11  ;;  %v709_v6 = vpop.xlane.xlu1 %708 }
 0x173   :  { %v729_v43 = vmul.f32 0.03125, %v709_v6  ;;  %v824_v46 = vmul.f32 %v728_v19, %v728_v19  ;;  %v871_v35 = vadd.f32 1e-05, %v839_v2  ;;  %6935 = vrsqrt.f32 %v870_v7 }
 0x174   :  { %v786_v22 = vpop.xlane.xlu0 %785  ;;  %v856_v50 = vsub.f32 %v7223_v33, %v728_v19 }
 0x175   :  { %v808_v16 = vmul.f32 0.03125, %v786_v22  ;;  %v825_v62 = vmul.f32 %v729_v43, %v729_v43  ;;  %6937 = vrsqrt.f32 %v871_v35  ;;  %v857_v57 = vsub.f32 %v7224_v49, %v729_v43 }
 0x176   :  { %v789_v27 = vpop.xlane.xlu1 %788 }
 0x177   :  { %v809_v1 = vmul.f32 0.03125, %v789_v27  ;;  %v840_v21 = vsub.f32 %v808_v16, %v824_v46 }
 0x179   :  { %v841_v42 = vsub.f32 %v809_v1, %v825_v62  ;;  %v872_v18 = vadd.f32 1e-05, %v840_v21 }
 0x17b   :  { %v873_v28 = vadd.f32 1e-05, %v841_v42  ;;  %6939 = vrsqrt.f32 %v872_v18 }
 0x17d   :  { %6941 = vrsqrt.f32 %v873_v28  ;;  %v6936_v38 = vpop.eup %6935 }
 0x17e   :  { %v902_v25 = vmul.f32 %v6936_v38, %v854_v17 }
 0x17f   :  { %v6938_v63 = vpop.eup %6937 }
 0x180   :  { %v903_v47 = vmul.f32 %v6938_v63, %v855_v37  ;;  %v922_v41 = vmul.f32 %v7974_v20, %v902_v25 }
 0x182   :  { %v923_v30 = vmul.f32 %v7974_v20, %v903_v47  ;;  %v942_v51 = vadd.f32 %v7982_v12, %v922_v41 }
 0x184   :  { %v943_v44 = vadd.f32 %v7982_v12, %v923_v30  ;;  %6490 = vmatprep.mubr.msk.f32.mxu0 %vm114_vm0, %v942_v51 }
 0x185   :  { %v6940_v48 = vpop.eup %6939 }
 0x186   :  { %v904_v53 = vmul.f32 %v6940_v48, %v856_v50  ;;  %6491 = vmatmul.mubr.msk.f32.gmra.mrb[42].mxu0 %vm114_vm0, %v943_v44 }
 0x187   :  { %v6942_v3 = vpop.eup %6941 }
 0x188   :  { %v905_v0 = vmul.f32 %v6942_v3, %v857_v57  ;;  %v924_v56 = vmul.f32 %v7974_v20, %v904_v53 }
 0x18a   :  { %v925_v9 = vmul.f32 %v7974_v20, %v905_v0  ;;  %v944_v31 = vadd.f32 %v7982_v12, %v924_v56 }
 0x18c   :  { %v945_v10 = vadd.f32 %v7982_v12, %v925_v9  ;;  %6493 = vmatprep.mubr.msk.f32.mxu0 %vm114_vm0, %v944_v31 }
 0x18e   :  { %6494 = vmatmul.mubr.msk.f32.gmra.mrb[44].mxu0 %vm114_vm0, %v945_v10 }
 0x1a8   :  { %v6429_v29 = vpop.f32.mrb[0].mxu0 }
 0x1a9   :  { %v1170_v8 = vadd.f32 %v6429_v29, %v8064_v61  ;;  %v1164_v54 = vpop.f32.mrb[1].mxu0 }
 0x1aa   :  { %v1165_v26 = vadd.f32 %v8064_v61, %v1164_v54 }
 0x1ab   :  { %v1452_v24 = vmul.f32 0.70710677, %v1170_v8  ;;  %v1404_v43 = vmul.f32 0.5, %v1170_v8 }
 0x1ac   :  { %v1451_v11 = vmul.f32 0.70710677, %v1165_v26  ;;  %v1403_v5 = vmul.f32 0.5, %v1165_v26 }
 0x1ad   :  { %6943 = verf.f32 %v1452_v24 }
 0x1ae   :  { %6945 = verf.f32 %v1451_v11 }
 0x1af   :  { %v6432_v59 = vpop.f32.mrb[2].mxu0 }
 0x1b0   :  { %v1180_v39 = vadd.f32 %v6432_v59, %v8064_v61  ;;  %v1174_v36 = vpop.f32.mrb[3].mxu0 }
 0x1b1   :  { %v1175_v60 = vadd.f32 %v8064_v61, %v1174_v36 }
 0x1b2   :  { %v1454_v55 = vmul.f32 0.70710677, %v1180_v39  ;;  %v1406_v34 = vmul.f32 0.5, %v1180_v39 }
 0x1b3   :  { %v1453_v13 = vmul.f32 0.70710677, %v1175_v60  ;;  %v1405_v21 = vmul.f32 0.5, %v1175_v60 }
 0x1b4   :  { %6947 = verf.f32 %v1454_v55 }
 0x1b5   :  { %6949 = verf.f32 %v1453_v13 }
 0x1b7   :  { %v6944_v4 = vpop.eup %6943  ;;  %v6435_v58 = vpop.f32.mrb[4].mxu0 }
 0x1b8   :  { %v6946_v45 = vpop.eup %6945  ;;  %v1548_v6 = vadd.f32 1.0, %v6944_v4  ;;  %v1190_v14 = vadd.f32 %v6435_v58, %v8064_v61  ;;  %v1184_v15 = vpop.f32.mrb[5].mxu0 }
 0x1b9   :  { %v1185_v19 = vadd.f32 %v8064_v61, %v1184_v15  ;;  %v1547_v2 = vadd.f32 1.0, %v6946_v45 }
 0x1ba   :  { %v1456_v22 = vmul.f32 0.70710677, %v1190_v14  ;;  %v1596_v16 = vmul.f32 %v1548_v6, %v1404_v43  ;;  %v1408_v30 = vmul.f32 0.5, %v1190_v14 }
 0x1bb   :  { %v1455_v7 = vmul.f32 0.70710677, %v1185_v19  ;;  %v1595_v46 = vmul.f32 %v1547_v2, %v1403_v5  ;;  %v1407_v57 = vmul.f32 0.5, %v1185_v19 }
 0x1bc   :  { %6951 = verf.f32 %v1456_v22 }
 0x1bd   :  { %6953 = verf.f32 %v1455_v7  ;;  %6507 = vmatprep.mubr.msk.f32.mxu1 %vm114_vm0, %v1595_v46 }
 0x1be   :  { %v6948_v27 = vpop.eup %6947  ;;  %6508 = vmatmul.mubr.msk.f32.vlgmr.msra.gmra.mrb[0].mxu1 %vm114_vm0, %v1596_v16 }
 0x1bf   :  { %v6950_v35 = vpop.eup %6949  ;;  %v1550_v62 = vadd.f32 1.0, %v6948_v27  ;;  %v6438_v1 = vpop.f32.mrb[6].mxu0 }
 0x1c0   :  { %v1549_v42 = vadd.f32 1.0, %v6950_v35  ;;  %v1200_v18 = vadd.f32 %v6438_v1, %v8064_v61  ;;  %v1194_v28 = vpop.f32.mrb[7].mxu0 }
 0x1c1   :  { %v1195_v17 = vadd.f32 %v8064_v61, %v1194_v28  ;;  %v1598_v38 = vmul.f32 %v1550_v62, %v1406_v34 }
 0x1c2   :  { %v1597_v32 = vmul.f32 %v1549_v42, %v1405_v21  ;;  %v1458_v37 = vmul.f32 0.70710677, %v1200_v18  ;;  %v1410_v24 = vmul.f32 0.5, %v1200_v18 }
 0x1c3   :  { %v1457_v63 = vmul.f32 0.70710677, %v1195_v17  ;;  %v1409_v29 = vmul.f32 0.5, %v1195_v17 }
 0x1c4   :  { %6955 = verf.f32 %v1458_v37  ;;  %6510 = vmatprep.mubr.msk.f32.mxu1 %vm114_vm0, %v1597_v32 }
 0x1c5   :  { %6957 = verf.f32 %v1457_v63  ;;  %6511 = vmatmul.mubr.msk.f32.gmra.mrb[2].mxu1 %vm114_vm0, %v1598_v38 }
 0x1c6   :  { %v6952_v33 = vpop.eup %6951 }
 0x1c7   :  { %v6954_v50 = vpop.eup %6953  ;;  %v1552_v25 = vadd.f32 1.0, %v6952_v33  ;;  %v6441_v49 = vpop.f32.mrb[8].mxu0 }
 0x1c8   :  { %v1551_v47 = vadd.f32 1.0, %v6954_v50  ;;  %v1210_v41 = vadd.f32 %v6441_v49, %v8064_v61  ;;  %v1204_v48 = vpop.f32.mrb[9].mxu0 }
 0x1c9   :  { %v1205_v3 = vadd.f32 %v8064_v61, %v1204_v48  ;;  %v1600_v44 = vmul.f32 %v1552_v25, %v1408_v30 }
 0x1ca   :  { %v1599_v51 = vmul.f32 %v1551_v47, %v1407_v57  ;;  %v1460_v53 = vmul.f32 0.70710677, %v1210_v41  ;;  %v1412_v5 = vmul.f32 0.5, %v1210_v41 }
 0x1cb   :  { %v1459_v0 = vmul.f32 0.70710677, %v1205_v3  ;;  %v1411_v45 = vmul.f32 0.5, %v1205_v3 }
 0x1cc   :  { %6959 = verf.f32 %v1460_v53  ;;  %6513 = vmatprep.mubr.msk.f32.mxu1 %vm114_vm0, %v1599_v51 }
 0x1cd   :  { %6961 = verf.f32 %v1459_v0  ;;  %6514 = vmatmul.mubr.msk.f32.gmra.mrb[4].mxu1 %vm114_vm0, %v1600_v44 }
 0x1ce   :  { %v6956_v56 = vpop.eup %6955 }
 0x1cf   :  { %v6958_v9 = vpop.eup %6957  ;;  %v1554_v31 = vadd.f32 1.0, %v6956_v56  ;;  %v6444_v10 = vpop.f32.mrb[10].mxu0 }
 0x1d0   :  { %v1553_v8 = vadd.f32 1.0, %v6958_v9  ;;  %v1220_v54 = vadd.f32 %v6444_v10, %v8064_v61  ;;  %v1214_v26 = vpop.f32.mrb[11].mxu0 }
 0x1d1   :  { %v1215_v11 = vadd.f32 %v8064_v61, %v1214_v26  ;;  %v1602_v36 = vmul.f32 %v1554_v31, %v1410_v24 }
 0x1d2   :  { %v1601_v59 = vmul.f32 %v1553_v8, %v1409_v29  ;;  %v1462_v39 = vmul.f32 0.70710677, %v1220_v54  ;;  %v1414_v18 = vmul.f32 0.5, %v1220_v54 }
 0x1d3   :  { %v1461_v60 = vmul.f32 0.70710677, %v1215_v11  ;;  %v1413_v62 = vmul.f32 0.5, %v1215_v11 }
 0x1d4   :  { %6963 = verf.f32 %v1462_v39  ;;  %6516 = vmatprep.mubr.msk.f32.mxu1 %vm114_vm0, %v1601_v59 }
 0x1d5   :  { %6965 = verf.f32 %v1461_v60  ;;  %6517 = vmatmul.mubr.msk.f32.gmra.mrb[6].mxu1 %vm114_vm0, %v1602_v36 }
 0x1d6   :  { %v6960_v55 = vpop.eup %6959 }
 0x1d7   :  { %v6962_v13 = vpop.eup %6961  ;;  %v1556_v4 = vadd.f32 1.0, %v6960_v55  ;;  %v6447_v58 = vpop.f32.mrb[12].mxu0 }
 0x1d8   :  { %v1555_v6 = vadd.f32 1.0, %v6962_v13  ;;  %v1230_v14 = vadd.f32 %v6447_v58, %v8064_v61  ;;  %v1224_v15 = vpop.f32.mrb[13].mxu0 }
 0x1d9   :  { %v1225_v19 = vadd.f32 %v8064_v61, %v1224_v15  ;;  %v1604_v22 = vmul.f32 %v1556_v4, %v1412_v5 }
 0x1da   :  { %v1603_v2 = vmul.f32 %v1555_v6, %v1411_v45  ;;  %v1464_v43 = vmul.f32 0.70710677, %v1230_v14  ;;  %v1416_v41 = vmul.f32 0.5, %v1230_v14 }
 0x1db   :  { %v1463_v7 = vmul.f32 0.70710677, %v1225_v19  ;;  %v1415_v25 = vmul.f32 0.5, %v1225_v19  ;;  %v712_v30 = vpop.xlane.xlu0 %711  ;;  %v715_v44 = vpop.xlane.xlu1 %714 }
 0x1dc   :  { %6967 = verf.f32 %v1464_v43  ;;  %6519 = vmatprep.mubr.msk.f32.mxu1 %vm114_vm0, %v1603_v2  ;;  %v8099_v53 = vmul.f32 0.03125, %v712_v30  ;;  %v8101_v9 = vmul.f32 0.03125, %v715_v44 }
 0x1dd   :  { %6969 = verf.f32 %v1463_v7  ;;  %6520 = vmatmul.mubr.msk.f32.gmra.mrb[8].mxu1 %vm114_vm0, %v1604_v22 }
 0x1de   :  { %v6964_v46 = vpop.eup %6963  ;;  %v826_v31 = vmul.f32 %v8099_v53, %v8099_v53  ;;  %v827_v10 = vmul.f32 %v8101_v9, %v8101_v9 }
 0x1df   :  { %v6966_v16 = vpop.eup %6965  ;;  %v1558_v27 = vadd.f32 1.0, %v6964_v46  ;;  %v6450_v35 = vpop.f32.mrb[14].mxu0 }
 0x1e0   :  { %v1557_v1 = vadd.f32 1.0, %v6966_v16  ;;  %v1240_v21 = vadd.f32 %v6450_v35, %v8064_v61  ;;  %v1234_v42 = vpop.f32.mrb[15].mxu0  ;;  %v792_v29 = vpop.xlane.xlu0 %791 }
 0x1e1   :  { %v1235_v28 = vadd.f32 %v8064_v61, %v1234_v42  ;;  %v1606_v32 = vmul.f32 %v1558_v27, %v1414_v18  ;;  %v810_v54 = vmul.f32 0.03125, %v792_v29  ;;  %v795_v26 = vpop.xlane.xlu1 %794 }
 0x1e2   :  { %v1605_v34 = vmul.f32 %v1557_v1, %v1413_v62  ;;  %v1466_v17 = vmul.f32 0.70710677, %v1240_v21  ;;  %v811_v39 = vmul.f32 0.03125, %v795_v26  ;;  %v1418_v58 = vmul.f32 0.5, %v1240_v21 }
 0x1e3   :  { %v1465_v37 = vmul.f32 0.70710677, %v1235_v28  ;;  %v1417_v36 = vmul.f32 0.5, %v1235_v28  ;;  %v842_v4 = vsub.f32 %v810_v54, %v826_v31 }
 0x1e4   :  { %6971 = verf.f32 %v1466_v17  ;;  %6522 = vmatprep.mubr.msk.f32.mxu1 %vm114_vm0, %v1605_v34  ;;  %v843_v6 = vsub.f32 %v811_v39, %v827_v10 }
 0x1e5   :  { %6973 = verf.f32 %v1465_v37  ;;  %6523 = vmatmul.mubr.msk.f32.gmra.mrb[10].mxu1 %vm114_vm0, %v1606_v32  ;;  %v874_v5 = vadd.f32 1e-05, %v842_v4  ;;  %v858_v32 = vsub.f32 %v8016_v23, %v8099_v53 }
 0x1e6   :  { %v6968_v38 = vpop.eup %6967  ;;  %v875_v43 = vadd.f32 1e-05, %v843_v6 }
 0x1e7   :  { %v6970_v63 = vpop.eup %6969  ;;  %v1560_v33 = vadd.f32 1.0, %v6968_v38  ;;  %v6453_v50 = vpop.f32.mrb[16].mxu0  ;;  %v859_v38 = vsub.f32 %v8020_v40, %v8101_v9 }
 0x1e8   :  { %v1559_v49 = vadd.f32 1.0, %v6970_v63  ;;  %v1250_v57 = vadd.f32 %v6453_v50, %v8064_v61  ;;  %v1244_v47 = vpop.f32.mrb[17].mxu0 }
 0x1e9   :  { %v1245_v48 = vadd.f32 %v8064_v61, %v1244_v47  ;;  %v1608_v0 = vmul.f32 %v1560_v33, %v1416_v41 }
 0x1ea   :  { %v1607_v3 = vmul.f32 %v1559_v49, %v1415_v25  ;;  %v1468_v51 = vmul.f32 0.70710677, %v1250_v57  ;;  %v1420_v21 = vmul.f32 0.5, %v1250_v57 }
 0x1eb   :  { %v1467_v56 = vmul.f32 0.70710677, %v1245_v48  ;;  %v1419_v27 = vmul.f32 0.5, %v1245_v48 }
 0x1ec   :  { %6975 = verf.f32 %v1468_v51  ;;  %6525 = vmatprep.mubr.msk.f32.mxu1 %vm114_vm0, %v1607_v3 }
 0x1ed   :  { %6977 = verf.f32 %v1467_v56  ;;  %6526 = vmatmul.mubr.msk.f32.gmra.mrb[12].mxu1 %vm114_vm0, %v1608_v0 }
 0x1ee   :  { %v6972_v8 = vpop.eup %6971 }
 0x1ef   :  { %v6974_v24 = vpop.eup %6973  ;;  %v1562_v11 = vadd.f32 1.0, %v6972_v8  ;;  %v6456_v59 = vpop.f32.mrb[18].mxu0 }
 0x1f0   :  { %v1561_v60 = vadd.f32 1.0, %v6974_v24  ;;  %v1260_v55 = vadd.f32 %v6456_v59, %v8064_v61  ;;  %v1254_v13 = vpop.f32.mrb[19].mxu0 }
 0x1f1   :  { %v1255_v45 = vadd.f32 %v8064_v61, %v1254_v13  ;;  %v1610_v19 = vmul.f32 %v1562_v11, %v1418_v58 }
 0x1f2   :  { %v1609_v14 = vmul.f32 %v1561_v60, %v1417_v36  ;;  %v1470_v15 = vmul.f32 0.70710677, %v1260_v55  ;;  %v1422_v30 = vmul.f32 0.5, %v1260_v55 }
 0x1f3   :  { %v1469_v2 = vmul.f32 0.70710677, %v1255_v45  ;;  %v1421_v49 = vmul.f32 0.5, %v1255_v45 }
 0x1f4   :  { %6979 = verf.f32 %v1470_v15  ;;  %6528 = vmatprep.mubr.msk.f32.mxu1 %vm114_vm0, %v1609_v14 }
 0x1f5   :  { %6981 = verf.f32 %v1469_v2  ;;  %6529 = vmatmul.mubr.msk.f32.gmra.mrb[14].mxu1 %vm114_vm0, %v1610_v19 }
 0x1f6   :  { %v6976_v22 = vpop.eup %6975  ;;  %6983 = vrsqrt.f32 %v874_v5 }
 0x1f7   :  { %v6978_v7 = vpop.eup %6977  ;;  %v1564_v46 = vadd.f32 1.0, %v6976_v22  ;;  %v6459_v16 = vpop.f32.mrb[20].mxu0  ;;  %6985 = vrsqrt.f32 %v875_v43 }
 0x1f8   :  { %v1563_v35 = vadd.f32 1.0, %v6978_v7  ;;  %v1270_v62 = vadd.f32 %v6459_v16, %v8064_v61  ;;  %v1264_v1 = vpop.f32.mrb[21].mxu0 }
 0x1f9   :  { %v1265_v42 = vadd.f32 %v8064_v61, %v1264_v1  ;;  %v1612_v34 = vmul.f32 %v1564_v46, %v1420_v21 }
 0x1fa   :  { %v1611_v18 = vmul.f32 %v1563_v35, %v1419_v27  ;;  %v1472_v28 = vmul.f32 0.70710677, %v1270_v62 }
 0x1fb   :  { %v1471_v17 = vmul.f32 0.70710677, %v1265_v42  ;;  %v1423_v24 = vmul.f32 0.5, %v1265_v42 }
 0x1fc   :  { %6987 = verf.f32 %v1472_v28  ;;  %6531 = vmatprep.mubr.msk.f32.mxu1 %vm114_vm0, %v1611_v18 }
 0x1fd   :  { %6989 = verf.f32 %v1471_v17  ;;  %6532 = vmatmul.mubr.msk.f32.gmra.mrb[16].mxu1 %vm114_vm0, %v1612_v34 }
 0x1fe   :  { %v6980_v37 = vpop.eup %6979 }
 0x1ff   :  { %v6982_v63 = vpop.eup %6981  ;;  %v1566_v33 = vadd.f32 1.0, %v6980_v37  ;;  %v6462_v50 = vpop.f32.mrb[22].mxu0 }
 0x200   :  { %v6984_v25 = vpop.eup %6983  ;;  %v1565_v57 = vadd.f32 1.0, %v6982_v63  ;;  %v1280_v47 = vadd.f32 %v6462_v50, %v8064_v61  ;;  %v1274_v41 = vpop.f32.mrb[23].mxu0 }
 0x201   :  { %v6986_v48 = vpop.eup %6985  ;;  %v1275_v3 = vadd.f32 %v8064_v61, %v1274_v41  ;;  %v906_v51 = vmul.f32 %v6984_v25, %v858_v32  ;;  %v1614_v0 = vmul.f32 %v1566_v33, %v1422_v30 }
 0x202   :  { %v1613_v44 = vmul.f32 %v1565_v57, %v1421_v49  ;;  %v1474_v23 = vmul.f32 0.70710677, %v1280_v47  ;;  %v907_v53 = vmul.f32 %v6986_v48, %v859_v38  ;;  %v1426_v2 = vmul.f32 0.5, %v1280_v47 }
 0x203   :  { %v1473_v56 = vmul.f32 0.70710677, %v1275_v3  ;;  %v926_v40 = vmul.f32 %v7974_v20, %v906_v51  ;;  %v1425_v14 = vmul.f32 0.5, %v1275_v3 }
 0x204   :  { %6991 = verf.f32 %v1474_v23  ;;  %6534 = vmatprep.mubr.msk.f32.mxu1 %vm114_vm0, %v1613_v44  ;;  %v927_v9 = vmul.f32 %v7974_v20, %v907_v53  ;;  %v1424_v20 = vmul.f32 0.5, %v1270_v62 }
 0x205   :  { %6993 = verf.f32 %v1473_v56  ;;  %6535 = vmatmul.mubr.msk.f32.gmra.mrb[18].mxu1 %vm114_vm0, %v1614_v0  ;;  %v946_v31 = vadd.f32 %v7982_v12, %v926_v40 }
 0x206   :  { %v6988_v10 = vpop.eup %6987  ;;  %v947_v29 = vadd.f32 %v7982_v12, %v927_v9 }
 0x207   :  { %v6990_v8 = vpop.eup %6989  ;;  %v1568_v54 = vadd.f32 1.0, %v6988_v10  ;;  %v6465_v26 = vpop.f32.mrb[24].mxu0  ;;  %6496 = vmatprep.mubr.msk.f32.mxu0 %vm114_vm0, %v946_v31 }
 0x208   :  { %v1567_v11 = vadd.f32 1.0, %v6990_v8  ;;  %v1290_v59 = vadd.f32 %v6465_v26, %v8064_v61  ;;  %v1284_v39 = vpop.f32.mrb[25].mxu0  ;;  %6497 = vmatmul.mubr.msk.f32.gmra.mrb[46].mxu0 %vm114_vm0, %v947_v29 }
 0x209   :  { %v1285_v36 = vadd.f32 %v8064_v61, %v1284_v39  ;;  %v1616_v13 = vmul.f32 %v1568_v54, %v1424_v20 }
 0x20a   :  { %v1615_v60 = vmul.f32 %v1567_v11, %v1423_v24  ;;  %v1476_v55 = vmul.f32 0.70710677, %v1290_v59  ;;  %v1428_v34 = vmul.f32 0.5, %v1290_v59 }
 0x20b   :  { %v1475_v4 = vmul.f32 0.70710677, %v1285_v36  ;;  %v1427_v21 = vmul.f32 0.5, %v1285_v36 }
 0x20c   :  { %6995 = verf.f32 %v1476_v55  ;;  %6537 = vmatprep.mubr.msk.f32.mxu1 %vm114_vm0, %v1615_v60 }
 0x20d   :  { %6997 = verf.f32 %v1475_v4  ;;  %6538 = vmatmul.mubr.msk.f32.gmra.mrb[20].mxu1 %vm114_vm0, %v1616_v13 }
 0x20e   :  { %v6992_v12 = vpop.eup %6991 }
 0x20f   :  { %v6994_v58 = vpop.eup %6993  ;;  %v1570_v45 = vadd.f32 1.0, %v6992_v12  ;;  %v6468_v6 = vpop.f32.mrb[26].mxu0 }
 0x210   :  { %v1569_v15 = vadd.f32 1.0, %v6994_v58  ;;  %v1300_v5 = vadd.f32 %v6468_v6, %v8064_v61  ;;  %v1294_v19 = vpop.f32.mrb[27].mxu0 }
 0x211   :  { %v1295_v43 = vadd.f32 %v8064_v61, %v1294_v19  ;;  %v1618_v46 = vmul.f32 %v1570_v45, %v1426_v2 }
 0x212   :  { %v1617_v22 = vmul.f32 %v1569_v15, %v1425_v14  ;;  %v1478_v7 = vmul.f32 0.70710677, %v1300_v5  ;;  %v1430_v3 = vmul.f32 0.5, %v1300_v5 }
 0x213   :  { %v1477_v16 = vmul.f32 0.70710677, %v1295_v43  ;;  %v1429_v41 = vmul.f32 0.5, %v1295_v43 }
 0x214   :  { %6999 = verf.f32 %v1478_v7  ;;  %6540 = vmatprep.mubr.msk.f32.mxu1 %vm114_vm0, %v1617_v22 }
 0x215   :  { %7001 = verf.f32 %v1477_v16  ;;  %6541 = vmatmul.mubr.msk.f32.gmra.mrb[22].mxu1 %vm114_vm0, %v1618_v46 }
 0x216   :  { %v6996_v27 = vpop.eup %6995 }
 0x217   :  { %v6998_v35 = vpop.eup %6997  ;;  %v1572_v62 = vadd.f32 1.0, %v6996_v27  ;;  %v6471_v1 = vpop.f32.mrb[28].mxu0 }
 0x218   :  { %v1571_v42 = vadd.f32 1.0, %v6998_v35  ;;  %v1310_v18 = vadd.f32 %v6471_v1, %v8064_v61  ;;  %v1304_v28 = vpop.f32.mrb[29].mxu0 }
 0x219   :  { %v1305_v17 = vadd.f32 %v8064_v61, %v1304_v28  ;;  %v1620_v38 = vmul.f32 %v1572_v62, %v1428_v34 }
 0x21a   :  { %v1619_v32 = vmul.f32 %v1571_v42, %v1427_v21  ;;  %v1480_v37 = vmul.f32 0.70710677, %v1310_v18  ;;  %v1432_v26 = vmul.f32 0.5, %v1310_v18 }
 0x21b   :  { %v1479_v63 = vmul.f32 0.70710677, %v1305_v17  ;;  %v1431_v29 = vmul.f32 0.5, %v1305_v17 }
 0x21c   :  { %7003 = verf.f32 %v1480_v37  ;;  %6543 = vmatprep.mubr.msk.f32.mxu1 %vm114_vm0, %v1619_v32 }
 0x21d   :  { %7005 = verf.f32 %v1479_v63  ;;  %6544 = vmatmul.mubr.msk.f32.gmra.mrb[24].mxu1 %vm114_vm0, %v1620_v38 }
 0x21e   :  { %v7000_v33 = vpop.eup %6999  ;;  %v6474_v50 = vpop.f32.mrb[30].mxu0 }
 0x21f   :  { %v7002_v25 = vpop.eup %7001  ;;  %v1574_v49 = vadd.f32 1.0, %v7000_v33  ;;  %v1320_v57 = vadd.f32 %v6474_v50, %v8064_v61  ;;  %v1314_v47 = vpop.f32.mrb[31].mxu0 }
 0x220   :  { %v1573_v48 = vadd.f32 1.0, %v7002_v25  ;;  %v1315_v30 = vadd.f32 %v8064_v61, %v1314_v47 }
 0x221   :  { %v1482_v51 = vmul.f32 0.70710677, %v1320_v57  ;;  %v1622_v53 = vmul.f32 %v1574_v49, %v1430_v3  ;;  %v1434_v6 = vmul.f32 0.5, %v1320_v57 }
 0x222   :  { %v1621_v44 = vmul.f32 %v1573_v48, %v1429_v41  ;;  %v1481_v23 = vmul.f32 0.70710677, %v1315_v30  ;;  %v1433_v12 = vmul.f32 0.5, %v1315_v30 }
 0x223   :  { %7007 = verf.f32 %v1482_v51 }
 0x224   :  { %7009 = verf.f32 %v1481_v23  ;;  %6546 = vmatprep.mubr.msk.f32.mxu1 %vm114_vm0, %v1621_v44 }
 0x225   :  { %6547 = vmatmul.mubr.msk.f32.gmra.mrb[26].mxu1 %vm114_vm0, %v1622_v53 }
 0x226   :  { %v7004_v0 = vpop.eup %7003  ;;  %v6477_v56 = vpop.f32.mrb[32].mxu0 }
 0x227   :  { %v7006_v40 = vpop.eup %7005  ;;  %v1576_v9 = vadd.f32 1.0, %v7004_v0  ;;  %v1330_v31 = vadd.f32 %v6477_v56, %v8064_v61  ;;  %v1324_v10 = vpop.f32.mrb[33].mxu0 }
 0x228   :  { %v1575_v8 = vadd.f32 1.0, %v7006_v40  ;;  %v1325_v54 = vadd.f32 %v8064_v61, %v1324_v10 }
 0x229   :  { %v1484_v24 = vmul.f32 0.70710677, %v1330_v31  ;;  %v1624_v39 = vmul.f32 %v1576_v9, %v1432_v26  ;;  %v1436_v1 = vmul.f32 0.5, %v1330_v31 }
 0x22a   :  { %v1623_v11 = vmul.f32 %v1575_v8, %v1431_v29  ;;  %v1483_v59 = vmul.f32 0.70710677, %v1325_v54  ;;  %v1435_v27 = vmul.f32 0.5, %v1325_v54 }
 0x22b   :  { %7011 = verf.f32 %v1484_v24 }
 0x22c   :  { %7013 = verf.f32 %v1483_v59  ;;  %6549 = vmatprep.mubr.msk.f32.mxu1 %vm114_vm0, %v1623_v11 }
 0x22d   :  { %v7008_v20 = vpop.eup %7007  ;;  %6550 = vmatmul.mubr.msk.f32.gmra.mrb[28].mxu1 %vm114_vm0, %v1624_v39  ;;  %v6480_v36 = vpop.f32.mrb[34].mxu0 }
 0x22e   :  { %v7010_v60 = vpop.eup %7009  ;;  %v1578_v55 = vadd.f32 1.0, %v7008_v20  ;;  %v1340_v13 = vadd.f32 %v6480_v36, %v8064_v61  ;;  %v1334_v4 = vpop.f32.mrb[35].mxu0 }
 0x22f   :  { %v1577_v58 = vadd.f32 1.0, %v7010_v60  ;;  %v1335_v45 = vadd.f32 %v8064_v61, %v1334_v4 }
 0x230   :  { %v1486_v14 = vmul.f32 0.70710677, %v1340_v13  ;;  %v1626_v19 = vmul.f32 %v1578_v55, %v1434_v6  ;;  %v1438_v34 = vmul.f32 0.5, %v1340_v13 }
 0x231   :  { %v1625_v15 = vmul.f32 %v1577_v58, %v1433_v12  ;;  %v1485_v5 = vmul.f32 0.70710677, %v1335_v45  ;;  %v1437_v32 = vmul.f32 0.5, %v1335_v45 }
 0x232   :  { %7015 = verf.f32 %v1486_v14 }
 0x233   :  { %7017 = verf.f32 %v1485_v5  ;;  %6552 = vmatprep.mubr.msk.f32.mxu1 %vm114_vm0, %v1625_v15 }
 0x234   :  { %6553 = vmatmul.mubr.msk.f32.gmra.mrb[30].mxu1 %vm114_vm0, %v1626_v19 }
 0x235   :  { %v7012_v2 = vpop.eup %7011  ;;  %v6483_v43 = vpop.f32.mrb[36].mxu0 }
 0x236   :  { %v7014_v22 = vpop.eup %7013  ;;  %v1580_v7 = vadd.f32 1.0, %v7012_v2  ;;  %v1350_v46 = vadd.f32 %v6483_v43, %v8064_v61  ;;  %v1344_v16 = vpop.f32.mrb[37].mxu0 }
 0x237   :  { %v1579_v35 = vadd.f32 1.0, %v7014_v22  ;;  %v1345_v62 = vadd.f32 %v8064_v61, %v1344_v16 }
 0x238   :  { %v1488_v21 = vmul.f32 0.70710677, %v1350_v46  ;;  %v1628_v28 = vmul.f32 %v1580_v7, %v1436_v1  ;;  %v1440_v30 = vmul.f32 0.5, %v1350_v46 }
 0x239   :  { %v1627_v42 = vmul.f32 %v1579_v35, %v1435_v27  ;;  %v1487_v18 = vmul.f32 0.70710677, %v1345_v62  ;;  %v1439_v51 = vmul.f32 0.5, %v1345_v62 }
 0x23a   :  { %7019 = verf.f32 %v1488_v21 }
 0x23b   :  { %7021 = verf.f32 %v1487_v18  ;;  %6555 = vmatprep.mubr.msk.f32.mxu1 %vm114_vm0, %v1627_v42 }
 0x23c   :  { %v7016_v17 = vpop.eup %7015  ;;  %6556 = vmatmul.mubr.msk.f32.gmra.mrb[32].mxu1 %vm114_vm0, %v1628_v28 }
 0x23d   :  { %v7018_v37 = vpop.eup %7017  ;;  %v1582_v38 = vadd.f32 1.0, %v7016_v17  ;;  %v6486_v63 = vpop.f32.mrb[38].mxu0 }
 0x23e   :  { %v1581_v33 = vadd.f32 1.0, %v7018_v37  ;;  %v1360_v50 = vadd.f32 %v6486_v63, %v8064_v61  ;;  %v1354_v25 = vpop.f32.mrb[39].mxu0 }
 0x23f   :  { %v1630_v49 = vmul.f32 %v1582_v38, %v1438_v34  ;;  %v1355_v57 = vadd.f32 %v8064_v61, %v1354_v25 }
 0x240   :  { %v1629_v47 = vmul.f32 %v1581_v33, %v1437_v32  ;;  %v1490_v41 = vmul.f32 0.70710677, %v1360_v50  ;;  %v1442_v54 = vmul.f32 0.5, %v1360_v50 }
 0x241   :  { %v1489_v48 = vmul.f32 0.70710677, %v1355_v57  ;;  %v1441_v24 = vmul.f32 0.5, %v1355_v57 }
 0x242   :  { %6558 = vmatprep.mubr.msk.f32.mxu1 %vm114_vm0, %v1629_v47  ;;  %7023 = verf.f32 %v1490_v41 }
 0x243   :  { %6559 = vmatmul.mubr.msk.f32.gmra.mrb[34].mxu1 %vm114_vm0, %v1630_v49  ;;  %7025 = verf.f32 %v1489_v48 }
 0x244   :  { %v7020_v3 = vpop.eup %7019 }
 0x245   :  { %v7022_v44 = vpop.eup %7021  ;;  %v1584_v23 = vadd.f32 1.0, %v7020_v3  ;;  %v6489_v53 = vpop.f32.mrb[40].mxu0 }
 0x246   :  { %v1583_v0 = vadd.f32 1.0, %v7022_v44  ;;  %v1370_v56 = vadd.f32 %v6489_v53, %v8064_v61  ;;  %v1364_v40 = vpop.f32.mrb[41].mxu0 }
 0x247   :  { %v1632_v9 = vmul.f32 %v1584_v23, %v1440_v30  ;;  %v1365_v31 = vadd.f32 %v8064_v61, %v1364_v40 }
 0x248   :  { %v1631_v10 = vmul.f32 %v1583_v0, %v1439_v51  ;;  %v1492_v29 = vmul.f32 0.70710677, %v1370_v56  ;;  %v1444_v60 = vmul.f32 0.5, %v1370_v56 }
 0x249   :  { %v1491_v8 = vmul.f32 0.70710677, %v1365_v31  ;;  %v1443_v13 = vmul.f32 0.5, %v1365_v31 }
 0x24a   :  { %6561 = vmatprep.mubr.msk.f32.mxu1 %vm114_vm0, %v1631_v10  ;;  %7027 = verf.f32 %v1492_v29 }
 0x24b   :  { %6562 = vmatmul.mubr.msk.f32.gmra.mrb[36].mxu1 %vm114_vm0, %v1632_v9  ;;  %7029 = verf.f32 %v1491_v8 }
 0x24c   :  { %v7024_v26 = vpop.eup %7023 }
 0x24d   :  { %v7026_v11 = vpop.eup %7025  ;;  %v1586_v59 = vadd.f32 1.0, %v7024_v26 }
 0x24e   :  { %v1585_v39 = vadd.f32 1.0, %v7026_v11 }
 0x24f   :  { %v1634_v20 = vmul.f32 %v1586_v59, %v1442_v54 }
 0x250   :  { %v1633_v36 = vmul.f32 %v1585_v39, %v1441_v24 }
 0x252   :  { %6564 = vmatprep.mubr.msk.f32.mxu1 %vm114_vm0, %v1633_v36 }
 0x253   :  { %6565 = vmatmul.mubr.msk.f32.gmra.mrb[38].mxu1 %vm114_vm0, %v1634_v20 }
 0x254   :  { %v7028_v55 = vpop.eup %7027 }
 0x255   :  { %v7030_v4 = vpop.eup %7029  ;;  %v1588_v12 = vadd.f32 1.0, %v7028_v55 }
 0x256   :  { %v1587_v58 = vadd.f32 1.0, %v7030_v4 }
 0x257   :  { %v1636_v45 = vmul.f32 %v1588_v12, %v1444_v60 }
 0x258   :  { %v1635_v6 = vmul.f32 %v1587_v58, %v1443_v13 }
 0x259   :  { %v6492_v14 = vpop.f32.mrb[42].mxu0 }
 0x25a   :  { %6567 = vmatprep.mubr.msk.f32.mxu1 %vm114_vm0, %v1635_v6  ;;  %v1374_v15 = vpop.f32.mrb[43].mxu0  ;;  %v1380_v19 = vadd.f32 %v6492_v14, %v8064_v61 }
 0x25b   :  { %6568 = vmatmul.mubr.msk.f32.gmra.mrb[40].mxu1 %vm114_vm0, %v1636_v45  ;;  %v1375_v5 = vadd.f32 %v8064_v61, %v1374_v15 }
 0x25c   :  { %v1494_v22 = vmul.f32 0.70710677, %v1380_v19  ;;  %v1446_v18 = vmul.f32 0.5, %v1380_v19 }
 0x25d   :  { %v1493_v2 = vmul.f32 0.70710677, %v1375_v5  ;;  %v1445_v21 = vmul.f32 0.5, %v1375_v5 }
 0x25f   :  { %7031 = verf.f32 %v1493_v2 }
 0x260   :  { %7033 = verf.f32 %v1494_v22 }
 0x261   :  { %v6495_v43 = vpop.f32.mrb[44].mxu0 }
 0x262   :  { %v1384_v7 = vpop.f32.mrb[45].mxu0  ;;  %v1390_v16 = vadd.f32 %v6495_v43, %v8064_v61 }
 0x263   :  { %v1385_v46 = vadd.f32 %v8064_v61, %v1384_v7  ;;  %v8179_v61 = vld [vmem:[%s9190_s6] ss:$0 sm:$0xff] }
 0x264   :  { %v1496_v35 = vmul.f32 0.70710677, %v1390_v16  ;;  %v1448_v33 = vmul.f32 0.5, %v1390_v16 }
 0x265   :  { %v1495_v27 = vmul.f32 0.70710677, %v1385_v46  ;;  %v1447_v38 = vmul.f32 0.5, %v1385_v46 }
 0x267   :  { %7035 = verf.f32 %v1495_v27 }
 0x268   :  { %7037 = verf.f32 %v1496_v35 }
 0x269   :  { %v7032_v62 = vpop.eup %7031 }
 0x26a   :  { %v7034_v1 = vpop.eup %7033  ;;  %v1589_v42 = vadd.f32 1.0, %v7032_v62 }
 0x26b   :  { %v1590_v28 = vadd.f32 1.0, %v7034_v1 }
 0x26c   :  { %v1637_v34 = vmul.f32 %v1589_v42, %v1445_v21 }
 0x26d   :  { %v1638_v32 = vmul.f32 %v1590_v28, %v1446_v18 }
 0x26e   :  { %6570 = vmatprep.mubr.msk.f32.mxu1 %vm114_vm0, %v1637_v34 }
 0x26f   :  { %6571 = vmatmul.mubr.msk.f32.gmra.mrb[42].mxu1 %vm114_vm0, %v1638_v32 }
 0x271   :  { %v7036_v17 = vpop.eup %7035 }
 0x272   :  { %v7038_v37 = vpop.eup %7037  ;;  %v1591_v63 = vadd.f32 1.0, %v7036_v17 }
 0x273   :  { %v1592_v50 = vadd.f32 1.0, %v7038_v37 }
 0x274   :  { %v1639_v25 = vmul.f32 %v1591_v63, %v1447_v38 }
 0x275   :  { %v1640_v57 = vmul.f32 %v1592_v50, %v1448_v33 }
 0x276   :  { %6573 = vmatprep.mubr.msk.f32.mxu1 %vm114_vm0, %v1639_v25 }
 0x277   :  { %6574 = vmatmul.mubr.msk.f32.gmra.mrb[44].mxu1 %vm114_vm0, %v1640_v57 }
 0x291   :  { %v6509_v49 = vpop.f32.mrb[0].mxu1 }
 0x292   :  { %v1865_v47 = vadd.f32 %v6509_v49, %v8179_v61  ;;  %v1859_v41 = vpop.f32.mrb[1].mxu1 }
 0x293   :  { %v1860_v48 = vadd.f32 %v8179_v61, %v1859_v41 }
 0x294   :  { %v2389_v30 = vsel %vm2259_vm1, %v1865_v47, -inf }
 0x295   :  { %v2388_v3 = vsel %vm2259_vm1, %v1860_v48, -inf }
 0x296   :  { %v2390_v51 = vmax.f32 %v2388_v3, %v2389_v30 }
 0x298   :  { %v2391_v44 = vrot.slane %v2390_v51, 4  ;;  %v6512_v23 = vpop.f32.mrb[2].mxu1 }
 0x299   :  { %v1875_v53 = vadd.f32 %v6512_v23, %v8179_v61  ;;  %v1869_v0 = vpop.f32.mrb[3].mxu1 }
 0x29a   :  { %v2392_v56 = vmax.f32 %v2390_v51, %v2391_v44  ;;  %v1870_v40 = vadd.f32 %v8179_v61, %v1869_v0 }
 0x29b   :  { %v2398_v9 = vsel %vm2259_vm1, %v1875_v53, -inf }
 0x29c   :  { %v2393_v31 = vrot.slane %v2392_v56, 2  ;;  %v2397_v10 = vsel %vm2259_vm1, %v1870_v40, -inf }
 0x29d   :  { %v2399_v29 = vmax.f32 %v2397_v10, %v2398_v9 }
 0x29e   :  { %v2394_v8 = vmax.f32 %v2392_v56, %v2393_v31 }
 0x29f   :  { %v2400_v54 = vrot.slane %v2399_v29, 4 }
 0x2a0   :  { %v2395_v26 = vrot.slane %v2394_v8, 1  ;;  %v6515_v24 = vpop.f32.mrb[4].mxu1 }
 0x2a1   :  { %v2401_v11 = vmax.f32 %v2399_v29, %v2400_v54  ;;  %v1885_v59 = vadd.f32 %v6515_v24, %v8179_v61  ;;  %v1879_v39 = vpop.f32.mrb[5].mxu1 }
 0x2a2   :  { %v2396_v20 = vmax.f32 %v2394_v8, %v2395_v26  ;;  %v1880_v36 = vadd.f32 %v8179_v61, %v1879_v39 }
 0x2a3   :  { %v2402_v60 = vrot.slane %v2401_v11, 2  ;;  %v2407_v55 = vsel %vm2259_vm1, %v1885_v59, -inf }
 0x2a4   :  { %v2532_v13 = vsub.f32 %v1860_v48, %v2396_v20  ;;  %v2533_v4 = vsub.f32 %v1865_v47, %v2396_v20  ;;  %v2406_v12 = vsel %vm2259_vm1, %v1880_v36, -inf }
 0x2a5   :  { %v2403_v58 = vmax.f32 %v2401_v11, %v2402_v60  ;;  %v2408_v45 = vmax.f32 %v2406_v12, %v2407_v55 }
 0x2a6   :  { %v2564_v6 = vmul.f32 1.442695, %v2532_v13  ;;  %v2566_v14 = vmul.f32 1.442695, %v2533_v4 }
 0x2a7   :  { %v2404_v15 = vrot.slane %v2403_v58, 1  ;;  %v2409_v5 = vrot.slane %v2408_v45, 4 }
 0x2a8   :  { %7039 = vpow2.f32 %v2564_v6  ;;  %v6518_v19 = vpop.f32.mrb[6].mxu1 }
 0x2a9   :  { %7041 = vpow2.f32 %v2566_v14  ;;  %v2405_v2 = vmax.f32 %v2403_v58, %v2404_v15  ;;  %v2410_v43 = vmax.f32 %v2408_v45, %v2409_v5  ;;  %v1895_v22 = vadd.f32 %v6518_v19, %v8179_v61  ;;  %v1889_v7 = vpop.f32.mrb[7].mxu1 }
 0x2aa   :  { %v1890_v46 = vadd.f32 %v8179_v61, %v1889_v7 }
 0x2ab   :  { %v2534_v16 = vsub.f32 %v1870_v40, %v2405_v2  ;;  %v2535_v27 = vsub.f32 %v1875_v53, %v2405_v2  ;;  %v2411_v35 = vrot.slane %v2410_v43, 2  ;;  %v2416_v62 = vsel %vm2259_vm1, %v1895_v22, -inf }
 0x2ac   :  { %v2415_v1 = vsel %vm2259_vm1, %v1890_v46, -inf }
 0x2ad   :  { %v2568_v21 = vmul.f32 1.442695, %v2534_v16  ;;  %v2570_v42 = vmul.f32 1.442695, %v2535_v27  ;;  %v2412_v18 = vmax.f32 %v2410_v43, %v2411_v35  ;;  %v2417_v28 = vmax.f32 %v2415_v1, %v2416_v62 }
 0x2af   :  { %7043 = vpow2.f32 %v2568_v21  ;;  %v2413_v34 = vrot.slane %v2412_v18, 1  ;;  %v2418_v17 = vrot.slane %v2417_v28, 4 }
 0x2b0   :  { %7045 = vpow2.f32 %v2570_v42  ;;  %v6521_v32 = vpop.f32.mrb[8].mxu1 }
 0x2b1   :  { %v2414_v37 = vmax.f32 %v2412_v18, %v2413_v34  ;;  %v2419_v38 = vmax.f32 %v2417_v28, %v2418_v17  ;;  %v8201_v63 = vadd.f32 %v6521_v32, %v8179_v61  ;;  %v1899_v33 = vpop.f32.mrb[9].mxu1 }
 0x2b2   :  { %v8203_v50 = vpop.eup %7039  ;;  %v8206_v25 = vadd.f32 %v8179_v61, %v1899_v33 }
 0x2b3   :  { %v8208_v49 = vpop.eup %7041  ;;  %v2628_v57 = vsel %vm2259_vm1, %v8203_v50, 0.0  ;;  %v2536_v47 = vsub.f32 %v1880_v36, %v2414_v37  ;;  %v2537_v41 = vsub.f32 %v1885_v59, %v2414_v37  ;;  %v2420_v48 = vrot.slane %v2419_v38, 2 }
 0x2b4   :  { %v2629_v30 = vsel %vm2259_vm1, %v8208_v49, 0.0  ;;  %v2425_v3 = vsel %vm2259_vm1, %v8201_v63, -inf  ;;  %v2424_v51 = vsel %vm2259_vm1, %v8206_v25, -inf }
 0x2b5   :  { %v2630_v44 = vadd.f32 %v2629_v30, %v2628_v57  ;;  %v2572_v23 = vmul.f32 1.442695, %v2536_v47  ;;  %v2574_v53 = vmul.f32 1.442695, %v2537_v41  ;;  %v2421_v0 = vmax.f32 %v2419_v38, %v2420_v48 }
 0x2b6   :  { %v2426_v56 = vmax.f32 %v2424_v51, %v2425_v3 }
 0x2b7   :  { %7047 = vpow2.f32 %v2572_v23  ;;  %v2422_v40 = vrot.slane %v2421_v0, 1  ;;  %v2631_v9 = vrot.slane %v2630_v44, 4 }
 0x2b8   :  { %7049 = vpow2.f32 %v2574_v53  ;;  %v2427_v31 = vrot.slane %v2426_v56, 4  ;;  %v6524_v10 = vpop.f32.mrb[10].mxu1 }
 0x2b9   :  { %v8218_v29 = vpop.eup %7043  ;;  %v2423_v8 = vmax.f32 %v2421_v0, %v2422_v40  ;;  %v8221_v54 = vadd.f32 %v6524_v10, %v8179_v61  ;;  %v1909_v26 = vpop.f32.mrb[11].mxu1  ;;  %v2632_v24 = vadd.f32 %v2631_v9, %v2630_v44 }
 0x2ba   :  { %v8223_v11 = vpop.eup %7045  ;;  %v2637_v59 = vsel %vm2259_vm1, %v8218_v29, 0.0  ;;  %v2428_v39 = vmax.f32 %v2426_v56, %v2427_v31  ;;  %v8228_v20 = vadd.f32 %v8179_v61, %v1909_v26 }
 0x2bb   :  { %v2638_v36 = vsel %vm2259_vm1, %v8223_v11, 0.0  ;;  %v2538_v60 = vsub.f32 %v1890_v46, %v2423_v8  ;;  %v2539_v55 = vsub.f32 %v1895_v22, %v2423_v8  ;;  %v2434_v13 = vsel %vm2259_vm1, %v8221_v54, -inf }
 0x2bc   :  { %v2639_v4 = vadd.f32 %v2638_v36, %v2637_v59  ;;  %v2429_v12 = vrot.slane %v2428_v39, 2  ;;  %v2433_v58 = vsel %vm2259_vm1, %v8228_v20, -inf  ;;  %v2633_v45 = vrot.slane %v2632_v24, 2 }
 0x2bd   :  { %v2576_v6 = vmul.f32 1.442695, %v2538_v60  ;;  %v2578_v14 = vmul.f32 1.442695, %v2539_v55  ;;  %v2435_v15 = vmax.f32 %v2433_v58, %v2434_v13 }
 0x2be   :  { %v2430_v5 = vmax.f32 %v2428_v39, %v2429_v12  ;;  %v2634_v19 = vadd.f32 %v2633_v45, %v2632_v24  ;;  %v2640_v2 = vrot.slane %v2639_v4, 4 }
 0x2bf   :  { %7051 = vpow2.f32 %v2576_v6  ;;  %v2436_v43 = vrot.slane %v2435_v15, 4 }
 0x2c0   :  { %7053 = vpow2.f32 %v2578_v14  ;;  %v2431_v7 = vrot.slane %v2430_v5, 1  ;;  %v6527_v22 = vpop.f32.mrb[12].mxu1  ;;  %v2635_v46 = vrot.slane %v2634_v19, 1  ;;  %v2641_v16 = vadd.f32 %v2640_v2, %v2639_v4 }
 0x2c1   :  { %v8236_v27 = vpop.eup %7047  ;;  %v2437_v35 = vmax.f32 %v2435_v15, %v2436_v43  ;;  %v8239_v62 = vadd.f32 %v6527_v22, %v8179_v61  ;;  %v1919_v1 = vpop.f32.mrb[13].mxu1 }
 0x2c2   :  { %v8241_v21 = vpop.eup %7049  ;;  %v2646_v42 = vsel %vm2259_vm1, %v8236_v27, 0.0  ;;  %v2432_v18 = vmax.f32 %v2430_v5, %v2431_v7  ;;  %v8246_v28 = vadd.f32 %v8179_v61, %v1919_v1  ;;  %v2636_v34 = vadd.f32 %v2635_v46, %v2634_v19 }
 0x2c3   :  { %v2647_v17 = vsel %vm2259_vm1, %v8241_v21, 0.0  ;;  %v2438_v32 = vrot.slane %v2437_v35, 2  ;;  %v2443_v37 = vsel %vm2259_vm1, %v8239_v62, -inf  ;;  %v2642_v38 = vrot.slane %v2641_v16, 2 }
 0x2c4   :  { %v2648_v33 = vadd.f32 %v2647_v17, %v2646_v42  ;;  %v2540_v57 = vsub.f32 %v8206_v25, %v2432_v18  ;;  %v2541_v47 = vsub.f32 %v8201_v63, %v2432_v18  ;;  %v2442_v41 = vsel %vm2259_vm1, %v8246_v28, -inf }
 0x2c5   :  { %v2439_v48 = vmax.f32 %v2437_v35, %v2438_v32  ;;  %v2444_v30 = vmax.f32 %v2442_v41, %v2443_v37  ;;  %7055 = vrcp.f32 %v2636_v34  ;;  %v2643_v3 = vadd.f32 %v2642_v38, %v2641_v16 }
 0x2c6   :  { %v2649_v51 = vrot.slane %v2648_v33, 4  ;;  %v2580_v44 = vmul.f32 1.442695, %v2540_v57  ;;  %v2582_v23 = vmul.f32 1.442695, %v2541_v47 }
 0x2c7   :  { %v2440_v53 = vrot.slane %v2439_v48, 1  ;;  %v2445_v0 = vrot.slane %v2444_v30, 4  ;;  %v2644_v56 = vrot.slane %v2643_v3, 1 }
 0x2c8   :  { %v2650_v40 = vadd.f32 %v2649_v51, %v2648_v33  ;;  %7057 = vpow2.f32 %v2580_v44  ;;  %v6530_v9 = vpop.f32.mrb[14].mxu1 }
 0x2c9   :  { %v8256_v31 = vpop.eup %7051  ;;  %7059 = vpow2.f32 %v2582_v23  ;;  %v2441_v63 = vmax.f32 %v2439_v48, %v2440_v53  ;;  %v2446_v25 = vmax.f32 %v2444_v30, %v2445_v0  ;;  %v8259_v10 = vadd.f32 %v6530_v9, %v8179_v61  ;;  %v1929_v8 = vpop.f32.mrb[15].mxu1 }
 0x2ca   :  { %v8261_v26 = vpop.eup %7053  ;;  %v2655_v24 = vsel %vm2259_vm1, %v8256_v31, 0.0  ;;  %v8266_v59 = vadd.f32 %v8179_v61, %v1929_v8  ;;  %v2645_v39 = vadd.f32 %v2644_v56, %v2643_v3  ;;  %v2651_v36 = vrot.slane %v2650_v40, 2 }
 0x2cb   :  { %v2656_v60 = vsel %vm2259_vm1, %v8261_v26, 0.0  ;;  %v2542_v55 = vsub.f32 %v8228_v20, %v2441_v63  ;;  %v2543_v13 = vsub.f32 %v8221_v54, %v2441_v63  ;;  %v2447_v4 = vrot.slane %v2446_v25, 2 }
 0x2cc   :  { %v2657_v12 = vadd.f32 %v2656_v60, %v2655_v24  ;;  %v2452_v58 = vsel %vm2259_vm1, %v8259_v10, -inf  ;;  %v2451_v45 = vsel %vm2259_vm1, %v8266_v59, -inf  ;;  %7061 = vrcp.f32 %v2645_v39 }
 0x2cd   :  { %v2584_v6 = vmul.f32 1.442695, %v2542_v55  ;;  %v2586_v14 = vmul.f32 1.442695, %v2543_v13  ;;  %v2448_v15 = vmax.f32 %v2446_v25, %v2447_v4  ;;  %v2453_v5 = vmax.f32 %v2451_v45, %v2452_v58 }
 0x2ce   :  { %v2658_v19 = vrot.slane %v2657_v12, 4  ;;  %v2652_v2 = vadd.f32 %v2651_v36, %v2650_v40 }
 0x2cf   :  { %v7056_v43 = vpop.eup %7055  ;;  %7063 = vpow2.f32 %v2584_v6  ;;  %v2449_v20 = vrot.slane %v2448_v15, 1  ;;  %v2454_v7 = vrot.slane %v2453_v5, 4 }
 0x2d0   :  { %v2659_v54 = vadd.f32 %v2658_v19, %v2657_v12  ;;  %7065 = vpow2.f32 %v2586_v14  ;;  %v6533_v22 = vpop.f32.mrb[16].mxu1  ;;  %v2788_v46 = vmul.f32 %v7056_v43, %v2636_v34  ;;  %v2653_v16 = vrot.slane %v2652_v2, 1 }
 0x2d1   :  { %v2450_v35 = vmax.f32 %v2448_v15, %v2449_v20  ;;  %v2455_v1 = vmax.f32 %v2453_v5, %v2454_v7  ;;  %v8277_v42 = vadd.f32 %v6533_v22, %v8179_v61  ;;  %v1939_v18 = vpop.f32.mrb[17].mxu1 }
 0x2d2   :  { %v8279_v17 = vpop.eup %7057  ;;  %v8282_v32 = vadd.f32 %v8179_v61, %v1939_v18  ;;  %v2804_v37 = vsub.f32 2.0, %v2788_v46  ;;  %v8284_v38 = vadd.f32 %v2653_v16, %v2652_v2  ;;  %v2660_v33 = vrot.slane %v2659_v54, 2 }
 0x2d3   :  { %v8286_v57 = vpop.eup %7059  ;;  %v2664_v34 = vsel %vm2259_vm1, %v8279_v17, 0.0  ;;  %v2544_v47 = vsub.f32 %v8246_v28, %v2450_v35  ;;  %v2545_v41 = vsub.f32 %v8239_v62, %v2450_v35  ;;  %v2456_v48 = vrot.slane %v2455_v1, 2 }
 0x2d4   :  { %v2665_v30 = vsel %vm2259_vm1, %v8286_v57, 0.0  ;;  %v2461_v3 = vsel %vm2259_vm1, %v8277_v42, -inf  ;;  %v2460_v51 = vsel %vm2259_vm1, %v8282_v32, -inf  ;;  %v2820_v44 = vmul.f32 %v7056_v43, %v2804_v37 }
 0x2d5   :  { %v2666_v23 = vadd.f32 %v2665_v30, %v2664_v34  ;;  %v2588_v53 = vmul.f32 1.442695, %v2544_v47  ;;  %v2590_v0 = vmul.f32 1.442695, %v2545_v41  ;;  %v2457_v56 = vmax.f32 %v2455_v1, %v2456_v48 }
 0x2d6   :  { %v7062_v40 = vpop.eup %7061  ;;  %v2462_v9 = vmax.f32 %v2460_v51, %v2461_v3  ;;  %v8299_v28 = vmul.f32 %v8203_v50, %v2820_v44  ;;  %v8302_v62 = vmul.f32 %v8208_v49, %v2820_v44  ;;  %7067 = vrcp.f32 %v8284_v38 }
 0x2d7   :  { %v2667_v63 = vrot.slane %v2666_v23, 4  ;;  %7069 = vpow2.f32 %v2588_v53  ;;  %v2458_v25 = vrot.slane %v2457_v56, 1  ;;  %v2789_v8 = vmul.f32 %v7062_v40, %v2645_v39 }
 0x2d8   :  { %7071 = vpow2.f32 %v2590_v0  ;;  %v2463_v24 = vrot.slane %v2462_v9, 4  ;;  %v6536_v36 = vpop.f32.mrb[18].mxu1  ;;  %v8305_v60 = vadd.f32 %v2660_v33, %v2659_v54 }
 0x2d9   :  { %v8307_v55 = vpop.eup %7063  ;;  %v8309_v13 = vadd.f32 %v2667_v63, %v2666_v23  ;;  %v2459_v50 = vmax.f32 %v2457_v56, %v2458_v25  ;;  %v8312_v4 = vadd.f32 %v6536_v36, %v8179_v61  ;;  %v1949_v49 = vpop.f32.mrb[19].mxu1  ;;  %v2805_v12 = vsub.f32 2.0, %v2789_v8 }
 0x2da   :  { %v8314_v58 = vpop.eup %7065  ;;  %v2673_v39 = vsel %vm2259_vm1, %v8307_v55, 0.0  ;;  %v2464_v45 = vmax.f32 %v2462_v9, %v2463_v24  ;;  %v8319_v6 = vadd.f32 %v8179_v61, %v1949_v49  ;;  %v2662_v14 = vrot.slane %v8305_v60, 1 }
 0x2db   :  { %v2674_v15 = vsel %vm2259_vm1, %v8314_v58, 0.0  ;;  %v2546_v5 = vsub.f32 %v8266_v59, %v2459_v50  ;;  %v2547_v19 = vsub.f32 %v8259_v10, %v2459_v50  ;;  %v2470_v2 = vsel %vm2259_vm1, %v8312_v4, -inf  ;;  %v6498_v43 = vpop.f32.mrb[46].mxu0  ;;  %v7225_v59 = vld [vmem:[%s9188_s4] ss:$0 sm:$0xff] }
 0x2dc   :  { %v2675_v20 = vadd.f32 %v2674_v15, %v2673_v39  ;;  %v2465_v7 = vrot.slane %v2464_v45, 2  ;;  %v2469_v54 = vsel %vm2259_vm1, %v8319_v6, -inf  ;;  %v2821_v22 = vmul.f32 %v7062_v40, %v2805_v12  ;;  %v1394_v46 = vpop.f32.mrb[47].mxu0 }
 0x2dd   :  { %v2592_v16 = vmul.f32 1.442695, %v2546_v5  ;;  %v2594_v35 = vmul.f32 1.442695, %v2547_v19  ;;  %v2471_v1 = vmax.f32 %v2469_v54, %v2470_v2  ;;  %v1400_v18 = vadd.f32 %v7225_v59, %v6498_v43 }
 0x2de   :  { %v2676_v10 = vrot.slane %v2675_v20, 4  ;;  %v2466_v37 = vmax.f32 %v2464_v45, %v2465_v7  ;;  %v8334_v33 = vmul.f32 %v8218_v29, %v2821_v22  ;;  %v1395_v34 = vadd.f32 %v7225_v59, %v1394_v46 }
 0x2df   :  { %7073 = vpow2.f32 %v2592_v16  ;;  %v2472_v47 = vrot.slane %v2471_v1, 4  ;;  %v8336_v41 = vmul.f32 0.5, %v1400_v18  ;;  %v1498_v48 = vmul.f32 0.70710677, %v1400_v18 }
 0x2e0   :  { %v7068_v30 = vpop.eup %7067  ;;  %v8338_v3 = vadd.f32 %v2676_v10, %v2675_v20  ;;  %7075 = vpow2.f32 %v2594_v35  ;;  %v2467_v51 = vrot.slane %v2466_v37, 1  ;;  %v6539_v44 = vpop.f32.mrb[20].mxu1  ;;  %v8340_v23 = vmul.f32 0.5, %v1395_v34 }
 0x2e1   :  { %v8342_v53 = vpop.eup %7069  ;;  %v2473_v0 = vmax.f32 %v2471_v1, %v2472_v47  ;;  %v8345_v29 = vadd.f32 %v6539_v44, %v8179_v61  ;;  %v1959_v56 = vpop.f32.mrb[21].mxu1  ;;  %7077 = verf.f32 %v1498_v48  ;;  %v1497_v40 = vmul.f32 0.70710677, %v1395_v34 }
 0x2e2   :  { %v8347_v9 = vpop.eup %7071  ;;  %v2682_v63 = vsel %vm2259_vm1, %v8342_v53, 0.0  ;;  %v2468_v25 = vmax.f32 %v2466_v37, %v2467_v51  ;;  %v8352_v8 = vadd.f32 %v8179_v61, %v1959_v56  ;;  %v8355_v24 = vmul.f32 %v8223_v11, %v2821_v22 }
 0x2e3   :  { %v2683_v36 = vsel %vm2259_vm1, %v8347_v9, 0.0  ;;  %v2474_v50 = vrot.slane %v2473_v0, 2  ;;  %v2479_v49 = vsel %vm2259_vm1, %v8345_v29, -inf  ;;  %7079 = verf.f32 %v1497_v40 }
 0x2e4   :  { %v2684_v12 = vadd.f32 %v2683_v36, %v2682_v63  ;;  %v2548_v39 = vsub.f32 %v8282_v32, %v2468_v25  ;;  %v2549_v45 = vsub.f32 %v8277_v42, %v2468_v25  ;;  %v2478_v15 = vsel %vm2259_vm1, %v8352_v8, -inf }
 0x2e5   :  { %v2475_v5 = vmax.f32 %v2473_v0, %v2474_v50  ;;  %v2480_v19 = vmax.f32 %v2478_v15, %v2479_v49  ;;  %v2790_v11 = vmul.f32 %v7068_v30, %v8284_v38  ;;  %v2663_v2 = vadd.f32 %v2662_v14, %v8305_v60 }
 0x2e6   :  { %v2685_v43 = vrot.slane %v2684_v12, 4  ;;  %v2596_v20 = vmul.f32 1.442695, %v2548_v39  ;;  %v2598_v7 = vmul.f32 1.442695, %v2549_v45  ;;  %v2669_v54 = vrot.slane %v8309_v13, 2 }
 0x2e7   :  { %v2476_v22 = vrot.slane %v2475_v5, 1  ;;  %v2481_v46 = vrot.slane %v2480_v19, 4  ;;  %v2806_v16 = vsub.f32 2.0, %v2790_v11  ;;  %7081 = vrcp.f32 %v2663_v2 }
 0x2e8   :  { %v8368_v32 = vadd.f32 %v2685_v43, %v2684_v12  ;;  %7083 = vpow2.f32 %v2596_v20  ;;  %v6542_v42 = vpop.f32.mrb[22].mxu1  ;;  %v2670_v35 = vadd.f32 %v2669_v54, %v8309_v13  ;;  %v2678_v1 = vrot.slane %v8338_v3, 2 }
 0x2e9   :  { %v8372_v38 = vpop.eup %7073  ;;  %7085 = vpow2.f32 %v2598_v7  ;;  %v2477_v60 = vmax.f32 %v2475_v5, %v2476_v22  ;;  %v2482_v14 = vmax.f32 %v2480_v19, %v2481_v46  ;;  %v8375_v59 = vadd.f32 %v6542_v42, %v8179_v61  ;;  %v1969_v18 = vpop.f32.mrb[23].mxu1 }
 0x2ea   :  { %v8377_v10 = vpop.eup %7075  ;;  %v2691_v37 = vsel %vm2259_vm1, %v8372_v38, 0.0  ;;  %v8382_v34 = vadd.f32 %v8179_v61, %v1969_v18  ;;  %v2822_v13 = vmul.f32 %v7068_v30, %v2806_v16  ;;  %v2671_v47 = vrot.slane %v2670_v35, 1 }
 0x2eb   :  { %v7078_v48 = vpop.eup %7077  ;;  %v2692_v51 = vsel %vm2259_vm1, %v8377_v10, 0.0  ;;  %v2550_v44 = vsub.f32 %v8319_v6, %v2477_v60  ;;  %v2551_v0 = vsub.f32 %v8312_v4, %v2477_v60  ;;  %v2483_v56 = vrot.slane %v2482_v14, 2 }
 0x2ec   :  { %v2693_v40 = vadd.f32 %v2692_v51, %v2691_v37  ;;  %v2488_v63 = vsel %vm2259_vm1, %v8375_v59, -inf  ;;  %v2487_v25 = vsel %vm2259_vm1, %v8382_v34, -inf  ;;  %v1594_v36 = vadd.f32 1.0, %v7078_v48 }
 0x2ed   :  { %v7080_v50 = vpop.eup %7079  ;;  %v2600_v30 = vmul.f32 1.442695, %v2550_v44  ;;  %v2602_v49 = vmul.f32 1.442695, %v2551_v0  ;;  %v2484_v12 = vmax.f32 %v2482_v14, %v2483_v56  ;;  %v2489_v39 = vmax.f32 %v2487_v25, %v2488_v63 }
 0x2ee   :  { %v2694_v45 = vrot.slane %v2693_v40, 4  ;;  %v1642_v15 = vmul.f32 %v1594_v36, %v8336_v41  ;;  %v1593_v6 = vadd.f32 1.0, %v7080_v50  ;;  %v8394_v4 = vmul.f32 %v8236_v27, %v2822_v13 }
 0x2ef   :  { %7087 = vpow2.f32 %v2600_v30  ;;  %v2485_v5 = vrot.slane %v2484_v12, 1  ;;  %v2490_v19 = vrot.slane %v2489_v39, 4  ;;  %v8397_v11 = vmul.f32 %v8241_v21, %v2822_v13 }
 0x2f0   :  { %v8399_v43 = vadd.f32 %v2694_v45, %v2693_v40  ;;  %7089 = vpow2.f32 %v2602_v49  ;;  %v6545_v20 = vpop.f32.mrb[24].mxu1  ;;  %v1641_v7 = vmul.f32 %v1593_v6, %v8340_v23  ;;  %v8402_v54 = vadd.f32 %v2671_v47, %v2670_v35 }
 0x2f1   :  { %v7082_v22 = vpop.eup %7081  ;;  %v2486_v41 = vmax.f32 %v2484_v12, %v2485_v5  ;;  %v2491_v46 = vmax.f32 %v2489_v39, %v2490_v19  ;;  %v8405_v27 = vadd.f32 %v6545_v20, %v8179_v61  ;;  %v1979_v16 = vpop.f32.mrb[25].mxu1  ;;  %v2679_v42 = vadd.f32 %v2678_v1, %v8338_v3 }
 0x2f2   :  { %v8408_v60 = vpop.eup %7083  ;;  %v8411_v21 = vadd.f32 %v8179_v61, %v1979_v16  ;;  %6576 = vmatprep.mubr.msk.f32.mxu1 %vm114_vm0, %v1641_v7  ;;  %v2791_v14 = vmul.f32 %v7082_v22, %v2663_v2  ;;  %7091 = vrcp.f32 %v8402_v54  ;;  %v2687_v23 = vrot.slane %v8368_v32, 2 }
 0x2f3   :  { %v8416_v35 = vpop.eup %7085  ;;  %v2700_v18 = vsel %vm2259_vm1, %v8408_v60, 0.0  ;;  %v2552_v37 = vsub.f32 %v8352_v8, %v2486_v41  ;;  %v2553_v3 = vsub.f32 %v8345_v29, %v2486_v41  ;;  %v2492_v1 = vrot.slane %v2491_v46, 2  ;;  %6577 = vmatmul.mubr.msk.f32.gmra.mrb[46].mxu1 %vm114_vm0, %v1642_v15 }
 0x2f4   :  { %v2701_v13 = vsel %vm2259_vm1, %v8416_v35, 0.0  ;;  %v2497_v2 = vsel %vm2259_vm1, %v8405_v27, -inf  ;;  %v2496_v47 = vsel %vm2259_vm1, %v8411_v21, -inf  ;;  %v2807_v48 = vsub.f32 2.0, %v2791_v14 }
 0x2f5   :  { %v2702_v51 = vadd.f32 %v2701_v13, %v2700_v18  ;;  %v2604_v44 = vmul.f32 1.442695, %v2552_v37  ;;  %v2606_v0 = vmul.f32 1.442695, %v2553_v3  ;;  %v2493_v56 = vmax.f32 %v2491_v46, %v2492_v1 }
 0x2f6   :  { %v2498_v8 = vmax.f32 %v2496_v47, %v2497_v2  ;;  %v2823_v40 = vmul.f32 %v7082_v22, %v2807_v48  ;;  %v2680_v29 = vrot.slane %v2679_v42, 1  ;;  %v2688_v63 = vadd.f32 %v2687_v23, %v8368_v32 }
 0x2f7   :  { %v2703_v25 = vrot.slane %v2702_v51, 4  ;;  %7093 = vpow2.f32 %v2604_v44  ;;  %v2494_v36 = vrot.slane %v2493_v56, 1  ;;  %v2696_v50 = vrot.slane %v8399_v43, 2 }
 0x2f8   :  { %7095 = vpow2.f32 %v2606_v0  ;;  %v2499_v30 = vrot.slane %v2498_v8, 4  ;;  %v6548_v49 = vpop.f32.mrb[26].mxu1  ;;  %v8432_v12 = vmul.f32 %v8256_v31, %v2823_v40  ;;  %v8435_v39 = vmul.f32 %v8261_v26, %v2823_v40 }
 0x2f9   :  { %v8437_v45 = vpop.eup %7087  ;;  %v8439_v15 = vadd.f32 %v2703_v25, %v2702_v51  ;;  %v2495_v6 = vmax.f32 %v2493_v56, %v2494_v36  ;;  %v8442_v32 = vadd.f32 %v6548_v49, %v8179_v61  ;;  %v1989_v5 = vpop.f32.mrb[27].mxu1  ;;  %v8444_v19 = vadd.f32 %v2680_v29, %v2679_v42 }
 0x2fa   :  { %v8446_v20 = vpop.eup %7089  ;;  %v2709_v31 = vsel %vm2259_vm1, %v8437_v45, 0.0  ;;  %v2500_v7 = vmax.f32 %v2498_v8, %v2499_v30  ;;  %v8451_v26 = vadd.f32 %v8179_v61, %v1989_v5  ;;  %v2689_v22 = vrot.slane %v2688_v63, 1 }
 0x2fb   :  { %v2710_v41 = vsel %vm2259_vm1, %v8446_v20, 0.0  ;;  %v2554_v46 = vsub.f32 %v8382_v34, %v2495_v6  ;;  %v2555_v16 = vsub.f32 %v8375_v59, %v2495_v6  ;;  %v2506_v42 = vsel %vm2259_vm1, %v8442_v32, -inf }
 0x2fc   :  { %v7092_v14 = vpop.eup %7091  ;;  %v2711_v23 = vadd.f32 %v2710_v41, %v2709_v31  ;;  %v2501_v18 = vrot.slane %v2500_v7, 2  ;;  %v2505_v37 = vsel %vm2259_vm1, %v8451_v26, -inf  ;;  %7097 = vrcp.f32 %v8444_v19 }
 0x2fd   :  { %v2608_v3 = vmul.f32 1.442695, %v2554_v46  ;;  %v2610_v1 = vmul.f32 1.442695, %v2555_v16  ;;  %v2507_v13 = vmax.f32 %v2505_v37, %v2506_v42  ;;  %v2792_v2 = vmul.f32 %v7092_v14, %v8402_v54 }
 0x2fe   :  { %v2502_v47 = vmax.f32 %v2500_v7, %v2501_v18  ;;  %v8463_v34 = vadd.f32 %v2689_v22, %v2688_v63  ;;  %v2697_v59 = vadd.f32 %v2696_v50, %v8399_v43  ;;  %v2712_v48 = vrot.slane %v2711_v23, 4 }
 0x2ff   :  { %7099 = vpow2.f32 %v2608_v3  ;;  %v2508_v51 = vrot.slane %v2507_v13, 4  ;;  %v2808_v44 = vsub.f32 2.0, %v2792_v2  ;;  %v2705_v0 = vrot.slane %v8439_v15, 2 }
 0x300   :  { %7101 = vpow2.f32 %v2610_v1  ;;  %v2503_v56 = vrot.slane %v2502_v47, 1  ;;  %v6551_v8 = vpop.f32.mrb[28].mxu1  ;;  %v2698_v40 = vrot.slane %v2697_v59, 1  ;;  %v2713_v29 = vadd.f32 %v2712_v48, %v2711_v23 }
 0x301   :  { %v8467_v25 = vpop.eup %7093  ;;  %v2509_v36 = vmax.f32 %v2507_v13, %v2508_v51  ;;  %v8470_v54 = vadd.f32 %v6551_v8, %v8179_v61  ;;  %v1999_v63 = vpop.f32.mrb[29].mxu1  ;;  %v2824_v30 = vmul.f32 %v7092_v14, %v2808_v44  ;;  %7103 = vrcp.f32 %v8463_v34 }
 0x302   :  { %v8473_v43 = vpop.eup %7095  ;;  %v2718_v50 = vsel %vm2259_vm1, %v8467_v25, 0.0  ;;  %v2504_v49 = vmax.f32 %v2502_v47, %v2503_v56  ;;  %v8478_v6 = vadd.f32 %v8179_v61, %v1999_v63  ;;  %v8480_v5 = vadd.f32 %v2698_v40, %v2697_v59 }
 0x303   :  { %v2719_v31 = vsel %vm2259_vm1, %v8473_v43, 0.0  ;;  %v2510_v7 = vrot.slane %v2509_v36, 2  ;;  %v2515_v22 = vsel %vm2259_vm1, %v8470_v54, -inf  ;;  %v8487_v41 = vmul.f32 %v8279_v17, %v2824_v30 }
 0x304   :  { %v8489_v46 = vadd.f32 %v2719_v31, %v2718_v50  ;;  %v2556_v16 = vsub.f32 %v8411_v21, %v2504_v49  ;;  %v2557_v42 = vsub.f32 %v8405_v27, %v2504_v49  ;;  %v2514_v14 = vsel %vm2259_vm1, %v8478_v6, -inf }
 0x305   :  { %v2511_v23 = vmax.f32 %v2509_v36, %v2510_v7  ;;  %v2516_v18 = vmax.f32 %v2514_v14, %v2515_v22  ;;  %v8496_v37 = vmul.f32 %v8286_v57, %v2824_v30  ;;  %7105 = vrcp.f32 %v8480_v5 }
 0x306   :  { %v7098_v3 = vpop.eup %7097  ;;  %v2612_v1 = vmul.f32 1.442695, %v2556_v16  ;;  %v2614_v17 = vmul.f32 1.442695, %v2557_v42  ;;  %v2714_v13 = vrot.slane %v2713_v29, 2  ;;  %v8500_v2 = vadd.f32 %v2705_v0, %v8439_v15 }
 0x307   :  { %v2512_v21 = vrot.slane %v2511_v23, 1  ;;  %v2517_v47 = vrot.slane %v2516_v18, 4  ;;  %v6554_v27 = vpop.f32.mrb[30].mxu1  ;;  %v2793_v59 = vmul.f32 %v7098_v3, %v8444_v19  ;;  %v2721_v48 = vrot.slane %v8489_v46, 4 }
 0x308   :  { %7107 = vpow2.f32 %v2612_v1  ;;  %v8505_v57 = vadd.f32 %v6554_v27, %v8179_v61  ;;  %v2009_v51 = vpop.f32.mrb[31].mxu1  ;;  %v2715_v44 = vadd.f32 %v2714_v13, %v2713_v29  ;;  %v2707_v56 = vrot.slane %v8500_v2, 1 }
 0x309   :  { %v8508_v8 = vpop.eup %7099  ;;  %7109 = vpow2.f32 %v2614_v17  ;;  %v2513_v15 = vmax.f32 %v2511_v23, %v2512_v21  ;;  %v2518_v0 = vmax.f32 %v2516_v18, %v2517_v47  ;;  %v8511_v40 = vadd.f32 %v8179_v61, %v2009_v51 }
 0x30a   :  { %v8513_v36 = vpop.eup %7101  ;;  %v2727_v19 = vsel %vm2259_vm1, %v8508_v8, 0.0  ;;  %v2524_v63 = vsel %vm2259_vm1, %v8505_v57, -inf  ;;  %v2809_v30 = vsub.f32 2.0, %v2793_v59  ;;  %v2716_v29 = vrot.slane %v2715_v44, 1 }
 0x30b   :  { %v7104_v50 = vpop.eup %7103  ;;  %v2728_v49 = vsel %vm2259_vm1, %v8513_v36, 0.0  ;;  %v2558_v31 = vsub.f32 %v8451_v26, %v2513_v15  ;;  %v2559_v7 = vsub.f32 %v8442_v32, %v2513_v15  ;;  %v2519_v22 = vrot.slane %v2518_v0, 2 }
 0x30c   :  { %v2729_v16 = vadd.f32 %v2728_v49, %v2727_v19  ;;  %v2523_v42 = vsel %vm2259_vm1, %v8511_v40, -inf  ;;  %v2825_v14 = vmul.f32 %v7098_v3, %v2809_v30  ;;  %v2794_v23 = vmul.f32 %v7104_v50, %v8463_v34 }
 0x30d   :  { %v2616_v18 = vmul.f32 1.442695, %v2558_v31  ;;  %v2618_v1 = vmul.f32 1.442695, %v2559_v7  ;;  %v2520_v17 = vmax.f32 %v2518_v0, %v2519_v22  ;;  %v2525_v13 = vmax.f32 %v2523_v42, %v2524_v63 }
 0x30e   :  { %v8527_v21 = vmul.f32 %v8307_v55, %v2825_v14  ;;  %v8530_v47 = vmul.f32 %v8314_v58, %v2825_v14  ;;  %v2810_v26 = vsub.f32 2.0, %v2794_v23  ;;  %v8532_v32 = vadd.f32 %v2716_v29, %v2715_v44 }
 0x30f   :  { %v7106_v27 = vpop.eup %7105  ;;  %7111 = vpow2.f32 %v2616_v18  ;;  %v2521_v59 = vrot.slane %v2520_v17, 1  ;;  %v2526_v51 = vrot.slane %v2525_v13, 4  ;;  %v6557_v3 = vpop.f32.mrb[32].mxu1  ;;  %v2730_v15 = vrot.slane %v2729_v16, 4 }
 0x310   :  { %7113 = vpow2.f32 %v2618_v1  ;;  %v8535_v34 = vadd.f32 %v6557_v3, %v8179_v61  ;;  %v2019_v0 = vpop.f32.mrb[33].mxu1  ;;  %v2826_v19 = vmul.f32 %v7104_v50, %v2810_v26  ;;  %v2795_v55 = vmul.f32 %v7106_v27, %v8480_v5 }
 0x311   :  { %v2522_v63 = vmax.f32 %v2520_v17, %v2521_v59  ;;  %v2527_v58 = vmax.f32 %v2525_v13, %v2526_v51  ;;  %v8539_v30 = vadd.f32 %v8179_v61, %v2019_v0  ;;  %7115 = vrcp.f32 %v8532_v32 }
 0x312   :  { %v8542_v44 = vpop.eup %7107  ;;  %v2102_v29 = vsel %vm2098_vm2, %v8535_v34, -inf  ;;  %v8547_v49 = vmul.f32 %v8342_v53, %v2826_v19  ;;  %v8550_v31 = vmul.f32 %v8347_v9, %v2826_v19  ;;  %v2811_v50 = vsub.f32 2.0, %v2795_v55 }
 0x313   :  { %9196 = vst [vmem:[#allocation12_spill] sm:$0xff] %v8539_v30  ;;  %v8552_v5 = vpop.eup %7109  ;;  %v2736_v61 = vsel %vm2259_vm1, %v8542_v44, 0.0  ;;  %v2560_v7 = vsub.f32 %v8478_v6, %v2522_v63  ;;  %v2561_v22 = vsub.f32 %v8470_v54, %v2522_v63  ;;  %v2528_v42 = vrot.slane %v2527_v58, 2  ;;  %2103 = vmax.xlane.f32.xlu1 %v2102_v29 }
 0x314   :  { %v2737_v14 = vsel %vm2259_vm1, %v8552_v5, 0.0  ;;  %v2099_v53 = vsel %vm2098_vm2, %v8539_v30, -inf  ;;  %v2827_v9 = vmul.f32 %v7106_v27, %v2811_v50  ;;  %v2731_v23 = vadd.f32 %v2730_v15, %v2729_v16  ;;  %v8574_v16 = vld [vmem:[%s9190_s6] ss:$0 sm:$0xff]  ;;  %s7338_s6 = smov 120  }
 0x315   :  { %v2738_v18 = vadd.f32 %v2737_v14, %v2736_v61  ;;  %v2620_v1 = vmul.f32 1.442695, %v2560_v7  ;;  %v2622_v17 = vmul.f32 1.442695, %v2561_v22  ;;  %v2529_v13 = vmax.f32 %v2527_v58, %v2528_v42  ;;  %2100 = vmax.xlane.f32.xlu0 %v2099_v53 }
 0x316   :  { %v6560_v26 = vpop.f32.mrb[34].mxu1  ;;  %v8563_v6 = vmul.f32 %v8372_v38, %v2827_v9  ;;  %v8566_v54 = vmul.f32 %v8377_v10, %v2827_v9  ;;  %v2732_v59 = vrot.slane %v2731_v23, 2  ;;  %v2708_v51 = vadd.f32 %v2707_v56, %v8500_v2 }
 0x317   :  { %7117 = vpow2.f32 %v2620_v1  ;;  %v2530_v27 = vrot.slane %v2529_v13, 1  ;;  %v8577_v3 = vadd.f32 %v8574_v16, %v6560_v26  ;;  %v8579_v38 = vpop.f32.mrb[35].mxu1  ;;  %v2722_v10 = vadd.f32 %v2721_v48, %v8489_v46 }
 0x318   :  { %7119 = vpow2.f32 %v2622_v17  ;;  %v2733_v15 = vadd.f32 %v2732_v59, %v2731_v23  ;;  %v2739_v0 = vrot.slane %v2738_v18, 4 }
 0x319   :  { %v8584_v2 = vpop.eup %7111  ;;  %v2531_v56 = vmax.f32 %v2529_v13, %v2530_v27  ;;  %v2108_v19 = vsel %vm2098_vm2, %v8577_v3, -inf  ;;  %7121 = vrcp.f32 %v2708_v51  ;;  %v2723_v55 = vrot.slane %v2722_v10, 2 }
 0x31a   :  { %v8588_v63 = vpop.eup %7113  ;;  %v2745_v58 = vsel %vm2259_vm1, %v8584_v2, 0.0  ;;  %2109 = vmax.xlane.f32.xlu1 %v2108_v19  ;;  %v2734_v29 = vrot.slane %v2733_v15, 1  ;;  %v2740_v50 = vadd.f32 %v2739_v0, %v2738_v18 }
 0x31b   :  { %v7116_v46 = vpop.eup %7115  ;;  %v2746_v48 = vsel %vm2259_vm1, %v8588_v63, 0.0  ;;  %v2562_v61 = vsub.f32 %v8511_v40, %v2531_v56  ;;  %v2563_v7 = vsub.f32 %v8505_v57, %v2531_v56  ;;  %v2724_v22 = vadd.f32 %v2723_v55, %v2722_v10 }
 0x31c   :  { %v2747_v42 = vadd.f32 %v2746_v48, %v2745_v58  ;;  %v2797_v14 = vmul.f32 %v7116_v46, %v8532_v32  ;;  %v2735_v53 = vadd.f32 %v2734_v29, %v2733_v15  ;;  %v2741_v9 = vrot.slane %v2740_v50, 2 }
 0x31d   :  { %v2624_v23 = vmul.f32 1.442695, %v2562_v61  ;;  %v2626_v1 = vmul.f32 1.442695, %v2563_v7  ;;  %v2725_v17 = vrot.slane %v2724_v22, 1 }
 0x31e   :  { %v6563_v13 = vpop.f32.mrb[36].mxu1  ;;  %v2813_v26 = vsub.f32 2.0, %v2797_v14  ;;  %7123 = vrcp.f32 %v2735_v53  ;;  %v2748_v18 = vrot.slane %v2747_v42, 4  ;;  %v2742_v59 = vadd.f32 %v2741_v9, %v2740_v50 }
 0x31f   :  { %7125 = vpow2.f32 %v2624_v23  ;;  %v8598_v27 = vadd.f32 %v8574_v16, %v6563_v13  ;;  %v8600_v40 = vpop.f32.mrb[37].mxu1  ;;  %v2726_v57 = vadd.f32 %v2725_v17, %v2724_v22 }
 0x320   :  { %7127 = vpow2.f32 %v2626_v1  ;;  %v2829_v10 = vmul.f32 %v7116_v46, %v2813_v26  ;;  %v2749_v32 = vadd.f32 %v2748_v18, %v2747_v42  ;;  %v2743_v56 = vrot.slane %v2742_v59, 1 }
 0x321   :  { %v8602_v15 = vpop.eup %7117  ;;  %v2114_v0 = vsel %vm2098_vm2, %v8598_v27, -inf  ;;  %7129 = vrcp.f32 %v2726_v57 }
 0x322   :  { %v8606_v19 = vpop.eup %7119  ;;  %v2754_v55 = vsel %vm2259_vm1, %v8602_v15, 0.0  ;;  %2115 = vmax.xlane.f32.xlu1 %v2114_v0  ;;  %v8611_v58 = vmul.f32 %v8437_v45, %v2829_v10  ;;  %v8614_v29 = vmul.f32 %v8446_v20, %v2829_v10  ;;  %v2750_v48 = vrot.slane %v2749_v32, 2 }
 0x323   :  { %v7122_v50 = vpop.eup %7121  ;;  %v2755_v46 = vsel %vm2259_vm1, %v8606_v19, 0.0  ;;  %v2744_v61 = vadd.f32 %v2743_v56, %v2742_v59 }
 0x324   :  { %v2756_v7 = vadd.f32 %v2755_v46, %v2754_v55  ;;  %v2796_v22 = vmul.f32 %v7122_v50, %v2708_v51  ;;  %v2751_v42 = vadd.f32 %v2750_v48, %v2749_v32 }
 0x325   :  { %7131 = vrcp.f32 %v2744_v61 }
 0x326   :  { %v8618_v14 = vpop.f32.mrb[38].mxu1  ;;  %v2812_v9 = vsub.f32 2.0, %v2796_v22  ;;  %v2757_v23 = vrot.slane %v2756_v7, 4  ;;  %v2752_v45 = vrot.slane %v2751_v42, 1 }
 0x327   :  { %v8620_v1 = vpop.f32.mrb[39].mxu1 }
 0x328   :  { %v7124_v17 = vpop.eup %7123  ;;  %v2828_v20 = vmul.f32 %v7122_v50, %v2812_v9  ;;  %v2758_v13 = vadd.f32 %v2757_v23, %v2756_v7  ;;  %v2753_v10 = vadd.f32 %v2752_v45, %v2751_v42 }
 0x329   :  { %v7126_v26 = vpop.eup %7125  ;;  %v2799_v18 = vmul.f32 %v7124_v17, %v2735_v53 }
 0x32a   :  { %v7128_v0 = vpop.eup %7127  ;;  %v2763_v59 = vsel %vm2259_vm1, %v7126_v26, 0.0  ;;  %v8624_v51 = vmul.f32 %v8408_v60, %v2828_v20  ;;  %v8627_v32 = vmul.f32 %v8416_v35, %v2828_v20  ;;  %v2759_v56 = vrot.slane %v2758_v13, 2 }
 0x32b   :  { %v7130_v55 = vpop.eup %7129  ;;  %v2764_v46 = vsel %vm2259_vm1, %v7128_v0, 0.0  ;;  %v2815_v48 = vsub.f32 2.0, %v2799_v18  ;;  %7133 = vrcp.f32 %v2753_v10 }
 0x32c   :  { %9197 = vst [vmem:[#allocation13_spill] sm:$0xff] %v8624_v51  ;;  %9198 = vst [vmem:[#allocation14_spill] sm:$0xff] %v8627_v32  ;;  %v2765_v50 = vadd.f32 %v2764_v46, %v2763_v59  ;;  %v2798_v7 = vmul.f32 %v7130_v55, %v2726_v57  ;;  %v2760_v22 = vadd.f32 %v2759_v56, %v2758_v13 }
 0x32d   :  { %v2831_v53 = vmul.f32 %v7124_v17, %v2815_v48 }
 0x32e   :  { %v6569_v42 = vpop.f32.mrb[40].mxu1  ;;  %v2766_v9 = vrot.slane %v2765_v50, 4  ;;  %v2814_v23 = vsub.f32 2.0, %v2798_v7  ;;  %v2761_v45 = vrot.slane %v2760_v22, 1 }
 0x32f   :  { %v7132_v52 = vpop.eup %7131  ;;  %v8631_v60 = vmul.f32 %v8508_v8, %v2831_v53  ;;  %v8634_v35 = vmul.f32 %v8513_v36, %v2831_v53  ;;  %v2059_v59 = vpop.f32.mrb[41].mxu1 }
 0x330   :  { %v2767_v20 = vadd.f32 %v2766_v9, %v2765_v50  ;;  %v2830_v30 = vmul.f32 %v7130_v55, %v2814_v23  ;;  %v2800_v32 = vmul.f32 %v7132_v52, %v2744_v61  ;;  %v2762_v18 = vadd.f32 %v2761_v45, %v2760_v22 }
 0x332   :  { %v2768_v51 = vrot.slane %v2767_v20, 2  ;;  %v8637_v57 = vmul.f32 %v8467_v25, %v2830_v30  ;;  %v8640_v17 = vmul.f32 %v8473_v43, %v2830_v30  ;;  %v2816_v13 = vsub.f32 2.0, %v2800_v32 }
 0x333   :  { %7135 = vrcp.f32 %v2762_v18 }
 0x334   :  { %v2769_v56 = vadd.f32 %v2768_v51, %v2767_v20  ;;  %v2832_v8 = vmul.f32 %v7132_v52, %v2816_v13 }
 0x335   :  { %v7134_v46 = vpop.eup %7133 }
 0x336   :  { %v2801_v48 = vmul.f32 %v7134_v46, %v2753_v10  ;;  %v2770_v36 = vrot.slane %v2769_v56, 1  ;;  %v8643_v50 = vmul.f32 %v8542_v44, %v2832_v8  ;;  %v8646_v61 = vmul.f32 %v8552_v5, %v2832_v8 }
 0x338   :  { %v2817_v55 = vsub.f32 2.0, %v2801_v48  ;;  %v2771_v25 = vadd.f32 %v2770_v36, %v2769_v56 }
 0x33a   :  { %v2833_v7 = vmul.f32 %v7134_v46, %v2817_v55  ;;  %7137 = vrcp.f32 %v2771_v25 }
 0x33c   :  { %v8649_v43 = vmul.f32 %v8584_v2, %v2833_v7  ;;  %v8652_v30 = vmul.f32 %v8588_v63, %v2833_v7  ;;  %v7227_v7 = vld [vmem:[#allocation2] sm:$0xff] }
 0x33d   :  { %v7136_v52 = vpop.eup %7135 }
 0x33e   :  { %v2802_v51 = vmul.f32 %v7136_v52, %v2762_v18  ;;  %v8700_v18 = vadd.f32 %v8574_v16, %v2059_v59 }
 0x340   :  { %v2818_v10 = vsub.f32 2.0, %v2802_v51 }
 0x342   :  { %2868 = vxpose.xlu0.b32.start [1/2] (short) (narrow) %v8299_v28, 8  ;;  %v2834_v44 = vmul.f32 %v7136_v52, %v2818_v10  ;;  %v6572_v28 = vpop.f32.mrb[42].mxu1  ;;  %v7228_v52 = vld [vmem:[#allocation2 + $0x8] sm:$0xff]  ;;  %v7335_v10 = vmov 0.0|0.0  }
 0x343   :  { %v2069_v45 = vpop.f32.mrb[43].mxu1  ;;  %v6788_v51 = vpack.c.bf16 %v7228_v52, %v7227_v7  ;;  %6787 = vmatprep.subr.bf16.mxu0 %v7335_v10  ;;  %6790 = vmatprep.subr.bf16.mxu1 %v7335_v10 }
 0x344   :  { %v7138_v32 = vpop.eup %7137  ;;  %v8656_v5 = vmul.f32 %v8602_v15, %v2834_v44  ;;  %v8659_v22 = vmul.f32 %v8606_v19, %v2834_v44  ;;  %v8670_v19 = vadd.f32 %v8574_v16, %v8579_v38  ;;  %v8723_v56 = vadd.f32 %v8574_v16, %v2069_v45  ;;  %v7232_v45 = vld [vmem:[#allocation2 + $0x20] sm:$0xff] }
 0x345   :  { %v2803_v53 = vmul.f32 %v7138_v32, %v2771_v25  ;;  %v7337_v44 = vmov 0.0   ;;  %6789 = vmatpush3.bf16.msra.mxu0 %v6788_v51 }
 0x346   :  { %2869 = vxpose.xlu0.b32.end [2/2] (short) (narrow) %v8302_v62, 8  ;;  %v8674_v62 = vadd.f32 %v8574_v16, %v8600_v40  ;;  %v2129_v46 = vsel %vm2098_vm2, %v8723_v56, -inf  ;;  %6583 = vmatprep.mubr.msk.f32.mxu0 %vm7336_vm3, %v7337_v44 }
 0x347   :  { %v2819_v2 = vsub.f32 2.0, %v2803_v53  ;;  %v7230_v53 = vld [vmem:[#allocation2 + $0x10] sm:$0xff]  ;;  %6793 = vmatprep.subr.bf16.mxu0 %v7335_v10  ;;  %6590 = vmatprep.mubr.msk.f32.mxu1 %vm7336_vm3, %v7337_v44 }
 0x349   :  { %v2835_v9 = vmul.f32 %v7138_v32, %v2819_v2  ;;  %v7229_v32 = vld [vmem:[#allocation2 + $0x18] sm:$0xff] }
 0x34a   :  { %v6575_v15 = vpop.f32.mrb[44].mxu1  ;;  %v6791_v2 = vpack.c.bf16 %v7229_v32, %v7230_v53 }
 0x34b   :  { %v8662_v63 = vmul.f32 %v7126_v26, %v2835_v9  ;;  %v8664_v23 = vmul.f32 %v7128_v0, %v2835_v9  ;;  %v2105_v26 = vsel %vm2098_vm2, %v8670_v19, -inf  ;;  %v8685_v0 = vadd.f32 %v8574_v16, %v6569_v42  ;;  %v2079_v20 = vpop.f32.mrb[45].mxu1 }
 0x34c   :  { %v8697_v42 = vadd.f32 %v8574_v16, %v8620_v1  ;;  %v8726_v8 = vadd.f32 %v8574_v16, %v2079_v20  ;;  %6792 = vmatpush3.bf16.msra.mxu1 %v6791_v2 }
 0x34d   :  { %v2126_v40 = vsel %vm2098_vm2, %v8685_v0, -inf  ;;  %6796 = vmatprep.subr.bf16.mxu1 %v7335_v10 }
 0x34e   :  { %v2117_v13 = vsel %vm2098_vm2, %v8697_v42, -inf  ;;  %v2135_v48 = vsel %vm2098_vm2, %v8726_v8, -inf }
 0x355   :  { %2974 = vxpose.xlu1.b32.start [1/2] (short) (narrow) %v8334_v33, 8  ;;  %v2111_v33 = vsel %vm2098_vm2, %v8674_v62, -inf }
 0x359   :  { %2975 = vxpose.xlu1.b32.end [2/2] (short) (narrow) %v8355_v24, 8  ;;  %v8682_v24 = vadd.f32 %v8574_v16, %v8618_v14 }
 0x35b   :  { %v2120_v38 = vsel %vm2098_vm2, %v8682_v24, -inf }
 0x373   :  { %2106 = vmax.xlane.f32.xlu0 %v2105_v26 }
 0x377   :  { %2112 = vmax.xlane.f32.xlu0 %v2111_v33 }
 0x380   :  { %2121 = vmax.xlane.f32.xlu1 %v2120_v38 }
 0x384   :  { %2127 = vmax.xlane.f32.xlu1 %v2126_v40 }
 0x3a0   :  { %v8739_v36 = vpop.xlane.xlu1 %2103 }
 0x3a4   :  { %3079 = vxpose.xlu0.b32.start [1/2] (short) (narrow) %v8394_v4, 8  ;;  %v2123_v4 = vsel %vm2098_vm2, %v8700_v18, -inf }
 0x3a7   :  { %v8741_v55 = vpop.xlane.xlu1 %2109 }
 0x3a8   :  { %3080 = vxpose.xlu0.b32.end [2/2] (short) (narrow) %v8397_v11, 8  ;;  %v8707_v11 = vadd.f32 %v8574_v16, %v6572_v28  ;;  %v7231_v28 = vld [vmem:[#allocation2 + $0x28] sm:$0xff]  ;;  %v2150_v7 = vsub.f32 %v8577_v3, %v8741_v55 }
 0x3aa   :  { %v2169_v52 = vmul.f32 1.442695, %v2150_v7 }
 0x3af   :  { %v8748_v9 = vpop.xlane.xlu1 %2115 }
 0x3b0   :  { %v2152_v32 = vsub.f32 %v8598_v27, %v8748_v9 }
 0x3b2   :  { %v2173_v2 = vmul.f32 1.442695, %v2152_v32  ;;  %v7251_v32 = vld [vmem:[#allocation2 + $0xf8] sm:$0xff] }
 0x3b7   :  { %3184 = vxpose.xlu1.b32.start [1/2] (short) (narrow) %v8432_v12, 8  ;;  %v8710_v12 = vadd.f32 %v8574_v16, %v6575_v15  ;;  %v6794_v15 = vpack.c.bf16 %v7231_v28, %v7232_v45 }
 0x3b9   :  { %v2138_v1 = vsel %vm2098_vm2, %v8710_v12, -inf }
 0x3bb   :  { %3185 = vxpose.xlu1.b32.end [2/2] (short) (narrow) %v8435_v39, 8  ;;  %v2132_v39 = vsel %vm2098_vm2, %v8707_v11, -inf }
 0x3c6   :  { %v6578_v14 = vpop.f32.mrb[46].mxu1 }
 0x3c7   :  { %v8716_v59 = vpop.f32.mrb[47].mxu1 }
 0x3d5   :  { %2118 = vmax.xlane.f32.xlu0 %v2117_v13  ;;  %v2990_v33 = vpop.trf.xlu1  ;;  %v7234_v13 = vld [vmem:[#allocation2 + $0x30] sm:$0xff] }
 0x3d6   :  { %6591 = vmatmul.mubr.msk.f32.vlgmr.msra.gmra.mrb[48].mxu1 %vm2900_vm4, %v2990_v33 }
 0x3d7   :  { %6604 = vmatprep.mubr.msk.f32.mxu1 %vm7336_vm3, %v7337_v44 }
 0x3d9   :  { %2124 = vmax.xlane.f32.xlu0 %v2123_v4  ;;  %v7235_v4 = vld [vmem:[#allocation2 + $0x48] sm:$0xff] }
 0x3e2   :  { %2133 = vmax.xlane.f32.xlu1 %v2132_v39 }
 0x3e6   :  { %2139 = vmax.xlane.f32.xlu1 %v2138_v1  ;;  %v7238_v1 = vld [vmem:[#allocation2 + $0x50] sm:$0xff] }
 0x406   :  { %3289 = vxpose.xlu0.b32.start [1/2] (short) (narrow) %v8487_v41, 8  ;;  %v8733_v41 = vadd.f32 %v8574_v16, %v6578_v14 }
 0x40a   :  { %3290 = vxpose.xlu0.b32.end [2/2] (short) (narrow) %v8496_v37, 8  ;;  %v2144_v37 = vsel %vm2098_vm2, %v8733_v41, -inf }
 0x419   :  { %3394 = vxpose.xlu1.b32.start [1/2] (short) (narrow) %v8527_v21, 8  ;;  %v8737_v21 = vpop.xlane.xlu0 %2100 }
 0x41d   :  { %3395 = vxpose.xlu1.b32.end [2/2] (short) (narrow) %v8530_v47, 8  ;;  %v2884_v47 = vpop.trf.xlu0 }
 0x41e   :  { %6584 = vmatmul.mubr.msk.f32.vlgmr.msra.gmra.mrb[48].mxu0 %vm2900_vm4, %v2884_v47 }
 0x41f   :  { %6795 = vmatpush3.bf16.msra.mxu0 %v6794_v15  ;;  %6597 = vmatprep.mubr.msk.f32.mxu0 %vm7336_vm3, %v7337_v44  ;;  %v9199_v15 = vld [vmem:[#allocation13_spill] sm:$0xff] }
 0x420   :  { %6799 = vmatprep.subr.bf16.mxu0 %v7335_v10 }
 0x421   :  { %v8743_v25 = vpop.xlane.xlu0 %2106 }
 0x422   :  { %v2149_v51 = vsub.f32 %v8670_v19, %v8743_v25 }
 0x424   :  { %v2167_v53 = vmul.f32 1.442695, %v2149_v51 }
 0x425   :  { %v8752_v26 = vpop.xlane.xlu0 %2112 }
 0x429   :  { %v3095_v38 = vpop.trf.xlu0 }
 0x42a   :  { %6598 = vmatmul.mubr.msk.f32.vlgmr.msra.gmra.mrb[50].mxu0 %vm2900_vm4, %v3095_v38 }
 0x42b   :  { %6611 = vmatprep.mubr.msk.f32.mxu0 %vm7336_vm3, %v7337_v44 }
 0x437   :  { %2130 = vmax.xlane.f32.xlu0 %v2129_v46  ;;  %v7239_v46 = vld [vmem:[#allocation2 + $0x68] sm:$0xff] }
 0x43b   :  { %2136 = vmax.xlane.f32.xlu0 %v2135_v48  ;;  %v7240_v48 = vld [vmem:[#allocation2 + $0x60] sm:$0xff] }
 0x444   :  { %2145 = vmax.xlane.f32.xlu1 %v2144_v37  ;;  %v6806_v37 = vpack.c.bf16 %v7239_v46, %v7240_v48  ;;  %v7248_v46 = vld [vmem:[#allocation2 + $0xb0] sm:$0xff] }
 0x462   :  { %v8774_v40 = vpop.xlane.xlu0 %2118 }
 0x468   :  { %3499 = vxpose.xlu0.b32.start [1/2] (short) (narrow) %v8547_v49, 8  ;;  %v2122_v49 = vpop.xlane.xlu1 %2121 }
 0x469   :  { %v2154_v28 = vsub.f32 %v8682_v24, %v2122_v49 }
 0x46c   :  { %3500 = vxpose.xlu0.b32.end [2/2] (short) (narrow) %v8550_v31, 8  ;;  %v2128_v20 = vpop.xlane.xlu1 %2127  ;;  %v8777_v31 = vpop.xlane.xlu0 %2124 }
 0x46d   :  { %v2156_v3 = vsub.f32 %v8685_v0, %v2128_v20 }
 0x46f   :  { %v2181_v27 = vmul.f32 1.442695, %v2156_v3 }
 0x470   :  { %v3200_v14 = vpop.trf.xlu1 }
 0x477   :  { %3604 = vxpose.xlu1.b32.start [1/2] (short) (narrow) %v8563_v6, 8  ;;  %v7233_v6 = vld [vmem:[#allocation2 + $0x38] sm:$0xff] }
 0x47b   :  { %3605 = vxpose.xlu1.b32.end [2/2] (short) (narrow) %v8566_v54, 8  ;;  %v6797_v54 = vpack.c.bf16 %v7233_v6, %v7234_v13  ;;  %v7241_v13 = vld [vmem:[#allocation2 + $0x78] sm:$0xff] }
 0x47d   :  { %6798 = vmatpush3.bf16.msra.mxu1 %v6797_v54  ;;  %v7242_v54 = vld [vmem:[#allocation2 + $0x70] sm:$0xff] }
 0x47e   :  { %6802 = vmatprep.subr.bf16.mxu1 %v7335_v10 }
 0x47f   :  { %3814 = vxpose.xlu1.b32.start [1/2] (short) (narrow) %v8611_v58, 8  ;;  %v7236_v58 = vld [vmem:[#allocation2 + $0x40] sm:$0xff] }
 0x480   :  { %v6800_v39 = vpack.c.bf16 %v7235_v4, %v7236_v58  ;;  %6605 = vmatmul.mubr.msk.f32.vlgmr.msra.gmra.mrb[50].mxu1 %vm2900_vm4, %v3200_v14  ;;  %v6809_v4 = vpack.c.bf16 %v7241_v13, %v7242_v54  ;;  %v7243_v58 = vld [vmem:[#allocation2 + $0x88] sm:$0xff] }
 0x481   :  { %6618 = vmatprep.mubr.msk.f32.mxu1 %vm7336_vm3, %v7337_v44 }
 0x482   :  { %6801 = vmatpush3.bf16.msra.mxu0 %v6800_v39  ;;  %v7244_v39 = vld [vmem:[#allocation2 + $0x80] sm:$0xff] }
 0x483   :  { %3815 = vxpose.xlu1.b32.end [2/2] (short) (narrow) %v8614_v29, 8  ;;  %6805 = vmatprep.subr.bf16.mxu0 %v7335_v10 }
 0x486   :  { %v3305_v29 = vpop.trf.xlu0 }
 0x487   :  { %4024 = vxpose.xlu1.b32.start [1/2] (short) (narrow) %v8631_v60, 8  ;;  %v8785_v60 = vadd.f32 %v8574_v16, %v8716_v59  ;;  %6612 = vmatmul.mubr.msk.f32.vlgmr.msra.gmra.mrb[52].mxu0 %vm2900_vm4, %v3305_v29  ;;  %v7237_v16 = vld [vmem:[#allocation2 + $0x58] sm:$0xff]  ;;  %v6812_v29 = vpack.c.bf16 %v7243_v58, %v7244_v39 }
 0x488   :  { %6625 = vmatprep.mubr.msk.f32.mxu0 %vm7336_vm3, %v7337_v44  ;;  %v6803_v59 = vpack.c.bf16 %v7237_v16, %v7238_v1  ;;  %6807 = vmatpush3.bf16.msra.mxu0 %v6806_v37  ;;  %v2151_v1 = vsub.f32 %v8674_v62, %v8752_v26  ;;  %v2155_v62 = vsub.f32 %v8700_v18, %v8777_v31  ;;  %v7249_v26 = vld [vmem:[#allocation2 + $0xd8] sm:$0xff] }
 0x489   :  { %6811 = vmatprep.subr.bf16.mxu0 %v7335_v10 }
 0x48a   :  { %6804 = vmatpush3.bf16.msra.mxu1 %v6803_v59  ;;  %v7247_v59 = vld [vmem:[#allocation2 + $0xb8] sm:$0xff]  ;;  %v2179_v51 = vmul.f32 1.442695, %v2155_v62 }
 0x48b   :  { %4025 = vxpose.xlu1.b32.end [2/2] (short) (narrow) %v8634_v35, 8  ;;  %v2134_v35 = vpop.xlane.xlu1 %2133  ;;  %6808 = vmatprep.subr.bf16.mxu1 %v7335_v10  ;;  %v6821_v48 = vpack.c.bf16 %v7247_v59, %v7248_v46 }
 0x48f   :  { %4234 = vxpose.xlu1.b32.start [1/2] (short) (narrow) %v8649_v43, 8  ;;  %v2141_v43 = vsel %vm2098_vm2, %v8785_v60, -inf }
 0x493   :  { %4235 = vxpose.xlu1.b32.end [2/2] (short) (narrow) %v8652_v30, 8  ;;  %v2140_v30 = vpop.xlane.xlu1 %2139 }
 0x494   :  { %v2160_v25 = vsub.f32 %v8710_v12, %v2140_v30  ;;  %v9201_v30 = vld [vmem:[#allocation12_spill] sm:$0xff] }
 0x496   :  { %v2189_v0 = vmul.f32 1.442695, %v2160_v25 }
 0x497   :  { %4444 = vxpose.xlu1.b32.start [1/2] (short) (narrow) %v8662_v63, 8 }
 0x499   :  { %2142 = vmax.xlane.f32.xlu0 %v2141_v43  ;;  %v3410_v63 = vpop.trf.xlu1 }
 0x49a   :  { %6619 = vmatmul.mubr.msk.f32.vlgmr.msra.gmra.mrb[52].mxu1 %vm2900_vm4, %v3410_v63  ;;  %v2171_v63 = vmul.f32 1.442695, %v2151_v1 }
 0x49b   :  { %4445 = vxpose.xlu1.b32.end [2/2] (short) (narrow) %v8664_v23, 8  ;;  %6632 = vmatprep.mubr.msk.f32.mxu1 %vm7336_vm3, %v7337_v44  ;;  %v2148_v23 = vsub.f32 %v8535_v34, %v8739_v36  ;;  %v2177_v34 = vmul.f32 1.442695, %v2154_v28  ;;  %v2158_v36 = vsub.f32 %v8707_v11, %v2134_v35  ;;  %v9200_v11 = vld [vmem:[#allocation14_spill] sm:$0xff] }
 0x49c   :  { %6810 = vmatpush3.bf16.msra.mxu1 %v6809_v4 }
 0x49d   :  { %v2165_v47 = vmul.f32 1.442695, %v2148_v23  ;;  %v2185_v55 = vmul.f32 1.442695, %v2158_v36  ;;  %6814 = vmatprep.subr.bf16.mxu1 %v7335_v10 }
 0x49f   :  { %7139 = vpow2.f32 %v2165_v47  ;;  %v7250_v47 = vld [vmem:[#allocation2 + $0xd0] sm:$0xff] }
 0x4a0   :  { %7141 = vpow2.f32 %v2169_v52  ;;  %v6827_v7 = vpack.c.bf16 %v7249_v26, %v7250_v47 }
 0x4a1   :  { %7143 = vpow2.f32 %v2167_v53  ;;  %v7252_v53 = vld [vmem:[#allocation2 + $0xf0] sm:$0xff] }
 0x4a2   :  { %7145 = vpow2.f32 %v2173_v2 }
 0x4a3   :  { %7147 = vpow2.f32 %v2177_v34 }
 0x4a4   :  { %7149 = vpow2.f32 %v2181_v27 }
 0x4a5   :  { %7151 = vpow2.f32 %v2185_v55 }
 0x4a6   :  { %7153 = vpow2.f32 %v2189_v0 }
 0x4a9   :  { %v8811_v45 = vpop.eup %7139  ;;  %v3075_v47 = vpop.f32.mrb[48].mxu1 }
 0x4aa   :  { %v8816_v19 = vpop.eup %7141 }
 0x4ab   :  { %v8821_v24 = vpop.eup %7143 }
 0x4ac   :  { %v8826_v9 = vpop.eup %7145 }
 0x4ad   :  { %v8831_v33 = vpop.eup %7147 }
 0x4ae   :  { %v8836_v38 = vpop.eup %7149 }
 0x4af   :  { %v8841_v12 = vpop.eup %7151 }
 0x4b0   :  { %v8847_v14 = vpop.eup %7153 }
 0x4b9   :  { %2213 = vrot.lane.b32.xlu1 %v8811_v45, %s7338_s6 }
 0x4bd   :  { %2217 = vrot.lane.b32.xlu1 %v8816_v19, %s7338_s6 }
 0x4c1   :  { %2215 = vrot.lane.b32.xlu1 %v8821_v24, %s7338_s6 }
 0x4c5   :  { %2221 = vrot.lane.b32.xlu1 %v8826_v9, %s7338_s6 }
 0x4c6   :  { %3709 = vxpose.xlu0.b32.start [1/2] (short) (narrow) %v9199_v15, 8 }
 0x4c9   :  { %2225 = vrot.lane.b32.xlu1 %v8831_v33, %s7338_s6 }
 0x4ca   :  { %3710 = vxpose.xlu0.b32.end [2/2] (short) (narrow) %v9200_v11, 8 }
 0x4cd   :  { %2229 = vrot.lane.b32.xlu1 %v8836_v38, %s7338_s6 }
 0x4ce   :  { %3919 = vxpose.xlu0.b32.start [1/2] (short) (narrow) %v8637_v57, 8  ;;  %v2131_v57 = vpop.xlane.xlu0 %2130 }
 0x4d1   :  { %v2146_v49 = vpop.xlane.xlu1 %2145  ;;  %2233 = vrot.lane.b32.xlu1 %v8841_v12, %s7338_s6 }
 0x4d2   :  { %3920 = vxpose.xlu0.b32.end [2/2] (short) (narrow) %v8640_v17, 8  ;;  %v2162_v20 = vsub.f32 %v8733_v41, %v2146_v49  ;;  %v2137_v41 = vpop.xlane.xlu0 %2136 }
 0x4d3   :  { %v2159_v31 = vsub.f32 %v8726_v8, %v2137_v41 }
 0x4d4   :  { %v2193_v6 = vmul.f32 1.442695, %v2162_v20 }
 0x4d5   :  { %2237 = vrot.lane.b32.xlu1 %v8847_v14, %s7338_s6  ;;  %v2187_v34 = vmul.f32 1.442695, %v2159_v31 }
 0x4d6   :  { %7155 = vpow2.f32 %v2193_v6  ;;  %4129 = vxpose.xlu0.b32.start [1/2] (short) (narrow) %v8643_v50, 8 }
 0x4da   :  { %4130 = vxpose.xlu0.b32.end [2/2] (short) (narrow) %v8646_v61, 8  ;;  %v7245_v61 = vld [vmem:[#allocation2 + $0x98] sm:$0xff] }
 0x4de   :  { %4339 = vxpose.xlu0.b32.start [1/2] (short) (narrow) %v8656_v5, 8  ;;  %v7246_v5 = vld [vmem:[#allocation2 + $0x90] sm:$0xff] }
 0x4df   :  { %v6815_v35 = vpack.c.bf16 %v7245_v61, %v7246_v5  ;;  %v7254_v61 = vld [vmem:[#allocation2 + $0xa0] sm:$0xff] }
 0x4e0   :  { %v8855_v17 = vpop.eup %7155 }
 0x4e1   :  { %2241 = vrot.lane.b32.xlu1 %v8855_v17, %s7338_s6 }
 0x4e2   :  { %4340 = vxpose.xlu0.b32.end [2/2] (short) (narrow) %v8659_v22, 8  ;;  %v2147_v22 = vsub.f32 %v9201_v30, %v8737_v21  ;;  %v2153_v21 = vsub.f32 %v8697_v42, %v8774_v40  ;;  %v2157_v42 = vsub.f32 %v8723_v56, %v2131_v57  ;;  %v6833_v56 = vpack.c.bf16 %v7251_v32, %v7252_v53 }
 0x4e4   :  { %v2163_v16 = vmul.f32 1.442695, %v2147_v22  ;;  %v2175_v23 = vmul.f32 1.442695, %v2153_v21  ;;  %v2183_v18 = vmul.f32 1.442695, %v2157_v42 }
 0x4e5   :  { %v7255_v22 = vld [vmem:[#allocation2 + $0xc8] sm:$0xff] }
 0x4e6   :  { %7157 = vpow2.f32 %v2163_v16  ;;  %v7256_v16 = vld [vmem:[#allocation2 + $0xc0] sm:$0xff] }
 0x4e7   :  { %7159 = vpow2.f32 %v2171_v63  ;;  %v6824_v1 = vpack.c.bf16 %v7255_v22, %v7256_v16  ;;  %v7258_v63 = vld [vmem:[#allocation2 + $0xe0] sm:$0xff] }
 0x4e8   :  { %v3515_v50 = vpop.trf.xlu0  ;;  %7161 = vpow2.f32 %v2175_v23 }
 0x4e9   :  { %6626 = vmatmul.mubr.msk.f32.vlgmr.msra.gmra.mrb[54].mxu0 %vm2900_vm4, %v3515_v50  ;;  %7163 = vpow2.f32 %v2179_v51  ;;  %v7253_v50 = vld [vmem:[#allocation2 + $0xa8] sm:$0xff] }
 0x4ea   :  { %6813 = vmatpush3.bf16.msra.mxu0 %v6812_v29  ;;  %6639 = vmatprep.mubr.msk.f32.mxu0 %vm7336_vm3, %v7337_v44  ;;  %7165 = vpow2.f32 %v2183_v18  ;;  %v6818_v5 = vpack.c.bf16 %v7253_v50, %v7254_v61 }
 0x4eb   :  { %6817 = vmatprep.subr.bf16.mxu0 %v7335_v10  ;;  %7167 = vpow2.f32 %v2187_v34 }
 0x4f0   :  { %v8884_v40 = vpop.eup %7157 }
 0x4f1   :  { %v8890_v2 = vpop.eup %7159 }
 0x4f2   :  { %v8897_v3 = vpop.eup %7161 }
 0x4f3   :  { %v8902_v8 = vpop.eup %7163 }
 0x4f4   :  { %v8909_v36 = vpop.eup %7165 }
 0x4f5   :  { %v8913_v55 = vpop.eup %7167 }
 0x4f7   :  { %v3620_v43 = vpop.trf.xlu1 }
 0x4f8   :  { %6633 = vmatmul.mubr.msk.f32.vlgmr.msra.gmra.mrb[54].mxu1 %vm2900_vm4, %v3620_v43 }
 0x4f9   :  { %6816 = vmatpush3.bf16.msra.mxu1 %v6815_v35  ;;  %6646 = vmatprep.mubr.msk.f32.mxu1 %vm7336_vm3, %v7337_v44 }
 0x4fa   :  { %6820 = vmatprep.subr.bf16.mxu1 %v7335_v10 }
 0x4ff   :  { %v3830_v37 = vpop.trf.xlu1 }
 0x500   :  { %6647 = vmatmul.mubr.msk.f32.vlgmr.msra.gmra.mrb[56].mxu1 %vm2900_vm4, %v3830_v37  ;;  %v7257_v37 = vld [vmem:[#allocation2 + $0xe8] sm:$0xff] }
 0x501   :  { %6822 = vmatpush3.bf16.msra.mxu1 %v6821_v48  ;;  %6660 = vmatprep.mubr.msk.f32.mxu1 %vm7336_vm3, %v7337_v44  ;;  %v6830_v21 = vpack.c.bf16 %v7257_v37, %v7258_v63 }
 0x502   :  { %6826 = vmatprep.subr.bf16.mxu1 %v7335_v10 }
 0x507   :  { %v4040_v52 = vpop.trf.xlu1 }
 0x508   :  { %6661 = vmatmul.mubr.msk.f32.vlgmr.msra.gmra.mrb[58].mxu1 %vm2900_vm4, %v4040_v52  ;;  %v6592_v52 = vpop.f32.mrb[49].mxu1 }
 0x509   :  { %6828 = vmatpush3.bf16.msra.mxu1 %v6827_v7  ;;  %6674 = vmatprep.mubr.msk.f32.mxu1 %vm7336_vm3, %v7337_v44 }
 0x50a   :  { %6832 = vmatprep.subr.bf16.mxu1 %v7335_v10 }
 0x50b   :  { %2211 = vrot.lane.b32.xlu0 %v8884_v40, %s7338_s6 }
 0x50f   :  { %2219 = vrot.lane.b32.xlu0 %v8890_v2, %s7338_s6  ;;  %v4250_v28 = vpop.trf.xlu1 }
 0x510   :  { %6675 = vmatmul.mubr.msk.f32.vlgmr.msra.gmra.mrb[60].mxu1 %vm2900_vm4, %v4250_v28 }
 0x511   :  { %6834 = vmatpush3.bf16.msra.mxu1 %v6833_v56  ;;  %6688 = vmatprep.mubr.msk.f32.mxu1 %vm7336_vm3, %v7337_v44 }
 0x512   :  { %6696 = vmatprep.subr.mxu1 %v7337_v44 }
 0x513   :  { %2223 = vrot.lane.b32.xlu0 %v8897_v3, %s7338_s6 }
 0x517   :  { %2227 = vrot.lane.b32.xlu0 %v8902_v8, %s7338_s6  ;;  %v4460_v27 = vpop.trf.xlu1 }
 0x518   :  { %6689 = vmatmul.mubr.msk.f32.vlgmr.msra.gmra.mrb[62].mxu1 %vm2900_vm4, %v4460_v27 }
 0x519   :  { %6698 = vmatprep.mubr.msk.f32.mxu1 %vm7336_vm3, %v7337_v44  ;;  %6697 = vmatpush3.msra.mxu1 %v3075_v47 }
 0x51a   :  { %6706 = vmatprep.subr.mxu1 %v7337_v44 }
 0x51b   :  { %2231 = vrot.lane.b32.xlu0 %v8909_v36, %s7338_s6 }
 0x51f   :  { %2235 = vrot.lane.b32.xlu0 %v8913_v55, %s7338_s6 }
 0x526   :  { %v2143_v25 = vpop.xlane.xlu0 %2142 }
 0x527   :  { %v2161_v0 = vsub.f32 %v8785_v60, %v2143_v25 }
 0x529   :  { %v2191_v15 = vmul.f32 1.442695, %v2161_v0 }
 0x52b   :  { %7169 = vpow2.f32 %v2191_v15  ;;  %v2214_v11 = vpop.permute.xlu1 %2213 }
 0x52c   :  { %v2263_v49 = vsel %vm2259_vm1, %v2214_v11, 0.0 }
 0x52d   :  { %2264 = vadd.xlane.f32.xlu1 %v2263_v49 }
 0x52f   :  { %v8919_v20 = vpop.permute.xlu1 %2217 }
 0x530   :  { %v2269_v25 = vsel %vm2259_vm1, %v8919_v20, 0.0 }
 0x533   :  { %v8921_v6 = vpop.permute.xlu1 %2215 }
 0x534   :  { %v2266_v15 = vsel %vm2259_vm1, %v8921_v6, 0.0 }
 0x535   :  { %v8923_v13 = vpop.eup %7169 }
 0x536   :  { %2239 = vrot.lane.b32.xlu0 %v8923_v13, %s7338_s6 }
 0x537   :  { %v2222_v54 = vpop.permute.xlu1 %2221 }
 0x538   :  { %v2275_v4 = vsel %vm2259_vm1, %v2222_v54, 0.0 }
 0x539   :  { %2276 = vadd.xlane.f32.xlu1 %v2275_v4 }
 0x53b   :  { %v2226_v60 = vpop.permute.xlu1 %2225 }
 0x53c   :  { %v2281_v57 = vsel %vm2259_vm1, %v2226_v60, 0.0 }
 0x53d   :  { %2282 = vadd.xlane.f32.xlu1 %v2281_v57 }
 0x53f   :  { %v2230_v41 = vpop.permute.xlu1 %2229 }
 0x540   :  { %v2287_v58 = vsel %vm2259_vm1, %v2230_v41, 0.0 }
 0x541   :  { %2288 = vadd.xlane.f32.xlu1 %v2287_v58 }
 0x543   :  { %v2234_v39 = vpop.permute.xlu1 %2233 }
 0x544   :  { %v2293_v29 = vsel %vm2259_vm1, %v2234_v39, 0.0 }
 0x545   :  { %2294 = vadd.xlane.f32.xlu1 %v2293_v29 }
 0x546   :  { %v3725_v35 = vpop.trf.xlu0 }
 0x547   :  { %v2238_v43 = vpop.permute.xlu1 %2237  ;;  %6640 = vmatmul.mubr.msk.f32.vlgmr.msra.gmra.mrb[56].mxu0 %vm2900_vm4, %v3725_v35 }
 0x548   :  { %v2299_v30 = vsel %vm2259_vm1, %v2238_v43, 0.0  ;;  %6819 = vmatpush3.bf16.msra.mxu0 %v6818_v5  ;;  %6653 = vmatprep.mubr.msk.f32.mxu0 %vm7336_vm3, %v7337_v44 }
 0x549   :  { %2300 = vadd.xlane.f32.xlu1 %v2299_v30  ;;  %6823 = vmatprep.subr.bf16.mxu0 %v7335_v10 }
 0x54e   :  { %v3935_v59 = vpop.trf.xlu0 }
 0x54f   :  { %6654 = vmatmul.mubr.msk.f32.vlgmr.msra.gmra.mrb[58].mxu0 %vm2900_vm4, %v3935_v59 }
 0x550   :  { %6825 = vmatpush3.bf16.msra.mxu0 %v6824_v1  ;;  %6667 = vmatprep.mubr.msk.f32.mxu0 %vm7336_vm3, %v7337_v44 }
 0x551   :  { %6829 = vmatprep.subr.bf16.mxu0 %v7335_v10  ;;  %v2970_v10 = vpop.f32.mrb[48].mxu0 }
 0x552   :  { %v6585_v26 = vpop.f32.mrb[49].mxu0 }
 0x553   :  { %v2242_v46 = vpop.permute.xlu1 %2241  ;;  %v8949_v7 = vpop.f32.mrb[50].mxu0 }
 0x554   :  { %v2305_v48 = vsel %vm2259_vm1, %v2242_v46, 0.0  ;;  %v6599_v51 = vpop.f32.mrb[51].mxu0  ;;  %v8952_v42 = vpop.f32.mrb[50].mxu1 }
 0x555   :  { %2306 = vadd.xlane.f32.xlu1 %v2305_v48  ;;  %v6606_v31 = vpop.f32.mrb[51].mxu1 }
 0x556   :  { %v4145_v23 = vpop.trf.xlu0 }
 0x557   :  { %6668 = vmatmul.mubr.msk.f32.vlgmr.msra.gmra.mrb[60].mxu0 %vm2900_vm4, %v4145_v23 }
 0x558   :  { %6831 = vmatpush3.bf16.msra.mxu0 %v6830_v21  ;;  %6681 = vmatprep.mubr.msk.f32.mxu0 %vm7336_vm3, %v7337_v44 }
 0x559   :  { %6691 = vmatprep.subr.mxu0 %v7337_v44 }
 0x55a   :  { %v8954_v18 = vpop.f32.mrb[52].mxu0 }
 0x55b   :  { %v6613_v32 = vpop.f32.mrb[53].mxu0 }
 0x55e   :  { %v4355_v62 = vpop.trf.xlu0 }
 0x55f   :  { %6682 = vmatmul.mubr.msk.f32.vlgmr.msra.gmra.mrb[62].mxu0 %vm2900_vm4, %v4355_v62 }
 0x560   :  { %6693 = vmatprep.mubr.msk.f32.mxu0 %vm7336_vm3, %v7337_v44  ;;  %6692 = vmatpush3.msra.mxu0 %v2970_v10 }
 0x561   :  { %6701 = vmatprep.subr.mxu0 %v7337_v44 }
 0x56d   :  { %v8956_v53 = vpop.f32.mrb[52].mxu1 }
 0x56e   :  { %v6620_v56 = vpop.f32.mrb[53].mxu1 }
 0x57d   :  { %v2212_v28 = vpop.permute.xlu0 %2211 }
 0x57e   :  { %v2260_v34 = vsel %vm2259_vm1, %v2212_v28, 0.0 }
 0x57f   :  { %2261 = vadd.xlane.f32.xlu0 %v2260_v34 }
 0x581   :  { %v2220_v27 = vpop.permute.xlu0 %2219 }
 0x582   :  { %v2272_v11 = vsel %vm2259_vm1, %v2220_v27, 0.0 }
 0x583   :  { %2270 = vadd.xlane.f32.xlu0 %v2269_v25 }
 0x585   :  { %v2224_v0 = vpop.permute.xlu0 %2223 }
 0x586   :  { %v2278_v54 = vsel %vm2259_vm1, %v2224_v0, 0.0 }
 0x587   :  { %2267 = vadd.xlane.f32.xlu0 %v2266_v15 }
 0x589   :  { %v2228_v49 = vpop.permute.xlu0 %2227 }
 0x58a   :  { %v2284_v60 = vsel %vm2259_vm1, %v2228_v49, 0.0 }
 0x58b   :  { %2273 = vadd.xlane.f32.xlu0 %v2272_v11 }
 0x58d   :  { %v2232_v4 = vpop.permute.xlu0 %2231 }
 0x58e   :  { %v2290_v57 = vsel %vm2259_vm1, %v2232_v4, 0.0 }
 0x58f   :  { %2279 = vadd.xlane.f32.xlu0 %v2278_v54 }
 0x591   :  { %v2236_v20 = vpop.permute.xlu0 %2235 }
 0x592   :  { %v2296_v41 = vsel %vm2259_vm1, %v2236_v20, 0.0 }
 0x593   :  { %2285 = vadd.xlane.f32.xlu0 %v2284_v60 }
 0x597   :  { %2291 = vadd.xlane.f32.xlu0 %v2290_v57 }
 0x59b   :  { %2297 = vadd.xlane.f32.xlu0 %v2296_v41 }
 0x5a8   :  { %v2240_v6 = vpop.permute.xlu0 %2239 }
 0x5a9   :  { %v2302_v58 = vsel %vm2259_vm1, %v2240_v6, 0.0 }
 0x5aa   :  { %2303 = vadd.xlane.f32.xlu0 %v2302_v58 }
 0x5ba   :  { %v2265_v39 = vpop.xlane.xlu1 %2264 }
 0x5bb   :  { %7171 = vrcp.f32 %v2265_v39 }
 0x5bc   :  { %v8969_v29 = vpop.f32.mrb[54].mxu0 }
 0x5bd   :  { %v6627_v50 = vpop.f32.mrb[55].mxu0 }
 0x5c5   :  { %v7172_v61 = vpop.eup %7171 }
 0x5c6   :  { %v2325_v5 = vmul.f32 %v7172_v61, %v2265_v39  ;;  %v2277_v62 = vpop.xlane.xlu1 %2276 }
 0x5c8   :  { %v2341_v35 = vsub.f32 2.0, %v2325_v5 }
 0x5ca   :  { %v2357_v43 = vmul.f32 %v7172_v61, %v2341_v35  ;;  %v2283_v10 = vpop.xlane.xlu1 %2282 }
 0x5cb   :  { %v8971_v30 = vpop.f32.mrb[54].mxu1 }
 0x5cc   :  { %v2373_v22 = vmul.f32 %v8811_v45, %v2357_v43  ;;  %v6634_v16 = vpop.f32.mrb[55].mxu1 }
 0x5ce   :  { %4625 = vrot.lane.b32.xlu1 %v2373_v22, %s7338_s6  ;;  %v2289_v47 = vpop.xlane.xlu1 %2288 }
 0x5d2   :  { %v2295_v31 = vpop.xlane.xlu1 %2294 }
 0x5d3   :  { %v8975_v1 = vpop.f32.mrb[56].mxu1 }
 0x5d4   :  { %v6648_v59 = vpop.f32.mrb[57].mxu1 }
 0x5d6   :  { %v2301_v54 = vpop.xlane.xlu1 %2300 }
 0x5db   :  { %v8977_v46 = vpop.f32.mrb[58].mxu1 }
 0x5dc   :  { %v6662_v48 = vpop.f32.mrb[59].mxu1 }
 0x5e2   :  { %v2307_v50 = vpop.xlane.xlu1 %2306 }
 0x5e3   :  { %v8979_v37 = vpop.f32.mrb[60].mxu1 }
 0x5e4   :  { %v6676_v63 = vpop.f32.mrb[61].mxu1 }
 0x5eb   :  { %v8981_v21 = vpop.f32.mrb[62].mxu1 }
 0x5ec   :  { %v6690_v23 = vpop.f32.mrb[63].mxu1 }
 0x60c   :  { %v2262_v26 = vpop.xlane.xlu0 %2261 }
 0x60d   :  { %7173 = vrcp.f32 %v2262_v26 }
 0x60e   :  { %7175 = vrcp.f32 %v2277_v62 }
 0x610   :  { %v2271_v45 = vpop.xlane.xlu0 %2270 }
 0x611   :  { %7177 = vrcp.f32 %v2271_v45 }
 0x612   :  { %7179 = vrcp.f32 %v2283_v10 }
 0x614   :  { %v2268_v52 = vpop.xlane.xlu0 %2267 }
 0x615   :  { %7181 = vrcp.f32 %v2268_v52 }
 0x616   :  { %7183 = vrcp.f32 %v2289_v47 }
 0x617   :  { %v7174_v51 = vpop.eup %7173 }
 0x618   :  { %v2324_v32 = vmul.f32 %v7174_v51, %v2262_v26  ;;  %v2274_v56 = vpop.xlane.xlu0 %2273  ;;  %v7176_v28 = vpop.eup %7175 }
 0x619   :  { %7185 = vrcp.f32 %v2274_v56  ;;  %v2329_v60 = vmul.f32 %v7176_v28, %v2277_v62 }
 0x61a   :  { %v2340_v34 = vsub.f32 2.0, %v2324_v32  ;;  %v8983_v27 = vpop.f32.mrb[56].mxu0  ;;  %7187 = vrcp.f32 %v2295_v31 }
 0x61b   :  { %v7178_v25 = vpop.eup %7177  ;;  %v6641_v0 = vpop.f32.mrb[57].mxu0  ;;  %v2345_v5 = vsub.f32 2.0, %v2329_v60 }
 0x61c   :  { %v2356_v15 = vmul.f32 %v7174_v51, %v2340_v34  ;;  %v2327_v11 = vmul.f32 %v7178_v25, %v2271_v45  ;;  %v2280_v49 = vpop.xlane.xlu0 %2279  ;;  %v7180_v4 = vpop.eup %7179 }
 0x61d   :  { %7189 = vrcp.f32 %v2280_v49  ;;  %v2331_v35 = vmul.f32 %v7180_v4, %v2283_v10  ;;  %v2361_v45 = vmul.f32 %v7176_v28, %v2345_v5 }
 0x61e   :  { %v2372_v57 = vmul.f32 %v8884_v40, %v2356_v15  ;;  %v2343_v20 = vsub.f32 2.0, %v2327_v11  ;;  %7191 = vrcp.f32 %v2301_v54 }
 0x61f   :  { %v7182_v41 = vpop.eup %7181  ;;  %v2377_v11 = vmul.f32 %v8826_v9, %v2361_v45 }
 0x620   :  { %v2359_v6 = vmul.f32 %v7178_v25, %v2343_v20  ;;  %v2326_v58 = vmul.f32 %v7182_v41, %v2268_v52  ;;  %4550 = vrot.lane.b32.xlu0 %v2372_v57, %s7338_s6  ;;  %v2286_v39 = vpop.xlane.xlu0 %2285  ;;  %v7184_v61 = vpop.eup %7183  ;;  %v2347_v52 = vsub.f32 2.0, %v2331_v35 }
 0x621   :  { %7193 = vrcp.f32 %v2286_v39  ;;  %v2333_v62 = vmul.f32 %v7184_v61, %v2289_v47 }
 0x622   :  { %v2375_v43 = vmul.f32 %v8816_v19, %v2359_v6  ;;  %v2342_v22 = vsub.f32 2.0, %v2326_v58  ;;  %v8988_v16 = vpop.f32.mrb[58].mxu0  ;;  %7195 = vrcp.f32 %v2307_v50  ;;  %v2363_v47 = vmul.f32 %v7180_v4, %v2347_v52 }
 0x623   :  { %v7186_v59 = vpop.eup %7185  ;;  %v6655_v40 = vpop.f32.mrb[59].mxu0  ;;  %v2349_v0 = vsub.f32 2.0, %v2333_v62 }
 0x624   :  { %v2358_v48 = vmul.f32 %v7182_v41, %v2342_v22  ;;  %v2328_v63 = vmul.f32 %v7186_v59, %v2274_v56  ;;  %4775 = vrot.lane.b32.xlu1 %v2375_v43, %s7338_s6  ;;  %v2292_v23 = vpop.xlane.xlu0 %2291  ;;  %v7188_v26 = vpop.eup %7187  ;;  %v2379_v5 = vmul.f32 %v8831_v33, %v2363_v47 }
 0x625   :  { %7197 = vrcp.f32 %v2292_v23  ;;  %v2335_v15 = vmul.f32 %v7188_v26, %v2295_v31 }
 0x626   :  { %v2374_v10 = vmul.f32 %v8821_v24, %v2358_v48  ;;  %v2344_v51 = vsub.f32 2.0, %v2328_v63 }
 0x627   :  { %v7190_v19 = vpop.eup %7189  ;;  %v2351_v31 = vsub.f32 2.0, %v2335_v15 }
 0x628   :  { %v2360_v32 = vmul.f32 %v7186_v59, %v2344_v51  ;;  %v2330_v34 = vmul.f32 %v7190_v19, %v2280_v49  ;;  %4700 = vrot.lane.b32.xlu1 %v2374_v10, %s7338_s6  ;;  %v2298_v25 = vpop.xlane.xlu0 %2297  ;;  %v7192_v56 = vpop.eup %7191  ;;  %v2365_v49 = vmul.f32 %v7184_v61, %v2349_v0 }
 0x629   :  { %7199 = vrcp.f32 %v2298_v25  ;;  %v2337_v9 = vmul.f32 %v7192_v56, %v2301_v54  ;;  %v2367_v59 = vmul.f32 %v7188_v26, %v2351_v31  ;;  %v9202_v31 = vld [vmem:[#allocation11_spill] sm:$0xff] }
 0x62a   :  { %v2376_v60 = vmul.f32 %v8890_v2, %v2360_v32  ;;  %v2346_v28 = vsub.f32 2.0, %v2330_v34  ;;  %v8995_v57 = vpop.f32.mrb[60].mxu0 }
 0x62b   :  { %v7194_v24 = vpop.eup %7193  ;;  %v6669_v20 = vpop.f32.mrb[61].mxu0  ;;  %v2353_v40 = vsub.f32 2.0, %v2337_v9 }
 0x62c   :  { %v2362_v41 = vmul.f32 %v7190_v19, %v2346_v28  ;;  %v2332_v6 = vmul.f32 %v7194_v24, %v2286_v39  ;;  %4925 = vrot.lane.b32.xlu1 %v2377_v11, %s7338_s6  ;;  %4850 = vrot.lane.b32.xlu0 %v2376_v60, %s7338_s6  ;;  %v7196_v58 = vpop.eup %7195  ;;  %v2381_v39 = vmul.f32 %v8836_v38, %v2365_v49  ;;  %v7339_v60 = vmov 1983009808  }
 0x62d   :  { %v2339_v61 = vmul.f32 %v7196_v58, %v2307_v50  ;;  %v2369_v52 = vmul.f32 %v7192_v56, %v2353_v40  ;;  %v5752_v28 = vunpack.c.l.s4 %v7339_v60 }
 0x62e   :  { %v2378_v4 = vmul.f32 %v8897_v3, %v2362_v41  ;;  %v2348_v2 = vsub.f32 2.0, %v2332_v6 }
 0x62f   :  { %v7198_v35 = vpop.eup %7197  ;;  %v2355_v38 = vsub.f32 2.0, %v2339_v61  ;;  %v2385_v51 = vmul.f32 %v8847_v14, %v2369_v52  ;;  %v5753_v20 = vunpack.c.0.s8 %v5752_v28 }
 0x630   :  { %v2364_v43 = vmul.f32 %v7194_v24, %v2348_v2  ;;  %v2334_v22 = vmul.f32 %v7198_v35, %v2292_v23  ;;  %5075 = vrot.lane.b32.xlu1 %v2379_v5, %s7338_s6  ;;  %5000 = vrot.lane.b32.xlu0 %v2378_v4, %s7338_s6  ;;  %v2383_v23 = vmul.f32 %v8841_v12, %v2367_v59 }
 0x631   :  { %v2371_v19 = vmul.f32 %v7196_v58, %v2355_v38  ;;  %v9092_v58 = vsub.s32 %v5753_v20, %v9202_v31 }
 0x632   :  { %v2380_v48 = vmul.f32 %v8902_v8, %v2364_v43  ;;  %v2350_v63 = vsub.f32 2.0, %v2334_v22  ;;  %v9005_v33 = vpop.f32.mrb[62].mxu0 }
 0x633   :  { %v7200_v54 = vpop.eup %7199  ;;  %v6683_v3 = vpop.f32.mrb[63].mxu0  ;;  %v2387_v12 = vmul.f32 %v8855_v17, %v2371_v19 }
 0x634   :  { %v2366_v62 = vmul.f32 %v7198_v35, %v2350_v63  ;;  %v2336_v45 = vmul.f32 %v7200_v54, %v2298_v25  ;;  %5225 = vrot.lane.b32.xlu1 %v2381_v39, %s7338_s6  ;;  %5150 = vrot.lane.b32.xlu0 %v2380_v48, %s7338_s6  ;;  %v7340_v39 = vmov 1934713408  }
 0x635   :  { %v5816_v59 = vunpack.c.l.s4 %v7340_v39 }
 0x636   :  { %v2382_v26 = vmul.f32 %v8909_v36, %v2366_v62  ;;  %v2352_v50 = vsub.f32 2.0, %v2336_v45 }
 0x637   :  { %v2304_v10 = vpop.xlane.xlu0 %2303  ;;  %v5817_v45 = vunpack.c.0.s8 %v5816_v59 }
 0x638   :  { %v2368_v8 = vmul.f32 %v7200_v54, %v2352_v50  ;;  %7201 = vrcp.f32 %v2304_v10  ;;  %5375 = vrot.lane.b32.xlu1 %v2383_v23, %s7338_s6  ;;  %5300 = vrot.lane.b32.xlu0 %v2382_v26, %s7338_s6 }
 0x63a   :  { %v2384_v32 = vmul.f32 %v8913_v55, %v2368_v8 }
 0x63c   :  { %5525 = vrot.lane.b32.xlu1 %v2385_v51, %s7338_s6  ;;  %5450 = vrot.lane.b32.xlu0 %v2384_v32, %s7338_s6 }
 0x640   :  { %5675 = vrot.lane.b32.xlu1 %v2387_v12, %s7338_s6  ;;  %v4626_v36 = vpop.permute.xlu1 %4625 }
 0x641   :  { %6699 = vmatmul.mubr.msk.f32.vlgmr.msra.gmra.mrb[64].mxu1 %vm2259_vm1, %v4626_v36 }
 0x642   :  { %v7202_v34 = vpop.eup %7201  ;;  %6707 = vmatpush3.msra.mxu1 %v8952_v42  ;;  %6708 = vmatprep.mubr.msk.f32.mxu1 %vm7336_vm3, %v7337_v44 }
 0x643   :  { %v2338_v14 = vmul.f32 %v7202_v34, %v2304_v10  ;;  %6716 = vmatprep.subr.mxu1 %v7337_v44 }
 0x645   :  { %v2354_v55 = vsub.f32 2.0, %v2338_v14 }
 0x647   :  { %v2370_v25 = vmul.f32 %v7202_v34, %v2354_v55  ;;  %v9103_v34 = vsub.s32 %v5817_v45, %v9202_v31 }
 0x649   :  { %v2386_v0 = vmul.f32 %v8923_v13, %v2370_v25 }
 0x64b   :  { %5600 = vrot.lane.b32.xlu0 %v2386_v0, %s7338_s6 }
 0x692   :  { %v4551_v17 = vpop.permute.xlu0 %4550 }
 0x693   :  { %6694 = vmatmul.mubr.msk.f32.vlgmr.msra.gmra.mrb[64].mxu0 %vm2259_vm1, %v4551_v17 }
 0x694   :  { %6702 = vmatpush3.msra.mxu0 %v8949_v7  ;;  %6703 = vmatprep.mubr.msk.f32.mxu0 %vm7336_vm3, %v7337_v44 }
 0x695   :  { %6711 = vmatprep.subr.mxu0 %v7337_v44 }
 0x696   :  { %v4776_v42 = vpop.permute.xlu1 %4775 }
 0x697   :  { %6709 = vmatmul.mubr.msk.f32.vlgmr.msra.gmra.mrb[66].mxu1 %vm2259_vm1, %v4776_v42 }
 0x698   :  { %6717 = vmatpush3.msra.mxu1 %v8956_v53  ;;  %6718 = vmatprep.mubr.msk.f32.mxu1 %vm7336_vm3, %v7337_v44 }
 0x699   :  { %6726 = vmatprep.subr.mxu1 %v7337_v44 }
 0x69a   :  { %v4701_v13 = vpop.permute.xlu1 %4700 }
 0x69b   :  { %6704 = vmatmul.mubr.msk.f32.vlgmr.msra.gmra.mrb[66].mxu0 %vm2259_vm1, %v4701_v13 }
 0x69c   :  { %6712 = vmatpush3.msra.mxu0 %v8954_v18  ;;  %6713 = vmatprep.mubr.msk.f32.mxu0 %vm7336_vm3, %v7337_v44 }
 0x69d   :  { %6721 = vmatprep.subr.mxu0 %v7337_v44 }
 0x69e   :  { %v4926_v7 = vpop.permute.xlu1 %4925  ;;  %v4851_v15 = vpop.permute.xlu0 %4850 }
 0x69f   :  { %6714 = vmatmul.mubr.msk.f32.vlgmr.msra.gmra.mrb[68].mxu0 %vm2259_vm1, %v4851_v15  ;;  %6719 = vmatmul.mubr.msk.f32.vlgmr.msra.gmra.mrb[68].mxu1 %vm2259_vm1, %v4926_v7 }
 0x6a0   :  { %6722 = vmatpush3.msra.mxu0 %v8969_v29  ;;  %6727 = vmatpush3.msra.mxu1 %v8971_v30 }
 0x6a1   :  { %6728 = vmatprep.mubr.msk.f32.mxu1 %vm7336_vm3, %v7337_v44  ;;  %6736 = vmatprep.subr.mxu1 %v7337_v44 }
 0x6a2   :  { %v5076_v18 = vpop.permute.xlu1 %5075  ;;  %6723 = vmatprep.mubr.msk.f32.mxu0 %vm7336_vm3, %v7337_v44  ;;  %6731 = vmatprep.subr.mxu0 %v7337_v44  ;;  %v5001_v53 = vpop.permute.xlu0 %5000 }
 0x6a3   :  { %6724 = vmatmul.mubr.msk.f32.vlgmr.msra.gmra.mrb[70].mxu0 %vm2259_vm1, %v5001_v53  ;;  %6729 = vmatmul.mubr.msk.f32.vlgmr.msra.gmra.mrb[70].mxu1 %vm2259_vm1, %v5076_v18 }
 0x6a4   :  { %6732 = vmatpush3.msra.mxu0 %v8983_v27  ;;  %6737 = vmatpush3.msra.mxu1 %v8975_v1 }
 0x6a5   :  { %6738 = vmatprep.mubr.msk.f32.mxu1 %vm7336_vm3, %v7337_v44  ;;  %6746 = vmatprep.subr.mxu1 %v7337_v44 }
 0x6a6   :  { %v5226_v29 = vpop.permute.xlu1 %5225  ;;  %6733 = vmatprep.mubr.msk.f32.mxu0 %vm7336_vm3, %v7337_v44  ;;  %6741 = vmatprep.subr.mxu0 %v7337_v44  ;;  %v5151_v30 = vpop.permute.xlu0 %5150 }
 0x6a7   :  { %6734 = vmatmul.mubr.msk.f32.vlgmr.msra.gmra.mrb[72].mxu0 %vm2259_vm1, %v5151_v30  ;;  %6739 = vmatmul.mubr.msk.f32.vlgmr.msra.gmra.mrb[72].mxu1 %vm2259_vm1, %v5226_v29 }
 0x6a8   :  { %6742 = vmatpush3.msra.mxu0 %v8988_v16  ;;  %6747 = vmatpush3.msra.mxu1 %v8977_v46 }
 0x6a9   :  { %6748 = vmatprep.mubr.msk.f32.mxu1 %vm7336_vm3, %v7337_v44  ;;  %6756 = vmatprep.subr.mxu1 %v7337_v44 }
 0x6aa   :  { %v5376_v1 = vpop.permute.xlu1 %5375  ;;  %6743 = vmatprep.mubr.msk.f32.mxu0 %vm7336_vm3, %v7337_v44  ;;  %6751 = vmatprep.subr.mxu0 %v7337_v44  ;;  %v5301_v27 = vpop.permute.xlu0 %5300 }
 0x6ab   :  { %6744 = vmatmul.mubr.msk.f32.vlgmr.msra.gmra.mrb[74].mxu0 %vm2259_vm1, %v5301_v27  ;;  %6749 = vmatmul.mubr.msk.f32.vlgmr.msra.gmra.mrb[74].mxu1 %vm2259_vm1, %v5376_v1 }
 0x6ac   :  { %6752 = vmatpush3.msra.mxu0 %v8995_v57  ;;  %6757 = vmatpush3.msra.mxu1 %v8979_v37 }
 0x6ad   :  { %6758 = vmatprep.mubr.msk.f32.mxu1 %vm7336_vm3, %v7337_v44  ;;  %6766 = vmatprep.subr.mxu1 %v7337_v44 }
 0x6ae   :  { %v5526_v46 = vpop.permute.xlu1 %5525  ;;  %6753 = vmatprep.mubr.msk.f32.mxu0 %vm7336_vm3, %v7337_v44  ;;  %6761 = vmatprep.subr.mxu0 %v7337_v44  ;;  %v5451_v16 = vpop.permute.xlu0 %5450 }
 0x6af   :  { %6754 = vmatmul.mubr.msk.f32.vlgmr.msra.gmra.mrb[76].mxu0 %vm2259_vm1, %v5451_v16  ;;  %6759 = vmatmul.mubr.msk.f32.vlgmr.msra.gmra.mrb[76].mxu1 %vm2259_vm1, %v5526_v46 }
 0x6b0   :  { %6762 = vmatpush3.msra.mxu0 %v9005_v33  ;;  %6767 = vmatpush3.msra.mxu1 %v8981_v21 }
 0x6b1   :  { %6768 = vmatprep.mubr.msk.f32.mxu1 %vm7336_vm3, %v7337_v44  ;;  %6763 = vmatprep.mubr.msk.f32.mxu0 %vm7336_vm3, %v7337_v44 }
 0x6b2   :  { %v5676_v37 = vpop.permute.xlu1 %5675 }
 0x6b3   :  { %6769 = vmatmul.mubr.msk.f32.vlgmr.msra.gmra.mrb[78].mxu1 %vm2259_vm1, %v5676_v37 }
 0x6bd   :  { %v5601_v56 = vpop.permute.xlu0 %5600 }
 0x6be   :  { %6764 = vmatmul.mubr.msk.f32.vlgmr.msra.gmra.mrb[78].mxu0 %vm2259_vm1, %v5601_v56 }
 0x714   :  { %v4695_v11 = vpop.f32.mrb[64].mxu1 }
 0x715   :  { %v6700_v47 = vpop.f32.mrb[65].mxu1 }
 0x766   :  { %v4620_v57 = vpop.f32.mrb[64].mxu0 }
 0x767   :  { %v6695_v24 = vpop.f32.mrb[65].mxu0 }
 0x76a   :  { %v4845_v21 = vpop.f32.mrb[66].mxu1 }
 0x76b   :  { %v5765_v41 = vcombine.low %v4695_v11, %v4845_v21  ;;  %v5766_v6 = vcombine.high %v4695_v11, %v4845_v21  ;;  %v6710_v49 = vpop.f32.mrb[67].mxu1 }
 0x76d   :  { %v5773_v2 = vrot.slane %v5765_v41, %v9092_v58  ;;  %v5780_v35 = vrot.slane %v5766_v6, %v9092_v58 }
 0x76e   :  { %v4770_v44 = vpop.f32.mrb[66].mxu0 }
 0x76f   :  { %v5749_v5 = vcombine.low %v4620_v57, %v4770_v44  ;;  %v5750_v9 = vcombine.high %v4620_v57, %v4770_v44  ;;  %v6705_v4 = vpop.f32.mrb[67].mxu0 }
 0x771   :  { %v5757_v43 = vrot.slane %v5749_v5, %v9092_v58  ;;  %v5764_v22 = vrot.slane %v5750_v9, %v9092_v58 }
 0x772   :  { %v4920_v40 = vpop.f32.mrb[68].mxu0  ;;  %v4995_v61 = vpop.f32.mrb[68].mxu1 }
 0x773   :  { %v5813_v48 = vcombine.low %v5757_v43, %v5773_v2  ;;  %v5814_v63 = vcombine.high %v5757_v43, %v5773_v2  ;;  %v5829_v33 = vcombine.low %v5764_v22, %v5780_v35  ;;  %v5830_v54 = vcombine.high %v5764_v22, %v5780_v35  ;;  %v6715_v3 = vpop.f32.mrb[69].mxu0  ;;  %v6720_v62 = vpop.f32.mrb[69].mxu1 }
 0x775   :  { %v9114_v30 = vrot.slane %v5813_v48, %v9103_v34  ;;  %v5828_v1 = vrot.slane %v5814_v63, %v9103_v34  ;;  %v9118_v27 = vrot.slane %v5829_v33, %v9103_v34  ;;  %v5844_v46 = vrot.slane %v5830_v54, %v9103_v34 }
 0x776   :  { %v5070_v23 = vpop.f32.mrb[70].mxu0  ;;  %v5145_v52 = vpop.f32.mrb[70].mxu1 }
 0x777   :  { %v5781_v38 = vcombine.low %v4920_v40, %v5070_v23  ;;  %v5782_v26 = vcombine.high %v4920_v40, %v5070_v23  ;;  %v5797_v50 = vcombine.low %v4995_v61, %v5145_v52  ;;  %v5798_v10 = vcombine.high %v4995_v61, %v5145_v52  ;;  %v6725_v8 = vpop.f32.mrb[71].mxu0  ;;  %v6730_v51 = vpop.f32.mrb[71].mxu1 }
 0x779   :  { %v5789_v19 = vrot.slane %v5781_v38, %v9092_v58  ;;  %v5796_v32 = vrot.slane %v5782_v26, %v9092_v58  ;;  %v5805_v12 = vrot.slane %v5797_v50, %v9092_v58  ;;  %v5812_v36 = vrot.slane %v5798_v10, %v9092_v58 }
 0x77a   :  { %v5220_v14 = vpop.f32.mrb[72].mxu0  ;;  %v5295_v55 = vpop.f32.mrb[72].mxu1 }
 0x77b   :  { %v5845_v25 = vcombine.low %v5789_v19, %v5805_v12  ;;  %v5846_v0 = vcombine.high %v5789_v19, %v5805_v12  ;;  %v5861_v17 = vcombine.low %v5796_v32, %v5812_v36  ;;  %v5862_v42 = vcombine.high %v5796_v32, %v5812_v36  ;;  %v6735_v13 = vpop.f32.mrb[73].mxu0  ;;  %v6740_v7 = vpop.f32.mrb[73].mxu1 }
 0x77d   :  { %v9106_v15 = vrot.slane %v5845_v25, %v9103_v34  ;;  %v5860_v18 = vrot.slane %v5846_v0, %v9103_v34  ;;  %v9110_v53 = vrot.slane %v5861_v17, %v9103_v34  ;;  %v5876_v29 = vrot.slane %v5862_v42, %v9103_v34 }
 0x77e   :  { %v5370_v16 = vpop.f32.mrb[74].mxu0  ;;  %v5445_v37 = vpop.f32.mrb[74].mxu1 }
 0x77f   :  { %v5885_v56 = vcombine.low %v5220_v14, %v5370_v16  ;;  %v5886_v11 = vcombine.high %v5220_v14, %v5370_v16  ;;  %v5901_v47 = vcombine.low %v5295_v55, %v5445_v37  ;;  %v5902_v60 = vcombine.high %v5295_v55, %v5445_v37  ;;  %v6745_v28 = vpop.f32.mrb[75].mxu0  ;;  %v6750_v57 = vpop.f32.mrb[75].mxu1 }
 0x780   :  { %v5878_v24 = vcombine.high %v9114_v30, %v9106_v15  ;;  %v5882_v20 = vcombine.high %v9118_v27, %v9110_v53  ;;  %v5879_v21 = vcombine.low %v5828_v1, %v5860_v18  ;;  %v5883_v41 = vcombine.low %v5844_v46, %v5876_v29 }
 0x781   :  { %v5893_v6 = vrot.slane %v5885_v56, %v9092_v58  ;;  %v5900_v49 = vrot.slane %v5886_v11, %v9092_v58  ;;  %v5909_v31 = vrot.slane %v5901_v47, %v9092_v58  ;;  %v5916_v44 = vrot.slane %v5902_v60, %v9092_v58 }
 0x782   :  { %6023 = vrot.lane.b32.xlu0 %v5878_v24, %s7341_s25  ;;  %v5520_v5 = vpop.f32.mrb[76].mxu0  ;;  %v5595_v9 = vpop.f32.mrb[76].mxu1  ;;  %v5880_v4 = vcombine.high %v5828_v1, %v5860_v18  ;;  %v5884_v2 = vcombine.high %v5844_v46, %v5876_v29  ;;  %v5877_v35 = vcombine.low %v9114_v30, %v9106_v15  ;;  %v5881_v43 = vcombine.low %v9118_v27, %v9110_v53 }
 0x783   :  { %v5949_v22 = vcombine.low %v5893_v6, %v5909_v31  ;;  %v5950_v39 = vcombine.high %v5893_v6, %v5909_v31  ;;  %v5965_v59 = vcombine.low %v5900_v49, %v5916_v44  ;;  %v5966_v40 = vcombine.high %v5900_v49, %v5916_v44  ;;  %v6755_v61 = vpop.f32.mrb[77].mxu0  ;;  %v6760_v48 = vpop.f32.mrb[77].mxu1 }
 0x785   :  { %v5957_v12 = vrot.slane %v5949_v22, %v9103_v34  ;;  %v5964_v36 = vrot.slane %v5950_v39, %v9103_v34  ;;  %v5973_v14 = vrot.slane %v5965_v59, %v9103_v34  ;;  %v5980_v55 = vrot.slane %v5966_v40, %v9103_v34 }
 0x786   :  { %6047 = vrot.lane.b32.xlu0 %v5882_v20, %s7341_s25  ;;  %v5745_v63 = vpop.f32.mrb[78].mxu1 }
 0x787   :  { %v5933_v33 = vcombine.low %v5595_v9, %v5745_v63  ;;  %v5934_v54 = vcombine.high %v5595_v9, %v5745_v63  ;;  %v6770_v3 = vpop.f32.mrb[79].mxu1 }
 0x789   :  { %v5941_v38 = vrot.slane %v5933_v33, %v9092_v58  ;;  %v5948_v26 = vrot.slane %v5934_v54, %v9092_v58 }
 0x78a   :  { %6031 = vrot.lane.b32.xlu0 %v5879_v21, %s7342_s1 }
 0x78e   :  { %6055 = vrot.lane.b32.xlu0 %v5883_v41, %s7342_s1 }
 0x791   :  { %v5670_v62 = vpop.f32.mrb[78].mxu0 }
 0x792   :  { %6039 = vrot.lane.b32.xlu0 %v5880_v4, %s7343_s26  ;;  %v5917_v45 = vcombine.low %v5520_v5, %v5670_v62  ;;  %v5918_v23 = vcombine.high %v5520_v5, %v5670_v62  ;;  %v6765_v52 = vpop.f32.mrb[79].mxu0 }
 0x794   :  { %v5925_v50 = vrot.slane %v5917_v45, %v9092_v58  ;;  %v5932_v10 = vrot.slane %v5918_v23, %v9092_v58 }
 0x796   :  { %v5981_v8 = vcombine.low %v5925_v50, %v5941_v38  ;;  %v5982_v51 = vcombine.high %v5925_v50, %v5941_v38  ;;  %v5997_v19 = vcombine.low %v5932_v10, %v5948_v26  ;;  %v5998_v32 = vcombine.high %v5932_v10, %v5948_v26  ;;  %6063 = vrot.lane.b32.xlu0 %v5884_v2, %s7343_s26 }
 0x798   :  { %v5989_v25 = vrot.slane %v5981_v8, %v9103_v34  ;;  %v5996_v0 = vrot.slane %v5982_v51, %v9103_v34  ;;  %v6005_v58 = vrot.slane %v5997_v19, %v9103_v34  ;;  %v6012_v17 = vrot.slane %v5998_v32, %v9103_v34 }
 0x79a   :  { %v6014_v42 = vcombine.high %v5957_v12, %v5989_v25  ;;  %v6018_v13 = vcombine.high %v5973_v14, %v6005_v58  ;;  %v6015_v7 = vcombine.low %v5964_v36, %v5996_v0  ;;  %v6019_v15 = vcombine.low %v5980_v55, %v6012_v17 }
 0x79b   :  { %v6016_v18 = vcombine.high %v5964_v36, %v5996_v0  ;;  %v6020_v29 = vcombine.high %v5980_v55, %v6012_v17  ;;  %v6013_v30 = vcombine.low %v5957_v12, %v5989_v25  ;;  %v6017_v1 = vcombine.low %v5973_v14, %v6005_v58 }
 0x79c   :  { %6025 = vrot.lane.b32.xlu1 %v6014_v42, %s7341_s25 }
 0x7a0   :  { %6049 = vrot.lane.b32.xlu1 %v6018_v13, %s7341_s25 }
 0x7a4   :  { %6033 = vrot.lane.b32.xlu1 %v6015_v7, %s7342_s1 }
 0x7a8   :  { %6057 = vrot.lane.b32.xlu1 %v6019_v15, %s7342_s1 }
 0x7ac   :  { %6041 = vrot.lane.b32.xlu1 %v6016_v18, %s7343_s26 }
 0x7b0   :  { %6065 = vrot.lane.b32.xlu1 %v6020_v29, %s7343_s26 }
 0x7f4   :  { %v6024_v34 = vpop.permute.xlu0 %6023 }
 0x7f5   :  { %v6069_v56 = vsel %vm114_vm0, %v5877_v35, %v6024_v34 }
 0x7f8   :  { %v6048_v46 = vpop.permute.xlu0 %6047 }
 0x7f9   :  { %v6077_v28 = vsel %vm114_vm0, %v5881_v43, %v6048_v46 }
 0x7fc   :  { %v6032_v16 = vpop.permute.xlu0 %6031 }
 0x7fd   :  { %v6072_v11 = vsel %vm6071_vm5, %v6069_v56, %v6032_v16 }
 0x800   :  { %v6056_v37 = vpop.permute.xlu0 %6055 }
 0x801   :  { %v6079_v57 = vsel %vm6071_vm5, %v6077_v28, %v6056_v37 }
 0x804   :  { %v6040_v47 = vpop.permute.xlu0 %6039 }
 0x805   :  { %v6075_v60 = vsel %vm6074_vm6, %v6072_v11, %v6040_v47 }
 0x806   :  { %6083 = vst [vmem:[#allocation7] sm:$0xff] %v6075_v60 }
 0x808   :  { %v6064_v24 = vpop.permute.xlu0 %6063 }
 0x809   :  { %v6081_v20 = vsel %vm6074_vm6, %v6079_v57, %v6064_v24 }
 0x80a   :  { %6084 = vst [vmem:[#allocation7 + $0x8] sm:$0xff] %v6081_v20 }
 0x80e   :  { %v6026_v21 = vpop.permute.xlu1 %6025 }
 0x80f   :  { %v6070_v31 = vsel %vm114_vm0, %v6013_v30, %v6026_v21 }
 0x812   :  { %v6050_v41 = vpop.permute.xlu1 %6049 }
 0x813   :  { %v6078_v53 = vsel %vm114_vm0, %v6017_v1, %v6050_v41 }
 0x816   :  { %v6034_v6 = vpop.permute.xlu1 %6033 }
 0x817   :  { %v6073_v44 = vsel %vm6071_vm5, %v6070_v31, %v6034_v6 }
 0x81a   :  { %v6058_v49 = vpop.permute.xlu1 %6057 }
 0x81b   :  { %v6080_v27 = vsel %vm6071_vm5, %v6078_v53, %v6058_v49 }
 0x81e   :  { %v6042_v5 = vpop.permute.xlu1 %6041 }
 0x81f   :  { %v6076_v9 = vsel %vm6074_vm6, %v6073_v44, %v6042_v5 }
 0x820   :  { %6085 = vst [vmem:[#allocation7 + $0x10] sm:$0xff] %v6076_v9 }
 0x822   :  { %v6066_v4 = vpop.permute.xlu1 %6065 }
 0x823   :  { %v6082_v2 = vsel %vm6074_vm6, %v6080_v27, %v6066_v4 }
 0x824   :  { %6086 = vst [vmem:[#allocation7 + $0x18] sm:$0xff] %v6082_v2 }
 0x825   :  { %7314 = shalt.err (!%p7311_p6)
}
 0x826   :  { %s7315_s9 = scalar_lea.hbm %s9191_s7, 512 }
 0x827   :  { %p7316_p7 = scmp.ne.s32.totalorder %s9191_s7, %s7315_s9  ;;  %p7319_p8 = scmp.lt.u32.totalorder %s7315_s9, %s9191_s7 }
 0x829   :  { %p7321_p9 = pnand %p7319_p8, %p7316_p7 }
 0x82b   :  { %7324 = shalt.err (!%p7321_p9)
}
 0x82c   :  { %s7345_s13 = smov 256   ;;  %s7346_s14 = smov 16  }
 0x82d   :  { %6098 = dma.vmem_to_hbm [thread:$0]  %s6093_s28, 512, %s9191_s7, [#allocation4], %s7345_s13, %s7345_s13, %s7346_s14  }
 0x82e   :  { %7329 = dma.done.wait [#allocation4], 512  }
 0x82f   :  { %7330 = vsyncadd [#allocation4], 4294966784 }
 0x830   :  { %6102 = vsyncpa [#allocation3], 1 }
 0x831   :  { %6103 = vsyncpa [#allocation6], 1 }
 0x832   :  { %6104 = vsyncpa [#allocation4], 1 }

</bundles_post_ra>
